<compile_context>
chip_gen: v5e
topology: v5e:2x2
jax: 0.10.0
libtpu: 0.0.40
codegen_flags: <defaults>
</compile_context>

<pallas_src>
import functools

import jax
import jax.numpy as jnp
from jax import lax
from jax.experimental import pallas as pl
from jax.experimental.pallas import tpu as pltpu

EPS = 1e-5
LANE = 128
VMEM_LIMIT = 48 * 1024 * 1024   # fits v7x (64 MiB physical) with headroom


def _round_up(x, m):
    return (x + m - 1) // m * m


def _compiler_params():
    return pltpu.CompilerParams(
        dimension_semantics=("parallel",),      # batch axis -> 2 TCs on v7x, no-op on v5e/v6e
        vmem_limit_bytes=VMEM_LIMIT,
    )


# ------------------------------------------------------------------ kernel 1:
# conv1 (3x3 / stride s) + 1x1/s shortcut conv + per-tile BN partial stats.

def _k1_call(xph, w1, we, *, s, PH, OH, OW):
    N = xph.shape[0]
    PW, Cinp = xph.shape[2], xph.shape[3]
    Cp = w1.shape[2]
    M = OH * OW

    # tap (ky,kx) of a stride-s 3x3 conv reads a contiguous slice of phase (ky%s, kx%s)
    taps = []
    for ky in range(3):
        for kx in range(3):
            p = (ky % s) * s + (kx % s)
            taps.append((ky * 3 + kx, p * PH + ky // s, kx // s))
    # the 1x1/s shortcut reads x[s*oy, s*ox] == padded-x[s*oy+1, s*ox+1]
    er0 = ((1 % s) * s + (1 % s)) * PH + 1 // s
    ec0 = 1 // s

    def kernel(xph_ref, w1_ref, we_ref, y1_ref, ye_ref, st1_ref, ste_ref):
        # conv1: 9 shifted matmuls, bf16 operands, f32 accumulation on the MXU
        acc1 = jnp.zeros((M, Cp), jnp.float32)
        for t, r0, c0 in taps:
            a = xph_ref[0, r0:r0 + OH, c0:c0 + OW, :].reshape(M, Cinp)
            acc1 = acc1 + jnp.dot(a, w1_ref[t], preferred_element_type=jnp.float32)
        y1_ref[0] = acc1
        st1_ref[0, 0:1, :] = jnp.sum(acc1, axis=0, keepdims=True)
        st1_ref[0, 1:2, :] = jnp.sum(acc1 * acc1, axis=0, keepdims=True)

        # shortcut: 1x1 / stride-s conv == one matmul on the strided phase slice
        ae = xph_ref[0, er0:er0 + OH, ec0:ec0 + OW, :].reshape(M, Cinp)
        acce = jnp.dot(ae, we_ref[...], preferred_element_type=jnp.float32)
        ye_ref[0] = acce
        ste_ref[0, 0:1, :] = jnp.sum(acce, axis=0, keepdims=True)
        ste_ref[0, 1:2, :] = jnp.sum(acce * acce, axis=0, keepdims=True)

    flops = 2 * N * M * Cinp * Cp * (9 + 1)
    bytes_accessed = (xph.size * 2 + w1.size * 2 + we.size * 2
                      + 2 * N * M * Cp * 4 + 2 * N * 2 * Cp * 4)

    return pl.pallas_call(
        kernel,
        grid=(N,),
        in_specs=[
            pl.BlockSpec((1, s * s * PH, PW, Cinp), lambda n: (n, 0, 0, 0)),
            pl.BlockSpec((9, Cinp, Cp), lambda n: (0, 0, 0)),
            pl.BlockSpec((Cinp, Cp), lambda n: (0, 0)),
        ],
        out_specs=[
            pl.BlockSpec((1, M, Cp), lambda n: (n, 0, 0)),
            pl.BlockSpec((1, M, Cp), lambda n: (n, 0, 0)),
            pl.BlockSpec((1, 2, Cp), lambda n: (n, 0, 0)),
            pl.BlockSpec((1, 2, Cp), lambda n: (n, 0, 0)),
        ],
        out_shape=(
            jax.ShapeDtypeStruct((N, M, Cp), jnp.float32),   # y1 (pre-BN conv1)
            jax.ShapeDtypeStruct((N, M, Cp), jnp.float32),   # ye (pre-BN shortcut)
            jax.ShapeDtypeStruct((N, 2, Cp), jnp.float32),   # [sum, sumsq] for bn1
            jax.ShapeDtypeStruct((N, 2, Cp), jnp.float32),   # [sum, sumsq] for bn_e
        ),
        compiler_params=_compiler_params(),
        cost_estimate=pl.CostEstimate(flops=flops, transcendentals=0,
                                      bytes_accessed=bytes_accessed),
    )(xph, w1, we)


# ------------------------------------------------------------------ kernel 2:
# bn1 + ReLU (fused, never hits HBM) + conv2 (3x3/1) + per-tile BN2 partial stats.

def _k2_call(y1, bn1, w2, *, OH, OW):
    N, M, Cp = y1.shape
    OHp, OWp = OH + 2, OW + 2

    def kernel(y1_ref, bn1_ref, w2_ref, y2_ref, st2_ref, o1p_ref):
        scale = bn1_ref[0:1, :]
        shift = bn1_ref[1:2, :]
        out1 = jnp.maximum(y1_ref[0] * scale + shift, 0.0)        # (M, Cp) f32

        # zero-halo tile in VMEM scratch implements conv2's padding=1
        o1p_ref[...] = jnp.zeros((OHp, OWp, Cp), jnp.float32)
        o1p_ref[1:OH + 1, 1:OW + 1, :] = out1.reshape(OH, OW, Cp)

        acc2 = jnp.zeros((M, Cp), jnp.float32)
        for ky in range(3):
            for kx in range(3):
                a = o1p_ref[ky:ky + OH, kx:kx + OW, :].reshape(M, Cp)
                acc2 = acc2 + jnp.dot(a.astype(jnp.bfloat16), w2_ref[ky * 3 + kx],
                                      preferred_element_type=jnp.float32)
        y2_ref[0] = acc2
        st2_ref[0, 0:1, :] = jnp.sum(acc2, axis=0, keepdims=True)
        st2_ref[0, 1:2, :] = jnp.sum(acc2 * acc2, axis=0, keepdims=True)

    flops = 2 * N * M * Cp * Cp * 9
    bytes_accessed = (y1.size * 4 + bn1.size * 4 + w2.size * 2
                      + N * M * Cp * 4 + N * 2 * Cp * 4)

    return pl.pallas_call(
        kernel,
        grid=(N,),
        in_specs=[
            pl.BlockSpec((1, M, Cp), lambda n: (n, 0, 0)),
            pl.BlockSpec((2, Cp), lambda n: (0, 0)),
            pl.BlockSpec((9, Cp, Cp), lambda n: (0, 0, 0)),
        ],
        out_specs=[
            pl.BlockSpec((1, M, Cp), lambda n: (n, 0, 0)),
            pl.BlockSpec((1, 2, Cp), lambda n: (n, 0, 0)),
        ],
        out_shape=(
            jax.ShapeDtypeStruct((N, M, Cp), jnp.float32),   # y2 (pre-BN conv2)
            jax.ShapeDtypeStruct((N, 2, Cp), jnp.float32),   # [sum, sumsq] for bn2
        ),
        scratch_shapes=[pltpu.VMEM((OHp, OWp, Cp), jnp.float32)],
        compiler_params=_compiler_params(),
        cost_estimate=pl.CostEstimate(flops=flops, transcendentals=0,
                                      bytes_accessed=bytes_accessed),
    )(y1, bn1, w2)


# ------------------------------------------------------------------ kernel 3:
# bn2(y2) + bn_e(ye) + add + ReLU (pure elementwise, lane-dense output slab).

def _k3_call(y2, ye, bn23):
    N, M, Cp = y2.shape

    def kernel(y2_ref, ye_ref, bn_ref, out_ref):
        main = y2_ref[0] * bn_ref[0:1, :] + bn_ref[1:2, :]
        res = ye_ref[0] * bn_ref[2:3, :] + bn_ref[3:4, :]
        out_ref[0] = jnp.maximum(main + res, 0.0)

    bytes_accessed = y2.size * 4 + ye.size * 4 + bn23.size * 4 + N * M * Cp * 4

    return pl.pallas_call(
        kernel,
        grid=(N,),
        in_specs=[
            pl.BlockSpec((1, M, Cp), lambda n: (n, 0, 0)),
            pl.BlockSpec((1, M, Cp), lambda n: (n, 0, 0)),
            pl.BlockSpec((4, Cp), lambda n: (0, 0)),
        ],
        out_specs=pl.BlockSpec((1, M, Cp), lambda n: (n, 0, 0)),
        out_shape=jax.ShapeDtypeStruct((N, M, Cp), jnp.float32),
        compiler_params=_compiler_params(),
        cost_estimate=pl.CostEstimate(flops=6 * N * M * Cp, transcendentals=0,
                                      bytes_accessed=bytes_accessed),
    )(y2, ye, bn23)


# ------------------------------------------------------------------ wrapper (layout only)

@functools.partial(jax.jit, static_argnames=("stride",))
def resnet_down_block(x_nchw, params, stride):
    N, Cin, H, W = x_nchw.shape
    Cout = params["w1"].shape[0]
    s = int(stride)
    OH = (H + 2 - 3) // s + 1
    OW = (W + 2 - 3) // s + 1
    M = OH * OW
    Cinp = _round_up(Cin, LANE)
    Cp = _round_up(Cout, LANE)

    # NHWC, lane-pad channels, spatial pad=1, then s*s phase (space-to-depth) split so
    # every conv tap becomes a contiguous static slice inside the kernel.  Total bytes
    # equal the padded input (no im2col expansion).
    x = jnp.transpose(x_nchw, (0, 2, 3, 1)).astype(jnp.float32)
    x = jnp.pad(x, ((0, 0), (1, 1), (1, 1), (0, Cinp - Cin)))
    Hr, Wr = _round_up(H + 2, s), _round_up(W + 2, s)
    x = jnp.pad(x, ((0, 0), (0, Hr - (H + 2)), (0, Wr - (W + 2)), (0, 0)))
    PH = Hr // s
    phases = [x[:, a::s, b::s, :] for a in range(s) for b in range(s)]
    xph = jnp.concatenate(phases, axis=1).astype(jnp.bfloat16)   # (N, s*s*PH, PW, Cinp)

    def conv_w(w, cin_p):
        # (Cout, Cin, KH, KW) -> (KH*KW, cin_p, Cp), lane-padded, bf16 MXU operands
        co, ci, kh, kw = w.shape
        wt = jnp.transpose(w, (2, 3, 1, 0)).astype(jnp.float32)
        wt = jnp.pad(wt, ((0, 0), (0, 0), (0, cin_p - ci), (0, Cp - co)))
        return wt.reshape(kh * kw, cin_p, Cp).astype(jnp.bfloat16)

    w1 = conv_w(params["w1"], Cinp)
    w2 = conv_w(params["w2"], Cp)
    we = conv_w(params["we"], Cinp)[0]

    def padc(v):
        return jnp.pad(v.astype(jnp.float32), (0, Cp - v.shape[0]))

    # NOTE: conv biases (b1, b2, be) are intentionally unused: training-mode BatchNorm's
    # mean subtraction cancels a pre-BN per-channel bias exactly.
    cnt = jnp.float32(N * M)

    def bn_affine(st, g, b):
        # reduce per-tile partials -> global per-channel affine (y * scale + shift)
        total = jnp.sum(st[:, 0, :], axis=0)
        total_sq = jnp.sum(st[:, 1, :], axis=0)
        mean = total / cnt
        var = jnp.maximum(total_sq / cnt - mean * mean, 0.0)
        scale = padc(g) * lax.rsqrt(var + EPS)
        return scale, padc(b) - mean * scale

    # kernel 1: conv1 + shortcut conv + partial stats
    y1, ye, st1, ste = _k1_call(xph, w1, we, s=s, PH=PH, OH=OH, OW=OW)

    sc1, sh1 = bn_affine(st1, params["g1"], params["bt1"])
    bn1 = jnp.stack([sc1, sh1], axis=0)                       # (2, Cp)

    # kernel 2: bn1 + ReLU + conv2 (fused, out1 never touches HBM) + partial stats
    y2, st2 = _k2_call(y1, bn1, w2, OH=OH, OW=OW)

    sc2, sh2 = bn_affine(st2, params["g2"], params["bt2"])
    sce, she = bn_affine(ste, params["ge"], params["bte"])
    bn23 = jnp.stack([sc2, sh2, sce, she], axis=0)            # (4, Cp)

    # kernel 3: bn2 + residual add + ReLU
    out = _k3_call(y2, ye, bn23)                              # (N, M, Cp) f32
    out = out.reshape(N, OH, OW, Cp)[:, :, :, :Cout]
    return jnp.transpose(out, (0, 3, 1, 2))                   # back to NCHW


# ------------------------------------------------------------------ pure-JAX reference

def _reference(x_nchw, params, stride, quantize):
    # quantize=True mirrors the kernel's bf16 MXU operands (activations / weights / out1)
    # so kernel-vs-reference differences reduce to f32 accumulation order.
    x = jnp.transpose(x_nchw, (0, 2, 3, 1)).astype(jnp.float32)

    def q(t):
        return t.astype(jnp.bfloat16).astype(jnp.float32) if quantize else t

    def conv(inp, w_oihw, b, s, pad):
        w = jnp.transpose(w_oihw, (2, 3, 1, 0)).astype(jnp.float32)
        y = lax.conv_general_dilated(q(inp), q(w), (s, s), ((pad, pad), (pad, pad)),
                                     dimension_numbers=("NHWC", "HWIO", "NHWC"),
                                     precision=lax.Precision.HIGHEST,
                                     preferred_element_type=jnp.float32)
        return y + b.reshape(1, 1, 1, -1)

    def bn(y, g, bt):
        mean = y.mean(axis=(0, 1, 2), keepdims=True)
        var = ((y - mean) ** 2).mean(axis=(0, 1, 2), keepdims=True)
        return (y - mean) * lax.rsqrt(var + EPS) * g.reshape(1, 1, 1, -1) \
            + bt.reshape(1, 1, 1, -1)

    res = bn(conv(x, params["we"], params["be"], stride, 0), params["ge"], params["bte"])
    out1 = jnp.maximum(bn(conv(x, params["w1"], params["b1"], stride, 1),
                          params["g1"], params["bt1"]), 0.0)
    out = bn(conv(out1, params["w2"], params["b2"], 1, 1), params["g2"], params["bt2"])
    return jnp.transpose(jnp.maximum(out + res, 0.0), (0, 3, 1, 2))


# ------------------------------------------------------------------ main

if __name__ == "__main__":
    N, Cin, H, W = 2, 4, 16, 16
    Cout, stride = 8, 2

    key = jax.random.PRNGKey(0)
    ks = jax.random.split(key, 13)
    params = {
        "w1": 0.1 * jax.random.normal(ks[0], (Cout, Cin, 3, 3), jnp.float32),
        "b1": 0.1 * jax.random.normal(ks[1], (Cout,), jnp.float32),
        "g1": 1.0 + 0.1 * jax.random.normal(ks[2], (Cout,), jnp.float32),
        "bt1": 0.1 * jax.random.normal(ks[3], (Cout,), jnp.float32),
        "w2": 0.1 * jax.random.normal(ks[4], (Cout, Cout, 3, 3), jnp.float32),
        "b2": 0.1 * jax.random.normal(ks[5], (Cout,), jnp.float32),
        "g2": 1.0 + 0.1 * jax.random.normal(ks[6], (Cout,), jnp.float32),
        "bt2": 0.1 * jax.random.normal(ks[7], (Cout,), jnp.float32),
        "we": 0.1 * jax.random.normal(ks[8], (Cout, Cin, 1, 1), jnp.float32),
        "be": 0.1 * jax.random.normal(ks[9], (Cout,), jnp.float32),
        "ge": 1.0 + 0.1 * jax.random.normal(ks[10], (Cout,), jnp.float32),
        "bte": 0.1 * jax.random.normal(ks[11], (Cout,), jnp.float32),
    }
    x = jax.random.normal(ks[12], (N, Cin, H, W), jnp.float32)

    out = jax.block_until_ready(resnet_down_block(x, params, stride=stride))
    assert out.shape == (N, Cout, H // stride, W // stride), out.shape

    # tight check vs. a bf16-MXU-matched reference (isolates kernel logic)
    ref_q = jax.block_until_ready(_reference(x, params, stride, quantize=True))
    err_q = float(jnp.max(jnp.abs(out - ref_q)))
    assert jnp.allclose(out, ref_q, rtol=3e-3, atol=3e-3), err_q

    # sanity check vs. the pure-f32 module semantics (bf16 MXU operands -> ~1e-2 dev.)
    ref_f = jax.block_until_ready(_reference(x, params, stride, quantize=False))
    err_f = float(jnp.max(jnp.abs(out - ref_f)))
    assert jnp.allclose(out, ref_f, rtol=5e-2, atol=5e-2), err_f

    print("KERNEL_OK")
</pallas_src>

<mosaic_0001>
module attributes {stable_mosaic.version = 11 : i64} {
  func.func @kernel(%arg0: i32, %arg1: memref<1x36x9x128xbf16, #tpu.memory_space<vmem>>, %arg2: memref<9x128x128xbf16, #tpu.memory_space<vmem>>, %arg3: memref<128x128xbf16, #tpu.memory_space<vmem>>, %arg4: memref<1x64x128xf32, #tpu.memory_space<vmem>>, %arg5: memref<1x64x128xf32, #tpu.memory_space<vmem>>, %arg6: memref<1x2x128xf32, #tpu.memory_space<vmem>>, %arg7: memref<1x2x128xf32, #tpu.memory_space<vmem>>) attributes {dimension_semantics = [#tpu.dimension_semantics<parallel>], iteration_bounds = array<i64: 2>, scalar_prefetch = 0 : i64, scratch_operands = 0 : i64, tpu.core_type = #tpu.core_type<tc>, window_params = [{transform_indices = @transform_0, window_bounds = array<i64: 1, 36, 9, 128>}, {pipeline_mode = #tpu.pipeline_mode<synchronous>, transform_indices = @transform_1, window_bounds = array<i64: 9, 128, 128>}, {pipeline_mode = #tpu.pipeline_mode<synchronous>, transform_indices = @transform_2, window_bounds = array<i64: 128, 128>}, {transform_indices = @transform_3, window_bounds = array<i64: 1, 64, 128>}, {transform_indices = @transform_4, window_bounds = array<i64: 1, 64, 128>}, {transform_indices = @transform_5, window_bounds = array<i64: 1, 2, 128>}, {transform_indices = @transform_6, window_bounds = array<i64: 1, 2, 128>}]} {
    %cst = arith.constant 0.000000e+00 : f32
    %0 = vector.broadcast %cst : f32 to vector<64x128xf32>
    %c0 = arith.constant 0 : index
    %c0_0 = arith.constant 0 : index
    %c0_1 = arith.constant 0 : index
    %c0_2 = arith.constant 0 : index
    %1 = vector.load %arg1[%c0, %c0_0, %c0_1, %c0_2] : memref<1x36x9x128xbf16, #tpu.memory_space<vmem>>, vector<1x8x8x128xbf16>
    %2 = vector.shape_cast %1 : vector<1x8x8x128xbf16> to vector<8x8x128xbf16>
    %3 = vector.shape_cast %2 : vector<8x8x128xbf16> to vector<64x128xbf16>
    %c0_3 = arith.constant 0 : index
    %c0_4 = arith.constant 0 : index
    %c0_5 = arith.constant 0 : index
    %4 = vector.load %arg2[%c0_3, %c0_4, %c0_5] : memref<9x128x128xbf16, #tpu.memory_space<vmem>>, vector<1x128x128xbf16>
    %5 = vector.shape_cast %4 : vector<1x128x128xbf16> to vector<128x128xbf16>
    %cst_6 = arith.constant dense<0.000000e+00> : vector<64x128xf32>
    %6 = tpu.matmul %3, %5, %cst_6 {dimension_numbers = #tpu.dot_dimension_numbers<[1], [0], [0], [1], [0, 0, 1, 1], [], []>} : vector<64x128xbf16>, vector<128x128xbf16>, vector<64x128xf32> -> vector<64x128xf32>
    %7 = arith.addf %0, %6 : vector<64x128xf32>
    %c0_7 = arith.constant 0 : index
    %c9 = arith.constant 9 : index
    %c0_8 = arith.constant 0 : index
    %c0_9 = arith.constant 0 : index
    %8 = vector.load %arg1[%c0_7, %c9, %c0_8, %c0_9] : memref<1x36x9x128xbf16, #tpu.memory_space<vmem>>, vector<1x8x8x128xbf16>
    %9 = vector.shape_cast %8 : vector<1x8x8x128xbf16> to vector<8x8x128xbf16>
    %10 = vector.shape_cast %9 : vector<8x8x128xbf16> to vector<64x128xbf16>
    %c1 = arith.constant 1 : index
    %c0_10 = arith.constant 0 : index
    %c0_11 = arith.constant 0 : index
    %11 = vector.load %arg2[%c1, %c0_10, %c0_11] : memref<9x128x128xbf16, #tpu.memory_space<vmem>>, vector<1x128x128xbf16>
    %12 = vector.shape_cast %11 : vector<1x128x128xbf16> to vector<128x128xbf16>
    %cst_12 = arith.constant dense<0.000000e+00> : vector<64x128xf32>
    %13 = tpu.matmul %10, %12, %cst_12 {dimension_numbers = #tpu.dot_dimension_numbers<[1], [0], [0], [1], [0, 0, 1, 1], [], []>} : vector<64x128xbf16>, vector<128x128xbf16>, vector<64x128xf32> -> vector<64x128xf32>
    %14 = arith.addf %7, %13 : vector<64x128xf32>
    %c0_13 = arith.constant 0 : index
    %c0_14 = arith.constant 0 : index
    %c1_15 = arith.constant 1 : index
    %c0_16 = arith.constant 0 : index
    %15 = vector.load %arg1[%c0_13, %c0_14, %c1_15, %c0_16] : memref<1x36x9x128xbf16, #tpu.memory_space<vmem>>, vector<1x8x8x128xbf16>
    %16 = vector.shape_cast %15 : vector<1x8x8x128xbf16> to vector<8x8x128xbf16>
    %17 = vector.shape_cast %16 : vector<8x8x128xbf16> to vector<64x128xbf16>
    %c2 = arith.constant 2 : index
    %c0_17 = arith.constant 0 : index
    %c0_18 = arith.constant 0 : index
    %18 = vector.load %arg2[%c2, %c0_17, %c0_18] : memref<9x128x128xbf16, #tpu.memory_space<vmem>>, vector<1x128x128xbf16>
    %19 = vector.shape_cast %18 : vector<1x128x128xbf16> to vector<128x128xbf16>
    %cst_19 = arith.constant dense<0.000000e+00> : vector<64x128xf32>
    %20 = tpu.matmul %17, %19, %cst_19 {dimension_numbers = #tpu.dot_dimension_numbers<[1], [0], [0], [1], [0, 0, 1, 1], [], []>} : vector<64x128xbf16>, vector<128x128xbf16>, vector<64x128xf32> -> vector<64x128xf32>
    %21 = arith.addf %14, %20 : vector<64x128xf32>
    %c0_20 = arith.constant 0 : index
    %c18 = arith.constant 18 : index
    %c0_21 = arith.constant 0 : index
    %c0_22 = arith.constant 0 : index
    %22 = vector.load %arg1[%c0_20, %c18, %c0_21, %c0_22] : memref<1x36x9x128xbf16, #tpu.memory_space<vmem>>, vector<1x8x8x128xbf16>
    %23 = vector.shape_cast %22 : vector<1x8x8x128xbf16> to vector<8x8x128xbf16>
    %24 = vector.shape_cast %23 : vector<8x8x128xbf16> to vector<64x128xbf16>
    %c3 = arith.constant 3 : index
    %c0_23 = arith.constant 0 : index
    %c0_24 = arith.constant 0 : index
    %25 = vector.load %arg2[%c3, %c0_23, %c0_24] : memref<9x128x128xbf16, #tpu.memory_space<vmem>>, vector<1x128x128xbf16>
    %26 = vector.shape_cast %25 : vector<1x128x128xbf16> to vector<128x128xbf16>
    %cst_25 = arith.constant dense<0.000000e+00> : vector<64x128xf32>
    %27 = tpu.matmul %24, %26, %cst_25 {dimension_numbers = #tpu.dot_dimension_numbers<[1], [0], [0], [1], [0, 0, 1, 1], [], []>} : vector<64x128xbf16>, vector<128x128xbf16>, vector<64x128xf32> -> vector<64x128xf32>
    %28 = arith.addf %21, %27 : vector<64x128xf32>
    %c0_26 = arith.constant 0 : index
    %c27 = arith.constant 27 : index
    %c0_27 = arith.constant 0 : index
    %c0_28 = arith.constant 0 : index
    %29 = vector.load %arg1[%c0_26, %c27, %c0_27, %c0_28] : memref<1x36x9x128xbf16, #tpu.memory_space<vmem>>, vector<1x8x8x128xbf16>
    %30 = vector.shape_cast %29 : vector<1x8x8x128xbf16> to vector<8x8x128xbf16>
    %31 = vector.shape_cast %30 : vector<8x8x128xbf16> to vector<64x128xbf16>
    %c4 = arith.constant 4 : index
    %c0_29 = arith.constant 0 : index
    %c0_30 = arith.constant 0 : index
    %32 = vector.load %arg2[%c4, %c0_29, %c0_30] : memref<9x128x128xbf16, #tpu.memory_space<vmem>>, vector<1x128x128xbf16>
    %33 = vector.shape_cast %32 : vector<1x128x128xbf16> to vector<128x128xbf16>
    %cst_31 = arith.constant dense<0.000000e+00> : vector<64x128xf32>
    %34 = tpu.matmul %31, %33, %cst_31 {dimension_numbers = #tpu.dot_dimension_numbers<[1], [0], [0], [1], [0, 0, 1, 1], [], []>} : vector<64x128xbf16>, vector<128x128xbf16>, vector<64x128xf32> -> vector<64x128xf32>
    %35 = arith.addf %28, %34 : vector<64x128xf32>
    %c0_32 = arith.constant 0 : index
    %c18_33 = arith.constant 18 : index
    %c1_34 = arith.constant 1 : index
    %c0_35 = arith.constant 0 : index
    %36 = vector.load %arg1[%c0_32, %c18_33, %c1_34, %c0_35] : memref<1x36x9x128xbf16, #tpu.memory_space<vmem>>, vector<1x8x8x128xbf16>
    %37 = vector.shape_cast %36 : vector<1x8x8x128xbf16> to vector<8x8x128xbf16>
    %38 = vector.shape_cast %37 : vector<8x8x128xbf16> to vector<64x128xbf16>
    %c5 = arith.constant 5 : index
    %c0_36 = arith.constant 0 : index
    %c0_37 = arith.constant 0 : index
    %39 = vector.load %arg2[%c5, %c0_36, %c0_37] : memref<9x128x128xbf16, #tpu.memory_space<vmem>>, vector<1x128x128xbf16>
    %40 = vector.shape_cast %39 : vector<1x128x128xbf16> to vector<128x128xbf16>
    %cst_38 = arith.constant dense<0.000000e+00> : vector<64x128xf32>
    %41 = tpu.matmul %38, %40, %cst_38 {dimension_numbers = #tpu.dot_dimension_numbers<[1], [0], [0], [1], [0, 0, 1, 1], [], []>} : vector<64x128xbf16>, vector<128x128xbf16>, vector<64x128xf32> -> vector<64x128xf32>
    %42 = arith.addf %35, %41 : vector<64x128xf32>
    %c0_39 = arith.constant 0 : index
    %c1_40 = arith.constant 1 : index
    %c0_41 = arith.constant 0 : index
    %c0_42 = arith.constant 0 : index
    %43 = vector.load %arg1[%c0_39, %c1_40, %c0_41, %c0_42] : memref<1x36x9x128xbf16, #tpu.memory_space<vmem>>, vector<1x8x8x128xbf16>
    %44 = vector.shape_cast %43 : vector<1x8x8x128xbf16> to vector<8x8x128xbf16>
    %45 = vector.shape_cast %44 : vector<8x8x128xbf16> to vector<64x128xbf16>
    %c6 = arith.constant 6 : index
    %c0_43 = arith.constant 0 : index
    %c0_44 = arith.constant 0 : index
    %46 = vector.load %arg2[%c6, %c0_43, %c0_44] : memref<9x128x128xbf16, #tpu.memory_space<vmem>>, vector<1x128x128xbf16>
    %47 = vector.shape_cast %46 : vector<1x128x128xbf16> to vector<128x128xbf16>
    %cst_45 = arith.constant dense<0.000000e+00> : vector<64x128xf32>
    %48 = tpu.matmul %45, %47, %cst_45 {dimension_numbers = #tpu.dot_dimension_numbers<[1], [0], [0], [1], [0, 0, 1, 1], [], []>} : vector<64x128xbf16>, vector<128x128xbf16>, vector<64x128xf32> -> vector<64x128xf32>
    %49 = arith.addf %42, %48 : vector<64x128xf32>
    %c0_46 = arith.constant 0 : index
    %c10 = arith.constant 10 : index
    %c0_47 = arith.constant 0 : index
    %c0_48 = arith.constant 0 : index
    %50 = vector.load %arg1[%c0_46, %c10, %c0_47, %c0_48] : memref<1x36x9x128xbf16, #tpu.memory_space<vmem>>, vector<1x8x8x128xbf16>
    %51 = vector.shape_cast %50 : vector<1x8x8x128xbf16> to vector<8x8x128xbf16>
    %52 = vector.shape_cast %51 : vector<8x8x128xbf16> to vector<64x128xbf16>
    %c7 = arith.constant 7 : index
    %c0_49 = arith.constant 0 : index
    %c0_50 = arith.constant 0 : index
    %53 = vector.load %arg2[%c7, %c0_49, %c0_50] : memref<9x128x128xbf16, #tpu.memory_space<vmem>>, vector<1x128x128xbf16>
    %54 = vector.shape_cast %53 : vector<1x128x128xbf16> to vector<128x128xbf16>
    %cst_51 = arith.constant dense<0.000000e+00> : vector<64x128xf32>
    %55 = tpu.matmul %52, %54, %cst_51 {dimension_numbers = #tpu.dot_dimension_numbers<[1], [0], [0], [1], [0, 0, 1, 1], [], []>} : vector<64x128xbf16>, vector<128x128xbf16>, vector<64x128xf32> -> vector<64x128xf32>
    %56 = arith.addf %49, %55 : vector<64x128xf32>
    %c0_52 = arith.constant 0 : index
    %c1_53 = arith.constant 1 : index
    %c1_54 = arith.constant 1 : index
    %c0_55 = arith.constant 0 : index
    %57 = vector.load %arg1[%c0_52, %c1_53, %c1_54, %c0_55] : memref<1x36x9x128xbf16, #tpu.memory_space<vmem>>, vector<1x8x8x128xbf16>
    %58 = vector.shape_cast %57 : vector<1x8x8x128xbf16> to vector<8x8x128xbf16>
    %59 = vector.shape_cast %58 : vector<8x8x128xbf16> to vector<64x128xbf16>
    %c8 = arith.constant 8 : index
    %c0_56 = arith.constant 0 : index
    %c0_57 = arith.constant 0 : index
    %60 = vector.load %arg2[%c8, %c0_56, %c0_57] : memref<9x128x128xbf16, #tpu.memory_space<vmem>>, vector<1x128x128xbf16>
    %61 = vector.shape_cast %60 : vector<1x128x128xbf16> to vector<128x128xbf16>
    %cst_58 = arith.constant dense<0.000000e+00> : vector<64x128xf32>
    %62 = tpu.matmul %59, %61, %cst_58 {dimension_numbers = #tpu.dot_dimension_numbers<[1], [0], [0], [1], [0, 0, 1, 1], [], []>} : vector<64x128xbf16>, vector<128x128xbf16>, vector<64x128xf32> -> vector<64x128xf32>
    %63 = arith.addf %56, %62 : vector<64x128xf32>
    %c0_59 = arith.constant 0 : index
    %c0_60 = arith.constant 0 : index
    %c0_61 = arith.constant 0 : index
    %64 = vector.load %arg4[%c0_59, %c0_60, %c0_61] : memref<1x64x128xf32, #tpu.memory_space<vmem>>, vector<1x64x128xf32>
    %65 = vector.shape_cast %64 : vector<1x64x128xf32> to vector<64x128xf32>
    %66 = vector.shape_cast %63 : vector<64x128xf32> to vector<1x64x128xf32>
    tpu.vector_store %arg4[%c0_59, %c0_60, %c0_61], %66 {strides = array<i32>} : memref<1x64x128xf32, #tpu.memory_space<vmem>>, vector<1x64x128xf32>,
    %cst_62 = arith.constant dense<0.000000e+00> : vector<128xf32>
    %67 = vector.multi_reduction <add>, %63, %cst_62 [0] : vector<64x128xf32> to vector<128xf32>
    %68 = vector.shape_cast %67 : vector<128xf32> to vector<1x128xf32>
    %c0_63 = arith.constant 0 : index
    %c0_64 = arith.constant 0 : index
    %c0_65 = arith.constant 0 : index
    %69 = vector.load %arg6[%c0_63, %c0_64, %c0_65] : memref<1x2x128xf32, #tpu.memory_space<vmem>>, vector<1x1x128xf32>
    %70 = vector.shape_cast %69 : vector<1x1x128xf32> to vector<1x128xf32>
    %71 = vector.shape_cast %68 : vector<1x128xf32> to vector<1x1x128xf32>
    tpu.vector_store %arg6[%c0_63, %c0_64, %c0_65], %71 {strides = array<i32>} : memref<1x2x128xf32, #tpu.memory_space<vmem>>, vector<1x1x128xf32>,
    %72 = arith.mulf %63, %63 : vector<64x128xf32>
    %cst_66 = arith.constant dense<0.000000e+00> : vector<128xf32>
    %73 = vector.multi_reduction <add>, %72, %cst_66 [0] : vector<64x128xf32> to vector<128xf32>
    %74 = vector.shape_cast %73 : vector<128xf32> to vector<1x128xf32>
    %c0_67 = arith.constant 0 : index
    %c1_68 = arith.constant 1 : index
    %c0_69 = arith.constant 0 : index
    %75 = vector.load %arg6[%c0_67, %c1_68, %c0_69] : memref<1x2x128xf32, #tpu.memory_space<vmem>>, vector<1x1x128xf32>
    %76 = vector.shape_cast %75 : vector<1x1x128xf32> to vector<1x128xf32>
    %77 = vector.shape_cast %74 : vector<1x128xf32> to vector<1x1x128xf32>
    tpu.vector_store %arg6[%c0_67, %c1_68, %c0_69], %77 {strides = array<i32>} : memref<1x2x128xf32, #tpu.memory_space<vmem>>, vector<1x1x128xf32>,
    %c0_70 = arith.constant 0 : index
    %c27_71 = arith.constant 27 : index
    %c0_72 = arith.constant 0 : index
    %c0_73 = arith.constant 0 : index
    %78 = vector.load %arg1[%c0_70, %c27_71, %c0_72, %c0_73] : memref<1x36x9x128xbf16, #tpu.memory_space<vmem>>, vector<1x8x8x128xbf16>
    %79 = vector.shape_cast %78 : vector<1x8x8x128xbf16> to vector<8x8x128xbf16>
    %80 = vector.shape_cast %79 : vector<8x8x128xbf16> to vector<64x128xbf16>
    %c0_74 = arith.constant 0 : index
    %c0_75 = arith.constant 0 : index
    %81 = vector.load %arg3[%c0_74, %c0_75] : memref<128x128xbf16, #tpu.memory_space<vmem>>, vector<128x128xbf16>
    %cst_76 = arith.constant dense<0.000000e+00> : vector<64x128xf32>
    %82 = tpu.matmul %80, %81, %cst_76 {dimension_numbers = #tpu.dot_dimension_numbers<[1], [0], [0], [1], [0, 0, 1, 1], [], []>} : vector<64x128xbf16>, vector<128x128xbf16>, vector<64x128xf32> -> vector<64x128xf32>
    %c0_77 = arith.constant 0 : index
    %c0_78 = arith.constant 0 : index
    %c0_79 = arith.constant 0 : index
    %83 = vector.load %arg5[%c0_77, %c0_78, %c0_79] : memref<1x64x128xf32, #tpu.memory_space<vmem>>, vector<1x64x128xf32>
    %84 = vector.shape_cast %83 : vector<1x64x128xf32> to vector<64x128xf32>
    %85 = vector.shape_cast %82 : vector<64x128xf32> to vector<1x64x128xf32>
    tpu.vector_store %arg5[%c0_77, %c0_78, %c0_79], %85 {strides = array<i32>} : memref<1x64x128xf32, #tpu.memory_space<vmem>>, vector<1x64x128xf32>,
    %cst_80 = arith.constant dense<0.000000e+00> : vector<128xf32>
    %86 = vector.multi_reduction <add>, %82, %cst_80 [0] : vector<64x128xf32> to vector<128xf32>
    %87 = vector.shape_cast %86 : vector<128xf32> to vector<1x128xf32>
    %c0_81 = arith.constant 0 : index
    %c0_82 = arith.constant 0 : index
    %c0_83 = arith.constant 0 : index
    %88 = vector.load %arg7[%c0_81, %c0_82, %c0_83] : memref<1x2x128xf32, #tpu.memory_space<vmem>>, vector<1x1x128xf32>
    %89 = vector.shape_cast %88 : vector<1x1x128xf32> to vector<1x128xf32>
    %90 = vector.shape_cast %87 : vector<1x128xf32> to vector<1x1x128xf32>
    tpu.vector_store %arg7[%c0_81, %c0_82, %c0_83], %90 {strides = array<i32>} : memref<1x2x128xf32, #tpu.memory_space<vmem>>, vector<1x1x128xf32>,
    %91 = arith.mulf %82, %82 : vector<64x128xf32>
    %cst_84 = arith.constant dense<0.000000e+00> : vector<128xf32>
    %92 = vector.multi_reduction <add>, %91, %cst_84 [0] : vector<64x128xf32> to vector<128xf32>
    %93 = vector.shape_cast %92 : vector<128xf32> to vector<1x128xf32>
    %c0_85 = arith.constant 0 : index
    %c1_86 = arith.constant 1 : index
    %c0_87 = arith.constant 0 : index
    %94 = vector.load %arg7[%c0_85, %c1_86, %c0_87] : memref<1x2x128xf32, #tpu.memory_space<vmem>>, vector<1x1x128xf32>
    %95 = vector.shape_cast %94 : vector<1x1x128xf32> to vector<1x128xf32>
    %96 = vector.shape_cast %93 : vector<1x128xf32> to vector<1x1x128xf32>
    tpu.vector_store %arg7[%c0_85, %c1_86, %c0_87], %96 {strides = array<i32>} : memref<1x2x128xf32, #tpu.memory_space<vmem>>, vector<1x1x128xf32>,
    return
  }
  func.func @transform_0(%arg0: i32) -> (i32, i32, i32, i32) {
    %c0_i32 = arith.constant 0 : i32
    %c0_i32_0 = arith.constant 0 : i32
    %c0_i32_1 = arith.constant 0 : i32
    %c0_i32_2 = arith.constant 0 : i32
    return %arg0, %c0_i32, %c0_i32_0, %c0_i32_1 : i32, i32, i32, i32
  }
  func.func @transform_1(%arg0: i32) -> (i32, i32, i32) {
    %c0_i32 = arith.constant 0 : i32
    %c0_i32_0 = arith.constant 0 : i32
    %c0_i32_1 = arith.constant 0 : i32
    %c0_i32_2 = arith.constant 0 : i32
    return %c0_i32, %c0_i32_0, %c0_i32_1 : i32, i32, i32
  }
  func.func @transform_2(%arg0: i32) -> (i32, i32) {
    %c0_i32 = arith.constant 0 : i32
    %c0_i32_0 = arith.constant 0 : i32
    %c0_i32_1 = arith.constant 0 : i32
    return %c0_i32, %c0_i32_0 : i32, i32
  }
  func.func @transform_3(%arg0: i32) -> (i32, i32, i32) {
    %c0_i32 = arith.constant 0 : i32
    %c0_i32_0 = arith.constant 0 : i32
    %c0_i32_1 = arith.constant 0 : i32
    return %arg0, %c0_i32, %c0_i32_0 : i32, i32, i32
  }
  func.func @transform_4(%arg0: i32) -> (i32, i32, i32) {
    %c0_i32 = arith.constant 0 : i32
    %c0_i32_0 = arith.constant 0 : i32
    %c0_i32_1 = arith.constant 0 : i32
    return %arg0, %c0_i32, %c0_i32_0 : i32, i32, i32
  }
  func.func @transform_5(%arg0: i32) -> (i32, i32, i32) {
    %c0_i32 = arith.constant 0 : i32
    %c0_i32_0 = arith.constant 0 : i32
    %c0_i32_1 = arith.constant 0 : i32
    return %arg0, %c0_i32, %c0_i32_0 : i32, i32, i32
  }
  func.func @transform_6(%arg0: i32) -> (i32, i32, i32) {
    %c0_i32 = arith.constant 0 : i32
    %c0_i32_0 = arith.constant 0 : i32
    %c0_i32_1 = arith.constant 0 : i32
    return %arg0, %c0_i32, %c0_i32_0 : i32, i32, i32
  }
}

module attributes {stable_mosaic.version = 11 : i64} {
  func.func @kernel(%arg0: i32, %arg1: memref<1x64x128xf32, #tpu.memory_space<vmem>>, %arg2: memref<2x128xf32, #tpu.memory_space<vmem>>, %arg3: memref<9x128x128xbf16, #tpu.memory_space<vmem>>, %arg4: memref<1x64x128xf32, #tpu.memory_space<vmem>>, %arg5: memref<1x2x128xf32, #tpu.memory_space<vmem>>, %arg6: memref<10x10x128xf32, #tpu.memory_space<vmem>>) attributes {dimension_semantics = [#tpu.dimension_semantics<parallel>], iteration_bounds = array<i64: 2>, scalar_prefetch = 0 : i64, scratch_operands = 1 : i64, tpu.core_type = #tpu.core_type<tc>, window_params = [{transform_indices = @transform_0, window_bounds = array<i64: 1, 64, 128>}, {pipeline_mode = #tpu.pipeline_mode<synchronous>, transform_indices = @transform_1, window_bounds = array<i64: 2, 128>}, {pipeline_mode = #tpu.pipeline_mode<synchronous>, transform_indices = @transform_2, window_bounds = array<i64: 9, 128, 128>}, {transform_indices = @transform_3, window_bounds = array<i64: 1, 64, 128>}, {transform_indices = @transform_4, window_bounds = array<i64: 1, 2, 128>}]} {
    %c0 = arith.constant 0 : index
    %c0_0 = arith.constant 0 : index
    %0 = vector.load %arg2[%c0, %c0_0] : memref<2x128xf32, #tpu.memory_space<vmem>>, vector<1x128xf32>
    %c1 = arith.constant 1 : index
    %c0_1 = arith.constant 0 : index
    %1 = vector.load %arg2[%c1, %c0_1] : memref<2x128xf32, #tpu.memory_space<vmem>>, vector<1x128xf32>
    %c0_2 = arith.constant 0 : index
    %c0_3 = arith.constant 0 : index
    %c0_4 = arith.constant 0 : index
    %2 = vector.load %arg1[%c0_2, %c0_3, %c0_4] : memref<1x64x128xf32, #tpu.memory_space<vmem>>, vector<1x64x128xf32>
    %3 = vector.shape_cast %2 : vector<1x64x128xf32> to vector<64x128xf32>
    %4 = vector.broadcast %0 : vector<1x128xf32> to vector<64x128xf32>
    %5 = arith.mulf %3, %4 : vector<64x128xf32>
    %6 = vector.broadcast %1 : vector<1x128xf32> to vector<64x128xf32>
    %7 = arith.addf %5, %6 : vector<64x128xf32>
    %cst = arith.constant 0.000000e+00 : f32
    %8 = vector.broadcast %cst : f32 to vector<64x128xf32>
    %9 = arith.maximumf %7, %8 : vector<64x128xf32>
    %cst_5 = arith.constant 0.000000e+00 : f32
    %10 = vector.broadcast %cst_5 : f32 to vector<10x10x128xf32>
    %c0_6 = arith.constant 0 : index
    %c0_7 = arith.constant 0 : index
    %c0_8 = arith.constant 0 : index
    %11 = vector.load %arg6[%c0_6, %c0_7, %c0_8] : memref<10x10x128xf32, #tpu.memory_space<vmem>>, vector<10x10x128xf32>
    tpu.vector_store %arg6[%c0_6, %c0_7, %c0_8], %10 {strides = array<i32>} : memref<10x10x128xf32, #tpu.memory_space<vmem>>, vector<10x10x128xf32>,
    %12 = vector.shape_cast %9 : vector<64x128xf32> to vector<8x8x128xf32>
    %c1_9 = arith.constant 1 : index
    %c1_10 = arith.constant 1 : index
    %c0_11 = arith.constant 0 : index
    %13 = vector.load %arg6[%c1_9, %c1_10, %c0_11] : memref<10x10x128xf32, #tpu.memory_space<vmem>>, vector<8x8x128xf32>
    tpu.vector_store %arg6[%c1_9, %c1_10, %c0_11], %12 {strides = array<i32>} : memref<10x10x128xf32, #tpu.memory_space<vmem>>, vector<8x8x128xf32>,
    %cst_12 = arith.constant 0.000000e+00 : f32
    %14 = vector.broadcast %cst_12 : f32 to vector<64x128xf32>
    %c0_13 = arith.constant 0 : index
    %c0_14 = arith.constant 0 : index
    %c0_15 = arith.constant 0 : index
    %15 = vector.load %arg6[%c0_13, %c0_14, %c0_15] : memref<10x10x128xf32, #tpu.memory_space<vmem>>, vector<8x8x128xf32>
    %16 = vector.shape_cast %15 : vector<8x8x128xf32> to vector<64x128xf32>
    %17 = arith.truncf %16 : vector<64x128xf32> to vector<64x128xbf16>
    %c0_16 = arith.constant 0 : index
    %c0_17 = arith.constant 0 : index
    %c0_18 = arith.constant 0 : index
    %18 = vector.load %arg3[%c0_16, %c0_17, %c0_18] : memref<9x128x128xbf16, #tpu.memory_space<vmem>>, vector<1x128x128xbf16>
    %19 = vector.shape_cast %18 : vector<1x128x128xbf16> to vector<128x128xbf16>
    %cst_19 = arith.constant dense<0.000000e+00> : vector<64x128xf32>
    %20 = tpu.matmul %17, %19, %cst_19 {dimension_numbers = #tpu.dot_dimension_numbers<[1], [0], [0], [1], [0, 0, 1, 1], [], []>} : vector<64x128xbf16>, vector<128x128xbf16>, vector<64x128xf32> -> vector<64x128xf32>
    %21 = arith.addf %14, %20 : vector<64x128xf32>
    %c0_20 = arith.constant 0 : index
    %c1_21 = arith.constant 1 : index
    %c0_22 = arith.constant 0 : index
    %22 = vector.load %arg6[%c0_20, %c1_21, %c0_22] : memref<10x10x128xf32, #tpu.memory_space<vmem>>, vector<8x8x128xf32>
    %23 = vector.shape_cast %22 : vector<8x8x128xf32> to vector<64x128xf32>
    %24 = arith.truncf %23 : vector<64x128xf32> to vector<64x128xbf16>
    %c1_23 = arith.constant 1 : index
    %c0_24 = arith.constant 0 : index
    %c0_25 = arith.constant 0 : index
    %25 = vector.load %arg3[%c1_23, %c0_24, %c0_25] : memref<9x128x128xbf16, #tpu.memory_space<vmem>>, vector<1x128x128xbf16>
    %26 = vector.shape_cast %25 : vector<1x128x128xbf16> to vector<128x128xbf16>
    %cst_26 = arith.constant dense<0.000000e+00> : vector<64x128xf32>
    %27 = tpu.matmul %24, %26, %cst_26 {dimension_numbers = #tpu.dot_dimension_numbers<[1], [0], [0], [1], [0, 0, 1, 1], [], []>} : vector<64x128xbf16>, vector<128x128xbf16>, vector<64x128xf32> -> vector<64x128xf32>
    %28 = arith.addf %21, %27 : vector<64x128xf32>
    %c0_27 = arith.constant 0 : index
    %c2 = arith.constant 2 : index
    %c0_28 = arith.constant 0 : index
    %29 = vector.load %arg6[%c0_27, %c2, %c0_28] : memref<10x10x128xf32, #tpu.memory_space<vmem>>, vector<8x8x128xf32>
    %30 = vector.shape_cast %29 : vector<8x8x128xf32> to vector<64x128xf32>
    %31 = arith.truncf %30 : vector<64x128xf32> to vector<64x128xbf16>
    %c2_29 = arith.constant 2 : index
    %c0_30 = arith.constant 0 : index
    %c0_31 = arith.constant 0 : index
    %32 = vector.load %arg3[%c2_29, %c0_30, %c0_31] : memref<9x128x128xbf16, #tpu.memory_space<vmem>>, vector<1x128x128xbf16>
    %33 = vector.shape_cast %32 : vector<1x128x128xbf16> to vector<128x128xbf16>
    %cst_32 = arith.constant dense<0.000000e+00> : vector<64x128xf32>
    %34 = tpu.matmul %31, %33, %cst_32 {dimension_numbers = #tpu.dot_dimension_numbers<[1], [0], [0], [1], [0, 0, 1, 1], [], []>} : vector<64x128xbf16>, vector<128x128xbf16>, vector<64x128xf32> -> vector<64x128xf32>
    %35 = arith.addf %28, %34 : vector<64x128xf32>
    %c1_33 = arith.constant 1 : index
    %c0_34 = arith.constant 0 : index
    %c0_35 = arith.constant 0 : index
    %36 = vector.load %arg6[%c1_33, %c0_34, %c0_35] : memref<10x10x128xf32, #tpu.memory_space<vmem>>, vector<8x8x128xf32>
    %37 = vector.shape_cast %36 : vector<8x8x128xf32> to vector<64x128xf32>
    %38 = arith.truncf %37 : vector<64x128xf32> to vector<64x128xbf16>
    %c3 = arith.constant 3 : index
    %c0_36 = arith.constant 0 : index
    %c0_37 = arith.constant 0 : index
    %39 = vector.load %arg3[%c3, %c0_36, %c0_37] : memref<9x128x128xbf16, #tpu.memory_space<vmem>>, vector<1x128x128xbf16>
    %40 = vector.shape_cast %39 : vector<1x128x128xbf16> to vector<128x128xbf16>
    %cst_38 = arith.constant dense<0.000000e+00> : vector<64x128xf32>
    %41 = tpu.matmul %38, %40, %cst_38 {dimension_numbers = #tpu.dot_dimension_numbers<[1], [0], [0], [1], [0, 0, 1, 1], [], []>} : vector<64x128xbf16>, vector<128x128xbf16>, vector<64x128xf32> -> vector<64x128xf32>
    %42 = arith.addf %35, %41 : vector<64x128xf32>
    %c1_39 = arith.constant 1 : index
    %c1_40 = arith.constant 1 : index
    %c0_41 = arith.constant 0 : index
    %43 = vector.load %arg6[%c1_39, %c1_40, %c0_41] : memref<10x10x128xf32, #tpu.memory_space<vmem>>, vector<8x8x128xf32>
    %44 = vector.shape_cast %43 : vector<8x8x128xf32> to vector<64x128xf32>
    %45 = arith.truncf %44 : vector<64x128xf32> to vector<64x128xbf16>
    %c4 = arith.constant 4 : index
    %c0_42 = arith.constant 0 : index
    %c0_43 = arith.constant 0 : index
    %46 = vector.load %arg3[%c4, %c0_42, %c0_43] : memref<9x128x128xbf16, #tpu.memory_space<vmem>>, vector<1x128x128xbf16>
    %47 = vector.shape_cast %46 : vector<1x128x128xbf16> to vector<128x128xbf16>
    %cst_44 = arith.constant dense<0.000000e+00> : vector<64x128xf32>
    %48 = tpu.matmul %45, %47, %cst_44 {dimension_numbers = #tpu.dot_dimension_numbers<[1], [0], [0], [1], [0, 0, 1, 1], [], []>} : vector<64x128xbf16>, vector<128x128xbf16>, vector<64x128xf32> -> vector<64x128xf32>
    %49 = arith.addf %42, %48 : vector<64x128xf32>
    %c1_45 = arith.constant 1 : index
    %c2_46 = arith.constant 2 : index
    %c0_47 = arith.constant 0 : index
    %50 = vector.load %arg6[%c1_45, %c2_46, %c0_47] : memref<10x10x128xf32, #tpu.memory_space<vmem>>, vector<8x8x128xf32>
    %51 = vector.shape_cast %50 : vector<8x8x128xf32> to vector<64x128xf32>
    %52 = arith.truncf %51 : vector<64x128xf32> to vector<64x128xbf16>
    %c5 = arith.constant 5 : index
    %c0_48 = arith.constant 0 : index
    %c0_49 = arith.constant 0 : index
    %53 = vector.load %arg3[%c5, %c0_48, %c0_49] : memref<9x128x128xbf16, #tpu.memory_space<vmem>>, vector<1x128x128xbf16>
    %54 = vector.shape_cast %53 : vector<1x128x128xbf16> to vector<128x128xbf16>
    %cst_50 = arith.constant dense<0.000000e+00> : vector<64x128xf32>
    %55 = tpu.matmul %52, %54, %cst_50 {dimension_numbers = #tpu.dot_dimension_numbers<[1], [0], [0], [1], [0, 0, 1, 1], [], []>} : vector<64x128xbf16>, vector<128x128xbf16>, vector<64x128xf32> -> vector<64x128xf32>
    %56 = arith.addf %49, %55 : vector<64x128xf32>
    %c2_51 = arith.constant 2 : index
    %c0_52 = arith.constant 0 : index
    %c0_53 = arith.constant 0 : index
    %57 = vector.load %arg6[%c2_51, %c0_52, %c0_53] : memref<10x10x128xf32, #tpu.memory_space<vmem>>, vector<8x8x128xf32>
    %58 = vector.shape_cast %57 : vector<8x8x128xf32> to vector<64x128xf32>
    %59 = arith.truncf %58 : vector<64x128xf32> to vector<64x128xbf16>
    %c6 = arith.constant 6 : index
    %c0_54 = arith.constant 0 : index
    %c0_55 = arith.constant 0 : index
    %60 = vector.load %arg3[%c6, %c0_54, %c0_55] : memref<9x128x128xbf16, #tpu.memory_space<vmem>>, vector<1x128x128xbf16>
    %61 = vector.shape_cast %60 : vector<1x128x128xbf16> to vector<128x128xbf16>
    %cst_56 = arith.constant dense<0.000000e+00> : vector<64x128xf32>
    %62 = tpu.matmul %59, %61, %cst_56 {dimension_numbers = #tpu.dot_dimension_numbers<[1], [0], [0], [1], [0, 0, 1, 1], [], []>} : vector<64x128xbf16>, vector<128x128xbf16>, vector<64x128xf32> -> vector<64x128xf32>
    %63 = arith.addf %56, %62 : vector<64x128xf32>
    %c2_57 = arith.constant 2 : index
    %c1_58 = arith.constant 1 : index
    %c0_59 = arith.constant 0 : index
    %64 = vector.load %arg6[%c2_57, %c1_58, %c0_59] : memref<10x10x128xf32, #tpu.memory_space<vmem>>, vector<8x8x128xf32>
    %65 = vector.shape_cast %64 : vector<8x8x128xf32> to vector<64x128xf32>
    %66 = arith.truncf %65 : vector<64x128xf32> to vector<64x128xbf16>
    %c7 = arith.constant 7 : index
    %c0_60 = arith.constant 0 : index
    %c0_61 = arith.constant 0 : index
    %67 = vector.load %arg3[%c7, %c0_60, %c0_61] : memref<9x128x128xbf16, #tpu.memory_space<vmem>>, vector<1x128x128xbf16>
    %68 = vector.shape_cast %67 : vector<1x128x128xbf16> to vector<128x128xbf16>
    %cst_62 = arith.constant dense<0.000000e+00> : vector<64x128xf32>
    %69 = tpu.matmul %66, %68, %cst_62 {dimension_numbers = #tpu.dot_dimension_numbers<[1], [0], [0], [1], [0, 0, 1, 1], [], []>} : vector<64x128xbf16>, vector<128x128xbf16>, vector<64x128xf32> -> vector<64x128xf32>
    %70 = arith.addf %63, %69 : vector<64x128xf32>
    %c2_63 = arith.constant 2 : index
    %c2_64 = arith.constant 2 : index
    %c0_65 = arith.constant 0 : index
    %71 = vector.load %arg6[%c2_63, %c2_64, %c0_65] : memref<10x10x128xf32, #tpu.memory_space<vmem>>, vector<8x8x128xf32>
    %72 = vector.shape_cast %71 : vector<8x8x128xf32> to vector<64x128xf32>
    %73 = arith.truncf %72 : vector<64x128xf32> to vector<64x128xbf16>
    %c8 = arith.constant 8 : index
    %c0_66 = arith.constant 0 : index
    %c0_67 = arith.constant 0 : index
    %74 = vector.load %arg3[%c8, %c0_66, %c0_67] : memref<9x128x128xbf16, #tpu.memory_space<vmem>>, vector<1x128x128xbf16>
    %75 = vector.shape_cast %74 : vector<1x128x128xbf16> to vector<128x128xbf16>
    %cst_68 = arith.constant dense<0.000000e+00> : vector<64x128xf32>
    %76 = tpu.matmul %73, %75, %cst_68 {dimension_numbers = #tpu.dot_dimension_numbers<[1], [0], [0], [1], [0, 0, 1, 1], [], []>} : vector<64x128xbf16>, vector<128x128xbf16>, vector<64x128xf32> -> vector<64x128xf32>
    %77 = arith.addf %70, %76 : vector<64x128xf32>
    %c0_69 = arith.constant 0 : index
    %c0_70 = arith.constant 0 : index
    %c0_71 = arith.constant 0 : index
    %78 = vector.load %arg4[%c0_69, %c0_70, %c0_71] : memref<1x64x128xf32, #tpu.memory_space<vmem>>, vector<1x64x128xf32>
    %79 = vector.shape_cast %78 : vector<1x64x128xf32> to vector<64x128xf32>
    %80 = vector.shape_cast %77 : vector<64x128xf32> to vector<1x64x128xf32>
    tpu.vector_store %arg4[%c0_69, %c0_70, %c0_71], %80 {strides = array<i32>} : memref<1x64x128xf32, #tpu.memory_space<vmem>>, vector<1x64x128xf32>,
    %cst_72 = arith.constant dense<0.000000e+00> : vector<128xf32>
    %81 = vector.multi_reduction <add>, %77, %cst_72 [0] : vector<64x128xf32> to vector<128xf32>
    %82 = vector.shape_cast %81 : vector<128xf32> to vector<1x128xf32>
    %c0_73 = arith.constant 0 : index
    %c0_74 = arith.constant 0 : index
    %c0_75 = arith.constant 0 : index
    %83 = vector.load %arg5[%c0_73, %c0_74, %c0_75] : memref<1x2x128xf32, #tpu.memory_space<vmem>>, vector<1x1x128xf32>
    %84 = vector.shape_cast %83 : vector<1x1x128xf32> to vector<1x128xf32>
    %85 = vector.shape_cast %82 : vector<1x128xf32> to vector<1x1x128xf32>
    tpu.vector_store %arg5[%c0_73, %c0_74, %c0_75], %85 {strides = array<i32>} : memref<1x2x128xf32, #tpu.memory_space<vmem>>, vector<1x1x128xf32>,
    %86 = arith.mulf %77, %77 : vector<64x128xf32>
    %cst_76 = arith.constant dense<0.000000e+00> : vector<128xf32>
    %87 = vector.multi_reduction <add>, %86, %cst_76 [0] : vector<64x128xf32> to vector<128xf32>
    %88 = vector.shape_cast %87 : vector<128xf32> to vector<1x128xf32>
    %c0_77 = arith.constant 0 : index
    %c1_78 = arith.constant 1 : index
    %c0_79 = arith.constant 0 : index
    %89 = vector.load %arg5[%c0_77, %c1_78, %c0_79] : memref<1x2x128xf32, #tpu.memory_space<vmem>>, vector<1x1x128xf32>
    %90 = vector.shape_cast %89 : vector<1x1x128xf32> to vector<1x128xf32>
    %91 = vector.shape_cast %88 : vector<1x128xf32> to vector<1x1x128xf32>
    tpu.vector_store %arg5[%c0_77, %c1_78, %c0_79], %91 {strides = array<i32>} : memref<1x2x128xf32, #tpu.memory_space<vmem>>, vector<1x1x128xf32>,
    return
  }
  func.func @transform_0(%arg0: i32) -> (i32, i32, i32) {
    %c0_i32 = arith.constant 0 : i32
    %c0_i32_0 = arith.constant 0 : i32
    %c0_i32_1 = arith.constant 0 : i32
    return %arg0, %c0_i32, %c0_i32_0 : i32, i32, i32
  }
  func.func @transform_1(%arg0: i32) -> (i32, i32) {
    %c0_i32 = arith.constant 0 : i32
    %c0_i32_0 = arith.constant 0 : i32
    %c0_i32_1 = arith.constant 0 : i32
    return %c0_i32, %c0_i32_0 : i32, i32
  }
  func.func @transform_2(%arg0: i32) -> (i32, i32, i32) {
    %c0_i32 = arith.constant 0 : i32
    %c0_i32_0 = arith.constant 0 : i32
    %c0_i32_1 = arith.constant 0 : i32
    %c0_i32_2 = arith.constant 0 : i32
    return %c0_i32, %c0_i32_0, %c0_i32_1 : i32, i32, i32
  }
  func.func @transform_3(%arg0: i32) -> (i32, i32, i32) {
    %c0_i32 = arith.constant 0 : i32
    %c0_i32_0 = arith.constant 0 : i32
    %c0_i32_1 = arith.constant 0 : i32
    return %arg0, %c0_i32, %c0_i32_0 : i32, i32, i32
  }
  func.func @transform_4(%arg0: i32) -> (i32, i32, i32) {
    %c0_i32 = arith.constant 0 : i32
    %c0_i32_0 = arith.constant 0 : i32
    %c0_i32_1 = arith.constant 0 : i32
    return %arg0, %c0_i32, %c0_i32_0 : i32, i32, i32
  }
}

module attributes {stable_mosaic.version = 11 : i64} {
  func.func @kernel(%arg0: i32, %arg1: memref<1x64x128xf32, #tpu.memory_space<vmem>>, %arg2: memref<1x64x128xf32, #tpu.memory_space<vmem>>, %arg3: memref<4x128xf32, #tpu.memory_space<vmem>>, %arg4: memref<1x64x128xf32, #tpu.memory_space<vmem>>) attributes {dimension_semantics = [#tpu.dimension_semantics<parallel>], iteration_bounds = array<i64: 2>, scalar_prefetch = 0 : i64, scratch_operands = 0 : i64, tpu.core_type = #tpu.core_type<tc>, window_params = [{transform_indices = @transform_0, window_bounds = array<i64: 1, 64, 128>}, {transform_indices = @transform_1, window_bounds = array<i64: 1, 64, 128>}, {pipeline_mode = #tpu.pipeline_mode<synchronous>, transform_indices = @transform_2, window_bounds = array<i64: 4, 128>}, {transform_indices = @transform_3, window_bounds = array<i64: 1, 64, 128>}]} {
    %c0 = arith.constant 0 : index
    %c0_0 = arith.constant 0 : index
    %c0_1 = arith.constant 0 : index
    %0 = vector.load %arg1[%c0, %c0_0, %c0_1] : memref<1x64x128xf32, #tpu.memory_space<vmem>>, vector<1x64x128xf32>
    %1 = vector.shape_cast %0 : vector<1x64x128xf32> to vector<64x128xf32>
    %c0_2 = arith.constant 0 : index
    %c0_3 = arith.constant 0 : index
    %2 = vector.load %arg3[%c0_2, %c0_3] : memref<4x128xf32, #tpu.memory_space<vmem>>, vector<1x128xf32>
    %3 = vector.broadcast %2 : vector<1x128xf32> to vector<64x128xf32>
    %4 = arith.mulf %1, %3 : vector<64x128xf32>
    %c1 = arith.constant 1 : index
    %c0_4 = arith.constant 0 : index
    %5 = vector.load %arg3[%c1, %c0_4] : memref<4x128xf32, #tpu.memory_space<vmem>>, vector<1x128xf32>
    %6 = vector.broadcast %5 : vector<1x128xf32> to vector<64x128xf32>
    %7 = arith.addf %4, %6 : vector<64x128xf32>
    %c0_5 = arith.constant 0 : index
    %c0_6 = arith.constant 0 : index
    %c0_7 = arith.constant 0 : index
    %8 = vector.load %arg2[%c0_5, %c0_6, %c0_7] : memref<1x64x128xf32, #tpu.memory_space<vmem>>, vector<1x64x128xf32>
    %9 = vector.shape_cast %8 : vector<1x64x128xf32> to vector<64x128xf32>
    %c2 = arith.constant 2 : index
    %c0_8 = arith.constant 0 : index
    %10 = vector.load %arg3[%c2, %c0_8] : memref<4x128xf32, #tpu.memory_space<vmem>>, vector<1x128xf32>
    %11 = vector.broadcast %10 : vector<1x128xf32> to vector<64x128xf32>
    %12 = arith.mulf %9, %11 : vector<64x128xf32>
    %c3 = arith.constant 3 : index
    %c0_9 = arith.constant 0 : index
    %13 = vector.load %arg3[%c3, %c0_9] : memref<4x128xf32, #tpu.memory_space<vmem>>, vector<1x128xf32>
    %14 = vector.broadcast %13 : vector<1x128xf32> to vector<64x128xf32>
    %15 = arith.addf %12, %14 : vector<64x128xf32>
    %16 = arith.addf %7, %15 : vector<64x128xf32>
    %cst = arith.constant 0.000000e+00 : f32
    %17 = vector.broadcast %cst : f32 to vector<64x128xf32>
    %18 = arith.maximumf %16, %17 : vector<64x128xf32>
    %c0_10 = arith.constant 0 : index
    %c0_11 = arith.constant 0 : index
    %c0_12 = arith.constant 0 : index
    %19 = vector.load %arg4[%c0_10, %c0_11, %c0_12] : memref<1x64x128xf32, #tpu.memory_space<vmem>>, vector<1x64x128xf32>
    %20 = vector.shape_cast %19 : vector<1x64x128xf32> to vector<64x128xf32>
    %21 = vector.shape_cast %18 : vector<64x128xf32> to vector<1x64x128xf32>
    tpu.vector_store %arg4[%c0_10, %c0_11, %c0_12], %21 {strides = array<i32>} : memref<1x64x128xf32, #tpu.memory_space<vmem>>, vector<1x64x128xf32>,
    return
  }
  func.func @transform_0(%arg0: i32) -> (i32, i32, i32) {
    %c0_i32 = arith.constant 0 : i32
    %c0_i32_0 = arith.constant 0 : i32
    %c0_i32_1 = arith.constant 0 : i32
    return %arg0, %c0_i32, %c0_i32_0 : i32, i32, i32
  }
  func.func @transform_1(%arg0: i32) -> (i32, i32, i32) {
    %c0_i32 = arith.constant 0 : i32
    %c0_i32_0 = arith.constant 0 : i32
    %c0_i32_1 = arith.constant 0 : i32
    return %arg0, %c0_i32, %c0_i32_0 : i32, i32, i32
  }
  func.func @transform_2(%arg0: i32) -> (i32, i32) {
    %c0_i32 = arith.constant 0 : i32
    %c0_i32_0 = arith.constant 0 : i32
    %c0_i32_1 = arith.constant 0 : i32
    return %c0_i32, %c0_i32_0 : i32, i32
  }
  func.func @transform_3(%arg0: i32) -> (i32, i32, i32) {
    %c0_i32 = arith.constant 0 : i32
    %c0_i32_0 = arith.constant 0 : i32
    %c0_i32_1 = arith.constant 0 : i32
    return %arg0, %c0_i32, %c0_i32_0 : i32, i32, i32
  }
}

</mosaic_0001>

<bundles_post_ra>
// kernel: resnet_down_block.5
= control target key start
LH: loop header
LB: loop body
LE: loop exit
PB: predicated region body
PF: predicated region fallthrough
CT: control target
= control target key end

     0   :  { %s394_s12 = smov 0   ;;  %s481_s0 = inlined_call_operand.vmem [shape: f32[2,64,128], index: 0, kind: input, shape index: {}]   ;;  %s482_s1 = inlined_call_operand.vmem [shape: f32[2,64,128], index: 1, kind: input, shape index: {}]   ;;  %s483_s2 = inlined_call_operand.vmem [shape: f32[4,128], index: 2, kind: input, shape index: {}]   ;;  %s484_s3 = inlined_call_operand.vmem [shape: f32[2,64,128], index: 3, kind: output, shape index: {}]  }
   0x1 LB: > { %s338_s13 = sadd.s32 4294967295, %s372_s12   ;;  %p342_p0 = scmp.ge.s32.totalorder %s372_s12, 1  ;;  %s372_s12 = sphi %s394_s12, %s13_s12  }
   0x2   : > { %p147_p1 = scmp.lt.s32.totalorder %s372_s12, 3 }
   0x4   : > { %p148_p2 = pnand %p342_p0, %p147_p1 }
   0x5   : > { %p176_p3 = scmp.lt.s32.totalorder (!%p148_p2), %s338_s13, 1 }
   0x6   : > { %151 = sbr.rel (%p148_p2) target bundleno = 33 (0x21), region = 32 }
   0xb   : > { %s486_s13 = smov (!%p176_p3, %s338_s13), 1  ;;  %v362_v0 = vld [vmem:[%s483_s2] ss:$0 sm:$0xff]  ;;  %v364_v1 = vld [vmem:[%s483_s2 + $0x2] ss:$0 sm:$0xff] }
   0xc   : > { %s408_s18 = sshll.u32 %s486_s13, 6  ;;  %v425_v2 = vld [vmem:[%s483_s2 + $0x1] ss:$0 sm:$0xff]  ;;  %v430_v3 = vld [vmem:[%s483_s2 + $0x3] ss:$0 sm:$0xff] }
   0xd   : > { %s414_s21 = scalar_lea.vmem %s481_s0, %s408_s18  ;;  %s420_s24 = scalar_lea.vmem %s482_s1, %s408_s18 }
   0xe   : > { %v191_v4 = vld [vmem:[%s414_s21] sm:$0xff]  ;;  %v192_v6 = vld [vmem:[%s414_s21 + $0x8] sm:$0xff]  ;;  %v193_v11 = vld [vmem:[%s414_s21 + $0x10] sm:$0xff]  ;;  %s455_s4 = scalar_lea.vmem %s484_s3, %s408_s18 }
   0xf   : > { %v219_v5 = vld [vmem:[%s420_s24] sm:$0xff]  ;;  %v201_v7 = vmul.f32 %v362_v0, %v191_v4  ;;  %v202_v9 = vmul.f32 %v362_v0, %v192_v6  ;;  %v220_v10 = vld [vmem:[%s420_s24 + $0x8] sm:$0xff]  ;;  %v221_v12 = vld [vmem:[%s420_s24 + $0x10] sm:$0xff]  ;;  %v203_v14 = vmul.f32 %v362_v0, %v193_v11 }
  0x10   : > { %v229_v8 = vmul.f32 %v364_v1, %v219_v5  ;;  %v230_v13 = vmul.f32 %v364_v1, %v220_v10  ;;  %v231_v15 = vmul.f32 %v364_v1, %v221_v12  ;;  %v194_v16 = vld [vmem:[%s414_s21 + $0x18] sm:$0xff]  ;;  %v195_v18 = vld [vmem:[%s414_s21 + $0x20] sm:$0xff]  ;;  %v196_v24 = vld [vmem:[%s414_s21 + $0x28] sm:$0xff] }
  0x11   : > { %v222_v17 = vld [vmem:[%s420_s24 + $0x18] sm:$0xff]  ;;  %v211_v19 = vadd.f32 %v425_v2, %v201_v7  ;;  %v212_v21 = vadd.f32 %v425_v2, %v202_v9  ;;  %v204_v22 = vmul.f32 %v362_v0, %v194_v16  ;;  %v223_v23 = vld [vmem:[%s420_s24 + $0x20] sm:$0xff]  ;;  %v213_v26 = vadd.f32 %v425_v2, %v203_v14  ;;  %v224_v29 = vld [vmem:[%s420_s24 + $0x28] sm:$0xff] }
  0x12   : > { %v239_v20 = vadd.f32 %v430_v3, %v229_v8  ;;  %v240_v25 = vadd.f32 %v430_v3, %v230_v13  ;;  %v241_v27 = vadd.f32 %v430_v3, %v231_v15  ;;  %v232_v28 = vmul.f32 %v364_v1, %v222_v17  ;;  %v197_v38 = vld [vmem:[%s414_s21 + $0x30] sm:$0xff]  ;;  %v198_v44 = vld [vmem:[%s414_s21 + $0x38] sm:$0xff] }
  0x13   : > { %v214_v31 = vadd.f32 %v425_v2, %v204_v22  ;;  %v205_v32 = vmul.f32 %v362_v0, %v195_v18  ;;  %v233_v33 = vmul.f32 %v364_v1, %v223_v23  ;;  %v206_v37 = vmul.f32 %v362_v0, %v196_v24  ;;  %v225_v39 = vld [vmem:[%s420_s24 + $0x30] sm:$0xff]  ;;  %v226_v45 = vld [vmem:[%s420_s24 + $0x38] sm:$0xff] }
  0x14   : > { %v247_v30 = vadd.f32 %v239_v20, %v211_v19  ;;  %v248_v34 = vadd.f32 %v240_v25, %v212_v21  ;;  %v249_v35 = vadd.f32 %v241_v27, %v213_v26  ;;  %v242_v36 = vadd.f32 %v430_v3, %v232_v28 }
  0x15   : > { %v215_v41 = vadd.f32 %v425_v2, %v205_v32  ;;  %v243_v42 = vadd.f32 %v430_v3, %v233_v33  ;;  %v234_v43 = vmul.f32 %v364_v1, %v224_v29  ;;  %v216_v49 = vadd.f32 %v425_v2, %v206_v37 }
  0x16   : > { %v255_v40 = vmax.f32 %v247_v30, 0.0  ;;  %v256_v46 = vmax.f32 %v248_v34, 0.0  ;;  %v257_v47 = vmax.f32 %v249_v35, 0.0  ;;  %v250_v48 = vadd.f32 %v242_v36, %v214_v31 }
  0x17   : > { %v251_v50 = vadd.f32 %v243_v42, %v215_v41  ;;  %v244_v51 = vadd.f32 %v430_v3, %v234_v43  ;;  %v207_v52 = vmul.f32 %v362_v0, %v197_v38  ;;  %v235_v53 = vmul.f32 %v364_v1, %v225_v39 }
  0x18   : > { %263 = vst [vmem:[%s455_s4] sm:$0xff] %v255_v40  ;;  %v258_v54 = vmax.f32 %v250_v48, 0.0  ;;  %v208_v55 = vmul.f32 %v362_v0, %v198_v44  ;;  %v236_v56 = vmul.f32 %v364_v1, %v226_v45 }
  0x19   : > { %264 = vst [vmem:[%s455_s4 + $0x8] sm:$0xff] %v256_v46  ;;  %v259_v57 = vmax.f32 %v251_v50, 0.0  ;;  %v252_v58 = vadd.f32 %v244_v51, %v216_v49  ;;  %v217_v59 = vadd.f32 %v425_v2, %v207_v52  ;;  %v245_v60 = vadd.f32 %v430_v3, %v235_v53 }
  0x1a   : > { %265 = vst [vmem:[%s455_s4 + $0x10] sm:$0xff] %v257_v47  ;;  %v218_v61 = vadd.f32 %v425_v2, %v208_v55  ;;  %v246_v62 = vadd.f32 %v430_v3, %v236_v56 }
  0x1b   : > { %266 = vst [vmem:[%s455_s4 + $0x18] sm:$0xff] %v258_v54  ;;  %v260_v63 = vmax.f32 %v252_v58, 0.0  ;;  %v253_v4 = vadd.f32 %v245_v60, %v217_v59 }
  0x1c   : > { %267 = vst [vmem:[%s455_s4 + $0x20] sm:$0xff] %v259_v57  ;;  %v254_v5 = vadd.f32 %v246_v62, %v218_v61 }
  0x1d   : > { %268 = vst [vmem:[%s455_s4 + $0x28] sm:$0xff] %v260_v63  ;;  %v261_v0 = vmax.f32 %v253_v4, 0.0 }
  0x1e   : > { %v262_v1 = vmax.f32 %v254_v5, 0.0 }
  0x1f   : > { %269 = vst [vmem:[%s455_s4 + $0x30] sm:$0xff] %v261_v0 }
  0x20   : > { %270 = vst [vmem:[%s455_s4 + $0x38] sm:$0xff] %v262_v1 }
  0x21 PF: > { %s13_s12 = sadd.s32 1, %s372_s12  }
  0x22   : > { %p10_p4 = scmp.ge.s32.totalorder %s13_s12, 4  }
  0x24   :  { %12 = sbr.rel (!%p10_p4) target bundleno = 1 (0x1), region = 65 }

// kernel: resnet_down_block.4
= control target key start
LH: loop header
LB: loop body
LE: loop exit
PB: predicated region body
PF: predicated region fallthrough
CT: control target
= control target key end

     0   :  { %s1977_s15 = smov 0   ;;  %s2441_s0 = inlined_call_operand.vmem [shape: f32[2,64,128], index: 0, kind: input, shape index: {}]   ;;  %s2442_s1 = inlined_call_operand.vmem [shape: f32[2,128], index: 1, kind: input, shape index: {}]   ;;  %s2443_s2 = inlined_call_operand.vmem [shape: bf16[9,128,128], index: 2, kind: input, shape index: {}]   ;;  %s2444_s3 = inlined_call_operand.vmem [shape: f32[2,64,128], index: 3, kind: output, shape index: {0}]   ;;  %s2445_s4 = inlined_call_operand.vmem [shape: f32[2,2,128], index: 4, kind: output, shape index: {1}]  }
   0x1 LB: > { %s1414_s16 = sadd.s32 4294967295, %s1949_s15   ;;  %p1418_p0 = scmp.ge.s32.totalorder %s1949_s15, 1  ;;  %s1949_s15 = sphi %s1977_s15, %s15_s15  }
   0x2   : > { %p165_p1 = scmp.lt.s32.totalorder %s1949_s15, 3 }
   0x4   : > { %p166_p2 = pnand %p1418_p0, %p165_p1 }
   0x5   : > { %p195_p3 = scmp.lt.s32.totalorder (!%p166_p2), %s1414_s16, 1 }
   0x6   : > { %169 = sbr.rel (%p166_p2) target bundleno = 346 (0x15a), region = 32 }
   0xb   : > { %v1859_v0 = vld [vmem:[%s2443_s2 + $0x78] sm:$0xff]  ;;  %v1951_v2 = vmov 0.0   ;;  %v1858_v3 = vld [vmem:[%s2443_s2 + $0x70] sm:$0xff]  ;;  %s2447_s16 = smov (!%p195_p3, %s1414_s16), 1  ;;  %v1857_v6 = vld [vmem:[%s2443_s2 + $0x68] sm:$0xff] }
   0xc   : > { %v1867_v1 = vld [vmem:[%s2443_s2 + $0xb8] sm:$0xff]  ;;  %253 = vst [vmem:[#allocation2 + $0x40] sm:$0xff] %v1951_v2  ;;  %1916 = vmatpush.bf16.msra.mxu1 %v1859_v0  ;;  %379 = vmatpush.bf16.msra.mxu0 %v1859_v0  ;;  %v1866_v4 = vld [vmem:[%s2443_s2 + $0xb0] sm:$0xff]  ;;  %s1842_s27 = sshll.u32 %s2447_s16, 6  ;;  %v1865_v10 = vld [vmem:[%s2443_s2 + $0xa8] sm:$0xff] }
   0xd   : > { %254 = vst [vmem:[#allocation2 + $0x48] sm:$0x3] %v1951_v2  ;;  %562 = vmatpush.bf16.msra.mxu2 %v1867_v1  ;;  %v1875_v5 = vld [vmem:[%s2443_s2 + $0xf8] sm:$0xff]  ;;  %v1874_v7 = vld [vmem:[%s2443_s2 + $0xf0] sm:$0xff]  ;;  %s2018_s8 = scalar_lea.vmem %s2441_s0, %s1842_s27  ;;  %v2030_v11 = vld [vmem:[%s2442_s1] ss:$0 sm:$0xff]  ;;  %s2409_s11 = scalar_lea.vmem %s2444_s3, %s1842_s27 }
   0xe   : > { %255 = vst [vmem:[#allocation2 + $0x50] sm:$0xff] %v1951_v2  ;;  %676 = vmatpush.bf16.msra.mxu3 %v1875_v5  ;;  %v214_v8 = vld [vmem:[%s2018_s8 + $0x18] sm:$0xff]  ;;  %v215_v9 = vld [vmem:[%s2018_s8 + $0x20] sm:$0xff]  ;;  %v1873_v13 = vld [vmem:[%s2443_s2 + $0xe8] sm:$0xff]  ;;  %s1423_s27 = sshll.u32 %s2447_s16, 1 }
   0xf   : > { %256 = vst [vmem:[#allocation2 + $0x58] sm:$0x3] %v1951_v2  ;;  %v2035_v12 = vld [vmem:[%s2442_s1 + $0x1] ss:$0 sm:$0xff]  ;;  %v223_v14 = vmul.f32 %v2030_v11, %v214_v8  ;;  %v224_v15 = vmul.f32 %v2030_v11, %v215_v9  ;;  %v216_v22 = vld [vmem:[%s2018_s8 + $0x28] sm:$0xff]  ;;  %v217_v23 = vld [vmem:[%s2018_s8 + $0x30] sm:$0xff]  ;;  %s208_s14 = scalar_lea.vmem %s2445_s4, %s1423_s27 }
  0x10   : > { %245 = vst [vmem:[#allocation2] sm:$0xff] %v1951_v2  ;;  %1917 = vmatpush.bf16.msra.mxu1 %v1858_v3  ;;  %380 = vmatpush.bf16.msra.mxu0 %v1858_v3  ;;  %v211_v16 = vld [vmem:[%s2018_s8] sm:$0xff]  ;;  %v212_v26 = vld [vmem:[%s2018_s8 + $0x8] sm:$0xff]  ;;  %v1855_v27 = vld [vmem:[%s2443_s2 + $0x58] sm:$0xff]  ;;  %v225_v29 = vmul.f32 %v2030_v11, %v216_v22  ;;  %v226_v34 = vmul.f32 %v2030_v11, %v217_v23 }
  0x11   : > { %246 = vst [vmem:[#allocation2 + $0x8] sm:$0x3] %v1951_v2  ;;  %563 = vmatpush.bf16.msra.mxu2 %v1866_v4  ;;  %v1856_v17 = vld [vmem:[%s2443_s2 + $0x60] sm:$0xff]  ;;  %v232_v19 = vadd.f32 %v2035_v12, %v223_v14  ;;  %v233_v20 = vadd.f32 %v2035_v12, %v224_v15  ;;  %v220_v21 = vmul.f32 %v2030_v11, %v211_v16  ;;  %v213_v30 = vld [vmem:[%s2018_s8 + $0x10] sm:$0xff]  ;;  %v1863_v32 = vld [vmem:[%s2443_s2 + $0x98] sm:$0xff] }
  0x12   : > { %247 = vst [vmem:[#allocation2 + $0x10] sm:$0xff] %v1951_v2  ;;  %677 = vmatpush.bf16.msra.mxu3 %v1874_v7  ;;  %v1864_v18 = vld [vmem:[%s2443_s2 + $0xa0] sm:$0xff]  ;;  %v221_v31 = vmul.f32 %v2030_v11, %v212_v26  ;;  %v222_v35 = vmul.f32 %v2030_v11, %v213_v30  ;;  %v1871_v36 = vld [vmem:[%s2443_s2 + $0xd8] sm:$0xff]  ;;  %v1854_v37 = vld [vmem:[%s2443_s2 + $0x50] sm:$0xff]  ;;  %v234_v38 = vadd.f32 %v2035_v12, %v225_v29 }
  0x13   : > { %248 = vst [vmem:[#allocation2 + $0x18] sm:$0x3] %v1951_v2  ;;  %v2060_v24 = vmax.f32 %v232_v19, 0.0  ;;  %v1872_v25 = vld [vmem:[%s2443_s2 + $0xe0] sm:$0xff]  ;;  %v2070_v28 = vmax.f32 %v233_v20, 0.0  ;;  %v229_v33 = vadd.f32 %v2035_v12, %v220_v21  ;;  %v1862_v40 = vld [vmem:[%s2443_s2 + $0x90] sm:$0xff]  ;;  %v235_v42 = vadd.f32 %v2035_v12, %v226_v34 }
  0x14   : > { %249 = vst [vmem:[#allocation2 + $0x20] sm:$0xff] %v1951_v2  ;;  %1918 = vmatpush.bf16.msra.mxu1 %v1857_v6  ;;  %381 = vmatpush.bf16.msra.mxu0 %v1857_v6  ;;  %v230_v39 = vadd.f32 %v2035_v12, %v221_v31  ;;  %v231_v43 = vadd.f32 %v2035_v12, %v222_v35  ;;  %v1870_v44 = vld [vmem:[%s2443_s2 + $0xd0] sm:$0xff]  ;;  %v1853_v45 = vld [vmem:[%s2443_s2 + $0x48] sm:$0xff]  ;;  %v2111_v46 = vmax.f32 %v234_v38, 0.0  ;;  %v1852_v52 = vld [vmem:[%s2443_s2 + $0x40] sm:$0xff] }
  0x15   : > { %250 = vst [vmem:[#allocation2 + $0x28] sm:$0x3] %v1951_v2  ;;  %564 = vmatpush.bf16.msra.mxu2 %v1865_v10  ;;  %v2098_v41 = vmax.f32 %v229_v33, 0.0  ;;  %v1861_v48 = vld [vmem:[%s2443_s2 + $0x88] sm:$0xff]  ;;  %v2119_v49 = vmax.f32 %v235_v42, 0.0  ;;  %v1851_v54 = vld [vmem:[%s2443_s2 + $0x38] sm:$0xff]  ;;  %v2147_v59 = vpack.c.bf16 %v2070_v28, %v2060_v24 }
  0x16   : > { %251 = vst [vmem:[#allocation2 + $0x30] sm:$0xff] %v1951_v2  ;;  %678 = vmatpush.bf16.msra.mxu3 %v1873_v13  ;;  %v2113_v47 = vmax.f32 %v230_v39, 0.0  ;;  %v2121_v50 = vmax.f32 %v231_v43, 0.0  ;;  %v1869_v51 = vld [vmem:[%s2443_s2 + $0xc8] sm:$0xff]  ;;  %v1860_v55 = vld [vmem:[%s2443_s2 + $0x80] sm:$0xff]  ;;  %v1883_v56 = vld [vmem:[%s2443_s2 + $0x138] sm:$0xff] }
  0x17   : > { %252 = vst [vmem:[#allocation2 + $0x38] sm:$0x3] %v1951_v2  ;;  %v1899_v58 = vld [vmem:[%s2443_s2 + $0x1b8] sm:$0xff]  ;;  %v1868_v62 = vld [vmem:[%s2443_s2 + $0xc0] sm:$0xff]  ;;  %v1850_v63 = vld [vmem:[%s2443_s2 + $0x30] sm:$0xff]  ;;  %v2211_v22 = vpack.c.bf16 %v2119_v49, %v2111_v46 }
  0x18   : > { %257 = vst [vmem:[#allocation2 + $0x60] sm:$0xff] %v1951_v2  ;;  %1919 = vmatpush.bf16.msra.mxu1 %v1856_v17  ;;  %382 = vmatpush.bf16.msra.mxu0 %v1856_v17  ;;  %v302_v53 = vld [vmem:[#allocation2 + $0x1] sm:$0xff]  ;;  %v1907_v3 = vld [vmem:[%s2443_s2 + $0x1f8] sm:$0xff]  ;;  %v1882_v4 = vld [vmem:[%s2443_s2 + $0x130] sm:$0xff]  ;;  %v2215_v23 = vpack.c.bf16 %v2121_v50, %v2113_v47 }
  0x19   : > { %258 = vst [vmem:[#allocation2 + $0x68] sm:$0x3] %v1951_v2  ;;  %565 = vmatpush.bf16.msra.mxu2 %v1864_v18  ;;  %v485_v57 = vld [vmem:[#allocation2 + $0x2] sm:$0xff]  ;;  %v310_v60 = vpack.c.bf16 %v2098_v41, %v302_v53  ;;  %v1898_v5 = vld [vmem:[%s2443_s2 + $0x1b0] sm:$0xff]  ;;  %v1847_v18 = vld [vmem:[%s2443_s2 + $0x18] sm:$0xff] }
  0x1a   : > { %269 = vst [vmem:[#allocation2 + $0x41] sm:$0xff] %v2060_v24  ;;  %679 = vmatpush.bf16.msra.mxu3 %v1872_v25  ;;  %v1849_v8 = vld [vmem:[%s2443_s2 + $0x28] sm:$0xff]  ;;  %v1906_v9 = vld [vmem:[%s2443_s2 + $0x1f0] sm:$0xff]  ;;  %v1848_v14 = vld [vmem:[%s2443_s2 + $0x20] sm:$0xff] }
  0x1b   : > { %270 = vst [vmem:[#allocation2 + $0x51] sm:$0xff] %v2070_v28  ;;  %v1881_v10 = vld [vmem:[%s2443_s2 + $0x128] sm:$0xff]  ;;  %v1880_v16 = vld [vmem:[%s2443_s2 + $0x120] sm:$0xff]  ;;  %v1879_v21 = vld [vmem:[%s2443_s2 + $0x118] sm:$0xff] }
  0x1c   : > { %259 = vst [vmem:[#allocation2 + $0x70] sm:$0xff] %v1951_v2  ;;  %1920 = vmatpush.bf16.msra.mxu1 %v1855_v27  ;;  %383 = vmatpush.bf16.msra.mxu0 %v1855_v27  ;;  %v1897_v13 = vld [vmem:[%s2443_s2 + $0x1a8] sm:$0xff]  ;;  %v1896_v17 = vld [vmem:[%s2443_s2 + $0x1a0] sm:$0xff]  ;;  %v1846_v29 = vld [vmem:[%s2443_s2 + $0x10] sm:$0xff] }
  0x1d   : > { %260 = vst [vmem:[#allocation2 + $0x78] sm:$0x3] %v1951_v2  ;;  %566 = vmatpush.bf16.msra.mxu2 %v1863_v32  ;;  %v1905_v15 = vld [vmem:[%s2443_s2 + $0x1e8] sm:$0xff]  ;;  %v1878_v30 = vld [vmem:[%s2443_s2 + $0x110] sm:$0xff]  ;;  %v1895_v32 = vld [vmem:[%s2443_s2 + $0x198] sm:$0xff] }
  0x1e   : > { %261 = vst [vmem:[#allocation2 + $0x80] sm:$0xff] %v1951_v2  ;;  %680 = vmatpush.bf16.msra.mxu3 %v1871_v36  ;;  %v1904_v33 = vld [vmem:[%s2443_s2 + $0x1e0] sm:$0xff]  ;;  %v1845_v34 = vld [vmem:[%s2443_s2 + $0x8] sm:$0xff]  ;;  %v1894_v36 = vld [vmem:[%s2443_s2 + $0x190] sm:$0xff] }
  0x1f   : > { %262 = vst [vmem:[#allocation2 + $0x88] sm:$0x3] %v1951_v2  ;;  %v1877_v35 = vld [vmem:[%s2443_s2 + $0x108] sm:$0xff]  ;;  %v218_v38 = vld [vmem:[%s2018_s8 + $0x38] sm:$0xff]  ;;  %v1844_v39 = vld [vmem:[%s2443_s2] sm:$0xff] }
  0x20   : > { %263 = vst [vmem:[#allocation2 + $0x90] sm:$0xff] %v1951_v2  ;;  %1921 = vmatpush.bf16.msra.mxu1 %v1854_v37  ;;  %384 = vmatpush.bf16.msra.mxu0 %v1854_v37  ;;  %v1903_v37 = vld [vmem:[%s2443_s2 + $0x1d8] sm:$0xff]  ;;  %v1876_v43 = vld [vmem:[%s2443_s2 + $0x100] sm:$0xff] }
  0x21   : > { %264 = vst [vmem:[#allocation2 + $0x98] sm:$0x3] %v1951_v2  ;;  %567 = vmatpush.bf16.msra.mxu2 %v1862_v40  ;;  %v2223_v27 = vld [vmem:[#allocation2 + $0x40] sm:$0xff]  ;;  %v227_v40 = vmul.f32 %v2030_v11, %v218_v38  ;;  %v1891_v42 = vld [vmem:[%s2443_s2 + $0x178] sm:$0xff] }
  0x22   : > { %266 = vst [vmem:[#allocation2 + $0x11] sm:$0xff] %v2098_v41  ;;  %681 = vmatpush.bf16.msra.mxu3 %v1870_v44  ;;  %v1915_v44 = vld [vmem:[%s2443_s2 + $0x238] sm:$0xff] }
  0x23   : > { %271 = vst [vmem:[#allocation2 + $0x61] sm:$0xff] %v2111_v46  ;;  %v2271_v11 = vld [vmem:[#allocation2 + $0x52] sm:$0xff] }
  0x24   : > { %272 = vst [vmem:[#allocation2 + $0x71] sm:$0xff] %v2119_v49  ;;  %1922 = vmatpush.bf16.msra.mxu1 %v1853_v45  ;;  %385 = vmatpush.bf16.msra.mxu0 %v1853_v45  ;;  %v236_v45 = vadd.f32 %v2035_v12, %v227_v40 }
  0x25   : > { %267 = vst [vmem:[#allocation2 + $0x21] sm:$0xff] %v2113_v47  ;;  %568 = vmatpush.bf16.msra.mxu2 %v1861_v48  ;;  %v2269_v48 = vld [vmem:[#allocation2 + $0x42] sm:$0xff] }
  0x26   : > { %268 = vst [vmem:[#allocation2 + $0x31] sm:$0xff] %v2121_v50  ;;  %682 = vmatpush.bf16.msra.mxu3 %v1869_v51  ;;  %v2273_v51 = vmax.f32 %v236_v45, 0.0  ;;  %v2285_v12 = vpack.c.bf16 %v2271_v11, %v2269_v48 }
  0x28   : > { %1923 = vmatpush.bf16.msra.mxu1 %v1852_v52  ;;  %386 = vmatpush.bf16.msra.mxu0 %v1852_v52  ;;  %v1890_v52 = vld [vmem:[%s2443_s2 + $0x170] sm:$0xff]  ;;  %273 = vst [vmem:[#allocation2 + $0x81] sm:$0xff] %v2273_v51 }
  0x29   : > { %v2150_v61 = vld [vmem:[#allocation2 + $0x12] sm:$0xff]  ;;  %569 = vmatpush.bf16.msra.mxu2 %v1860_v55 }
  0x2a   : > { %v493_v0 = vpack.c.bf16 %v2150_v61, %v485_v57  ;;  %v2159_v1 = vld [vmem:[#allocation2 + $0x10] sm:$0xff]  ;;  %683 = vmatpush.bf16.msra.mxu3 %v1868_v62 }
  0x2b   : > { %397 = vmatmul.bf16.vlgmr.msra.gmra.mxu1 %v2147_v59  ;;  %387 = vmatmul.bf16.vlgmr.msra.gmra.mxu0 %v310_v60  ;;  %v282_v53 = vpack.c.bf16 %v2159_v1, %v1951_v2  ;;  %v603_v55 = vld [vmem:[#allocation2 + $0x50] sm:$0xff]  ;;  %v1889_v2 = vld [vmem:[%s2443_s2 + $0x168] sm:$0xff] }
  0x2c   : > { %456 = vmatpush.bf16.msrb.mxu1 %v1851_v54  ;;  %790 = vmatpush.bf16.msrb.mxu0 %v1883_v56  ;;  %v2171_v6 = vld [vmem:[#allocation2 + $0x20] sm:$0xff]  ;;  %v721_v54 = vpack.c.bf16 %v2113_v47, %v2098_v41  ;;  %v1914_v57 = vld [vmem:[%s2443_s2 + $0x230] sm:$0xff]  ;;  %v1893_v41 = vld [vmem:[%s2443_s2 + $0x188] sm:$0xff] }
  0x2d   : > { %1019 = vmatpush.bf16.msrb.mxu2 %v1899_v58  ;;  %v607_v7 = vpack.c.bf16 %v2171_v6, %v2159_v1  ;;  %v2202_v19 = vld [vmem:[#allocation2 + $0x22] sm:$0xff]  ;;  %v2204_v20 = vld [vmem:[#allocation2 + $0x32] sm:$0xff]  ;;  %v723_v58 = vpack.c.bf16 %v2111_v46, %v2070_v28 }
  0x2e   : > { %570 = vmatmul.bf16.vlgmr.msra.gmra.mxu2 %v493_v0  ;;  %1133 = vmatpush.bf16.msrb.mxu3 %v1907_v3  ;;  %v2219_v25 = vpack.c.bf16 %v2204_v20, %v2202_v19  ;;  %v2221_v26 = vld [vmem:[#allocation2 + $0x30] sm:$0xff]  ;;  %v2287_v56 = vld [vmem:[#allocation2 + $0x60] sm:$0xff]  ;;  %v1913_v60 = vld [vmem:[%s2443_s2 + $0x228] sm:$0xff] }
  0x2f   : > { %684 = vmatmul.bf16.vlgmr.msra.gmra.mxu3 %v607_v7  ;;  %v608_v31 = vpack.c.bf16 %v2223_v27, %v2221_v26  ;;  %v609_v47 = vpack.c.bf16 %v2287_v56, %v603_v55  ;;  %v1902_v62 = vld [vmem:[%s2443_s2 + $0x1d0] sm:$0xff]  ;;  %v1888_v28 = vld [vmem:[%s2443_s2 + $0x160] sm:$0xff]  ;;  %v1901_v46 = vld [vmem:[%s2443_s2 + $0x1c8] sm:$0xff]  ;;  %v283_v7 = vpack.c.bf16 %v2221_v26, %v2171_v6 }
  0x30   : > { %457 = vmatpush.bf16.msrb.mxu1 %v1850_v63  ;;  %791 = vmatpush.bf16.msrb.mxu0 %v1882_v4  ;;  %v1892_v63 = vld [vmem:[%s2443_s2 + $0x180] sm:$0xff]  ;;  %v1887_v1 = vld [vmem:[%s2443_s2 + $0x158] sm:$0xff] }
  0x31   : > { %1020 = vmatpush.bf16.msrb.mxu2 %v1898_v5  ;;  %v1912_v0 = vld [vmem:[%s2443_s2 + $0x220] sm:$0xff]  ;;  %v2325_v4 = vld [vmem:[#allocation2 + $0x72] sm:$0xff] }
  0x32   : > { %1134 = vmatpush.bf16.msrb.mxu3 %v1906_v9  ;;  %v2323_v3 = vld [vmem:[#allocation2 + $0x62] sm:$0xff]  ;;  %v1886_v5 = vld [vmem:[%s2443_s2 + $0x150] sm:$0xff]  ;;  %v1911_v6 = vld [vmem:[%s2443_s2 + $0x218] sm:$0xff] }
  0x33   : > { %v496_v9 = vpack.c.bf16 %v2325_v4, %v2323_v3 }
  0x34   : > { %458 = vmatpush.bf16.msrb.mxu1 %v1849_v8  ;;  %792 = vmatpush.bf16.msrb.mxu0 %v1881_v10  ;;  %v722_v8 = vpack.c.bf16 %v2060_v24, %v2121_v50  ;;  %v605_v10 = vld [vmem:[#allocation2 + $0x70] sm:$0xff]  ;;  %v1900_v24 = vld [vmem:[%s2443_s2 + $0x1c0] sm:$0xff]  ;;  %v835_v50 = vpack.c.bf16 %v2202_v19, %v2150_v61  ;;  %v284_v61 = vpack.c.bf16 %v603_v55, %v2223_v27 }
  0x35   : > { %1021 = vmatpush.bf16.msrb.mxu2 %v1897_v13  ;;  %v606_v13 = vld [vmem:[#allocation2 + $0x80] sm:$0xff]  ;;  %v285_v26 = vpack.c.bf16 %v605_v10, %v2287_v56  ;;  %v724_v27 = vpack.c.bf16 %v2273_v51, %v2119_v49 }
  0x36   : > { %1135 = vmatpush.bf16.msrb.mxu3 %v1905_v15  ;;  %v1885_v15 = vld [vmem:[%s2443_s2 + $0x148] sm:$0xff]  ;;  %v1908_v19 = vld [vmem:[%s2443_s2 + $0x200] sm:$0xff] }
  0x37   : > { %v1176_v49 = vld [vmem:[#allocation2 + $0x82] sm:$0xff] }
  0x38   : > { %459 = vmatpush.bf16.msrb.mxu1 %v1848_v14  ;;  %793 = vmatpush.bf16.msrb.mxu0 %v1880_v16  ;;  %v610_v14 = vpack.c.bf16 %v606_v13, %v605_v10  ;;  %v1910_v16 = vld [vmem:[%s2443_s2 + $0x210] sm:$0xff] }
  0x39   : > { %1022 = vmatpush.bf16.msrb.mxu2 %v1896_v17  ;;  %v1884_v17 = vld [vmem:[%s2443_s2 + $0x140] sm:$0xff] }
  0x3a   : > { %1136 = vmatpush.bf16.msrb.mxu3 %v1904_v33 }
  0x3b   : > { %402 = vmatmul.bf16.gmra.mxu1 %v2211_v22  ;;  %392 = vmatmul.bf16.gmra.mxu0 %v2215_v23 }
  0x3c   : > { %460 = vmatpush.bf16.msrb.mxu1 %v1847_v18  ;;  %794 = vmatpush.bf16.msrb.mxu0 %v1879_v21  ;;  %v1909_v18 = vld [vmem:[%s2443_s2 + $0x208] sm:$0xff]  ;;  %v836_v21 = vpack.c.bf16 %v2269_v48, %v2204_v20  ;;  %v953_v20 = vpack.c.bf16 0.0, %v606_v13 }
  0x3d   : > { %1023 = vmatpush.bf16.msrb.mxu2 %v1895_v32 }
  0x3e   : > { %575 = vmatmul.bf16.gmra.mxu2 %v2219_v25  ;;  %1137 = vmatpush.bf16.msrb.mxu3 %v1903_v37 }
  0x3f   : > { %689 = vmatmul.bf16.gmra.mxu3 %v608_v31 }
  0x40   : > { %461 = vmatpush.bf16.msrb.mxu1 %v1846_v29  ;;  %795 = vmatpush.bf16.msrb.mxu0 %v1878_v30  ;;  %v1063_v29 = vld [vmem:[#allocation2 + $0x91] sm:$0xff] }
  0x41   : > { %1024 = vmatpush.bf16.msrb.mxu2 %v1894_v36  ;;  %v1177_v30 = vld [vmem:[#allocation2 + $0x92] sm:$0xff]  ;;  %v838_v36 = vpack.c.bf16 %v1176_v49, %v2325_v4 }
  0x42   : > { %1138 = vmatpush.bf16.msrb.mxu3 %v1902_v62 }
  0x44   : > { %462 = vmatpush.bf16.msrb.mxu1 %v1845_v34  ;;  %796 = vmatpush.bf16.msrb.mxu0 %v1877_v35 }
  0x45   : > { %1025 = vmatpush.bf16.msrb.mxu2 %v1893_v41 }
  0x46   : > { %1139 = vmatpush.bf16.msrb.mxu3 %v1901_v46 }
  0x48   : > { %463 = vmatpush.bf16.msrb.mxu1 %v1844_v39  ;;  %797 = vmatpush.bf16.msrb.mxu0 %v1876_v43 }
  0x49   : > { %1026 = vmatpush.bf16.msrb.mxu2 %v1892_v63 }
  0x4a   : > { %1140 = vmatpush.bf16.msrb.mxu3 %v1900_v24 }
  0x4b   : > { %464 = vmatmul.bf16.vlgmr.msrb.gmra.mxu1 %v282_v53  ;;  %798 = vmatmul.bf16.vlgmr.msrb.gmra.mxu0 %v721_v54 }
  0x4c   : > { %904 = vmatpush.bf16.msra.mxu1 %v1891_v42  ;;  %1247 = vmatpush.bf16.msra.mxu0 %v1915_v44 }
  0x4d   : > { %1924 = vmatpush.bf16.msra.mxu2 %v1915_v44 }
  0x4e   : > { %580 = vmatmul.bf16.gmra.mxu2 %v2285_v12 }
  0x4f   : > { %694 = vmatmul.bf16.gmra.mxu3 %v609_v47 }
  0x50   : > { %905 = vmatpush.bf16.msra.mxu1 %v1890_v52  ;;  %1248 = vmatpush.bf16.msra.mxu0 %v1914_v57 }
  0x51   : > { %1925 = vmatpush.bf16.msra.mxu2 %v1914_v57 }
  0x54   : > { %906 = vmatpush.bf16.msra.mxu1 %v1889_v2  ;;  %1249 = vmatpush.bf16.msra.mxu0 %v1913_v60 }
  0x55   : > { %1926 = vmatpush.bf16.msra.mxu2 %v1913_v60 }
  0x58   : > { %907 = vmatpush.bf16.msra.mxu1 %v1888_v28  ;;  %1250 = vmatpush.bf16.msra.mxu0 %v1912_v0 }
  0x59   : > { %1927 = vmatpush.bf16.msra.mxu2 %v1912_v0 }
  0x5b   : > { %469 = vmatmul.bf16.gmra.mxu1 %v283_v7  ;;  %803 = vmatmul.bf16.gmra.mxu0 %v722_v8 }
  0x5c   : > { %908 = vmatpush.bf16.msra.mxu1 %v1887_v1  ;;  %1251 = vmatpush.bf16.msra.mxu0 %v1911_v6 }
  0x5d   : > { %1928 = vmatpush.bf16.msra.mxu2 %v1911_v6 }
  0x5e   : > { %585 = vmatmul.bf16.gmra.mxu2 %v496_v9 }
  0x5f   : > { %699 = vmatmul.bf16.gmra.mxu3 %v610_v14 }
  0x60   : > { %909 = vmatpush.bf16.msra.mxu1 %v1886_v5  ;;  %1252 = vmatpush.bf16.msra.mxu0 %v1910_v16 }
  0x61   : > { %1929 = vmatpush.bf16.msra.mxu2 %v1910_v16 }
  0x64   : > { %910 = vmatpush.bf16.msra.mxu1 %v1885_v15  ;;  %1253 = vmatpush.bf16.msra.mxu0 %v1909_v18 }
  0x65   : > { %1930 = vmatpush.bf16.msra.mxu2 %v1909_v18 }
  0x68   : > { %911 = vmatpush.bf16.msra.mxu1 %v1884_v17  ;;  %1254 = vmatpush.bf16.msra.mxu0 %v1908_v19 }
  0x69   : > { %1931 = vmatpush.bf16.msra.mxu2 %v1908_v19 }
  0x6b   : > { %474 = vmatmul.bf16.gmra.mxu1 %v284_v61  ;;  %808 = vmatmul.bf16.gmra.mxu0 %v723_v58 }
  0x6e   : > { %1027 = vmatmul.bf16.vlgmr.msrb.gmra.mxu2 %v283_v7 }
  0x6f   : > { %1141 = vmatmul.bf16.vlgmr.msrb.gmra.mxu3 %v2215_v23  ;;  %v1067_v23 = vpack.c.bf16 %v1063_v29, %v2273_v51 }
  0x7b   : > { %479 = vmatmul.bf16.gmra.mxu1 %v285_v26  ;;  %813 = vmatmul.bf16.gmra.mxu0 %v724_v27 }
  0x7e   : > { %1032 = vmatmul.bf16.gmra.mxu2 %v284_v61 }
  0x7f   : > { %1146 = vmatmul.bf16.gmra.mxu3 %v2147_v59  ;;  %v837_v59 = vpack.c.bf16 %v2323_v3, %v2271_v11 }
  0x8b   : > { %912 = vmatmul.bf16.vlgmr.msra.gmra.mxu1 %v835_v50  ;;  %1255 = vmatmul.bf16.vlgmr.msra.gmra.mxu0 %v2219_v25  ;;  %v1181_v25 = vpack.c.bf16 %v1177_v30, %v1176_v49 }
  0x8e   : > { %1037 = vmatmul.bf16.gmra.mxu2 %v285_v26 }
  0x8f   : > { %1151 = vmatmul.bf16.gmra.mxu3 %v2211_v22 }
  0x9b   : > { %917 = vmatmul.bf16.gmra.mxu1 %v836_v21  ;;  %1260 = vmatmul.bf16.gmra.mxu0 %v2285_v12 }
  0x9e   : > { %1042 = vmatmul.bf16.gmra.mxu2 %v953_v20 }
  0x9f   : > { %1156 = vmatmul.bf16.gmra.mxu3 %v1067_v23 }
  0xa8   : > { %v398_v31 = vpop.f32.mrf.mxu1  ;;  %v388_v32 = vpop.f32.mrf.mxu0 }
  0xab   : > { %922 = vmatmul.bf16.gmra.mxu1 %v837_v59  ;;  %1265 = vmatmul.bf16.gmra.mxu0 %v496_v9 }
  0xae   : > { %1270 = vmatmul.bf16.vlgmr.msra.gmra.mxu2 %v1181_v25 }
  0xb0   : > { %v400_v33 = vpop.f32.mrf.mxu1  ;;  %v390_v34 = vpop.f32.mrf.mxu0 }
  0xb1   : > { %v571_v22 = vpop.f32.mrf.mxu2 }
  0xb2   : > { %v685_v35 = vpop.f32.mrf.mxu3 }
  0xb8   : > { %v403_v38 = vpop.f32.mrf.mxu1  ;;  %v393_v39 = vpop.f32.mrf.mxu0 }
  0xb9   : > { %v573_v37 = vpop.f32.mrf.mxu2 }
  0xba   : > { %v687_v40 = vpop.f32.mrf.mxu3 }
  0xbb   : > { %927 = vmatmul.bf16.gmra.mxu1 %v838_v36 }
  0xc0   : > { %v405_v43 = vpop.f32.mrf.mxu1  ;;  %v395_v44 = vpop.f32.mrf.mxu0 }
  0xc1   : > { %v576_v42 = vpop.f32.mrf.mxu2 }
  0xc2   : > { %v2374_v45 = vpop.f32.mrf.mxu3 }
  0xc8   : > { %v465_v11 = vpop.f32.mrf.mxu1  ;;  %v799_v51 = vpop.f32.mrf.mxu0 }
  0xc9   : > { %v578_v48 = vpop.f32.mrf.mxu2  ;;  %v466_v52 = vadd.f32 %v465_v11, %v388_v32 }
  0xca   : > { %v2376_v54 = vpop.f32.mrf.mxu3 }
  0xcb   : > { %v591_v53 = vadd.f32 %v571_v22, %v466_v52 }
  0xcd   : > { %v705_v49 = vadd.f32 %v685_v35, %v591_v53 }
  0xcf   : > { %v819_v59 = vadd.f32 %v799_v51, %v705_v49 }
  0xd0   : > { %v467_v55 = vpop.f32.mrf.mxu1  ;;  %v801_v56 = vpop.f32.mrf.mxu0 }
  0xd1   : > { %v581_v12 = vpop.f32.mrf.mxu2  ;;  %v468_v57 = vadd.f32 %v467_v55, %v390_v34 }
  0xd2   : > { %v2378_v41 = vpop.f32.mrf.mxu3 }
  0xd3   : > { %v592_v2 = vadd.f32 %v573_v37, %v468_v57 }
  0xd5   : > { %v706_v34 = vadd.f32 %v687_v40, %v592_v2 }
  0xd8   : > { %v470_v58 = vpop.f32.mrf.mxu1  ;;  %v804_v60 = vpop.f32.mrf.mxu0 }
  0xd9   : > { %v583_v47 = vpop.f32.mrf.mxu2  ;;  %v471_v62 = vadd.f32 %v470_v58, %v393_v39 }
  0xda   : > { %v2380_v46 = vpop.f32.mrf.mxu3 }
  0xdb   : > { %v593_v63 = vadd.f32 %v576_v42, %v471_v62 }
  0xe0   : > { %v472_v0 = vpop.f32.mrf.mxu1  ;;  %v2382_v1 = vpop.f32.mrf.mxu0 }
  0xe1   : > { %v586_v28 = vpop.f32.mrf.mxu2  ;;  %v473_v3 = vadd.f32 %v472_v0, %v395_v44 }
  0xe2   : > { %v2386_v10 = vpop.f32.mrf.mxu3 }
  0xe3   : > { %v594_v4 = vadd.f32 %v578_v48, %v473_v3  ;;  %v707_v48 = vadd.f32 %v2374_v45, %v593_v63 }
  0xe5   : > { %v821_v52 = vadd.f32 %v804_v60, %v707_v48  ;;  %v708_v58 = vadd.f32 %v2376_v54, %v594_v4 }
  0xe7   : > { %v822_v63 = vadd.f32 %v2382_v1, %v708_v58 }
  0xe8   : > { %v475_v7 = vpop.f32.mrf.mxu1  ;;  %v2384_v8 = vpop.f32.mrf.mxu0 }
  0xe9   : > { %v588_v5 = vpop.f32.mrf.mxu2  ;;  %v476_v9 = vadd.f32 %v475_v7, %v398_v31 }
  0xea   : > { %v2394_v16 = vpop.f32.mrf.mxu3 }
  0xeb   : > { %v2388_v13 = vadd.f32 %v581_v12, %v476_v9 }
  0xf0   : > { %v477_v15 = vpop.f32.mrf.mxu1  ;;  %v2390_v6 = vpop.f32.mrf.mxu0 }
  0xf1   : > { %v1028_v14 = vpop.f32.mrf.mxu2  ;;  %v478_v24 = vadd.f32 %v477_v15, %v400_v33 }
  0xf2   : > { %v1142_v26 = vpop.f32.mrf.mxu3 }
  0xf3   : > { %v2392_v50 = vadd.f32 %v583_v47, %v478_v24  ;;  %v709_v24 = vadd.f32 %v2378_v41, %v2388_v13 }
  0xf8   : > { %v480_v18 = vpop.f32.mrf.mxu1  ;;  %v2396_v61 = vpop.f32.mrf.mxu0 }
  0xf9   : > { %v1030_v17 = vpop.f32.mrf.mxu2  ;;  %v481_v19 = vadd.f32 %v480_v18, %v403_v38  ;;  %v820_v38 = vadd.f32 %v801_v56, %v706_v34 }
  0xfa   : > { %v1144_v31 = vpop.f32.mrf.mxu3 }
  0xfb   : > { %v2398_v21 = vadd.f32 %v586_v28, %v481_v19  ;;  %v823_v19 = vadd.f32 %v2384_v8, %v709_v24 }
 0x100   : > { %v482_v20 = vpop.f32.mrf.mxu1  ;;  %v2400_v29 = vpop.f32.mrf.mxu0 }
 0x101   : > { %v1033_v27 = vpop.f32.mrf.mxu2  ;;  %v483_v23 = vadd.f32 %v482_v20, %v405_v43 }
 0x102   : > { %v1147_v44 = vpop.f32.mrf.mxu3 }
 0x103   : > { %v2402_v30 = vadd.f32 %v588_v5, %v483_v23 }
 0x108   : > { %v913_v32 = vpop.f32.mrf.mxu1  ;;  %v1256_v25 = vpop.f32.mrf.mxu0 }
 0x109   : > { %v933_v22 = vadd.f32 %v913_v32, %v819_v59  ;;  %v1035_v33 = vpop.f32.mrf.mxu2 }
 0x10a   : > { %v1149_v0 = vpop.f32.mrf.mxu3 }
 0x10b   : > { %v1048_v36 = vadd.f32 %v1028_v14, %v933_v22 }
 0x10d   : > { %v1162_v37 = vadd.f32 %v1142_v26, %v1048_v36 }
 0x10f   : > { %v1276_v35 = vadd.f32 %v1256_v25, %v1162_v37 }
 0x110   : > { %v915_v39 = vpop.f32.mrf.mxu1  ;;  %v1258_v42 = vpop.f32.mrf.mxu0 }
 0x111   : > { %1284 = vst [vmem:[%s2409_s11] sm:$0xff] %v1276_v35  ;;  %v934_v43 = vadd.f32 %v915_v39, %v820_v38  ;;  %v1038_v11 = vpop.f32.mrf.mxu2  ;;  %v1306_v57 = vmul.f32 %v1276_v35, %v1276_v35 }
 0x112   : > { %v1152_v18 = vpop.f32.mrf.mxu3 }
 0x113   : > { %v1049_v40 = vadd.f32 %v1030_v17, %v934_v43 }
 0x115   : > { %v1163_v51 = vadd.f32 %v1144_v31, %v1049_v40  ;;  %v710_v31 = vadd.f32 %v2380_v46, %v2392_v50 }
 0x117   : > { %v1277_v53 = vadd.f32 %v1258_v42, %v1163_v51  ;;  %v824_v25 = vadd.f32 %v2390_v6, %v710_v31 }
 0x118   : > { %v918_v12 = vpop.f32.mrf.mxu1  ;;  %v1261_v55 = vpop.f32.mrf.mxu0 }
 0x119   : > { %1285 = vst [vmem:[%s2409_s11 + $0x8] sm:$0xff] %v1277_v53  ;;  %v1292_v56 = vadd.f32 %v1277_v53, %v1276_v35  ;;  %v1307_v2 = vmul.f32 %v1277_v53, %v1277_v53  ;;  %v935_v47 = vadd.f32 %v918_v12, %v821_v52  ;;  %v1040_v45 = vpop.f32.mrf.mxu2  ;;  %v711_v35 = vadd.f32 %v2386_v10, %v2398_v21 }
 0x11a   : > { %v1154_v8 = vpop.f32.mrf.mxu3  ;;  %v712_v52 = vadd.f32 %v2394_v16, %v2402_v30 }
 0x11b   : > { %v1314_v62 = vadd.f32 %v1307_v2, %v1306_v57  ;;  %v1050_v28 = vadd.f32 %v1033_v27, %v935_v47  ;;  %v825_v43 = vadd.f32 %v2396_v61, %v711_v35 }
 0x11d   : > { %v1164_v3 = vadd.f32 %v1147_v44, %v1050_v28 }
 0x11f   : > { %v1278_v5 = vadd.f32 %v1261_v55, %v1164_v3  ;;  %v826_v55 = vadd.f32 %v2400_v29, %v712_v52 }
 0x120   : > { %v920_v60 = vpop.f32.mrf.mxu1  ;;  %v1263_v7 = vpop.f32.mrf.mxu0 }
 0x121   : > { %1286 = vst [vmem:[%s2409_s11 + $0x10] sm:$0xff] %v1278_v5  ;;  %v1293_v9 = vadd.f32 %v1292_v56, %v1278_v5  ;;  %v1308_v14 = vmul.f32 %v1278_v5, %v1278_v5  ;;  %v936_v15 = vadd.f32 %v920_v60, %v822_v63  ;;  %v1043_v1 = vpop.f32.mrf.mxu2 }
 0x122   : > { %v1157_v51 = vpop.f32.mrf.mxu3 }
 0x123   : > { %v1315_v17 = vadd.f32 %v1314_v62, %v1308_v14  ;;  %v1051_v54 = vadd.f32 %v1035_v33, %v936_v15 }
 0x125   : > { %v1165_v4 = vadd.f32 %v1149_v0, %v1051_v54 }
 0x127   : > { %v1279_v26 = vadd.f32 %v1263_v7, %v1165_v4 }
 0x128   : > { %v923_v27 = vpop.f32.mrf.mxu1  ;;  %v1266_v59 = vpop.f32.mrf.mxu0 }
 0x129   : > { %1287 = vst [vmem:[%s2409_s11 + $0x18] sm:$0xff] %v1279_v26  ;;  %v1294_v20 = vadd.f32 %v1293_v9, %v1279_v26  ;;  %v1309_v23 = vmul.f32 %v1279_v26, %v1279_v26  ;;  %v937_v49 = vadd.f32 %v923_v27, %v823_v19  ;;  %v1045_v38 = vpop.f32.mrf.mxu2 }
 0x12a   : > { %v1159_v28 = vpop.f32.mrf.mxu3 }
 0x12b   : > { %v1316_v32 = vadd.f32 %v1315_v17, %v1309_v23  ;;  %v1052_v41 = vadd.f32 %v1038_v11, %v937_v49 }
 0x12d   : > { %v1166_v13 = vadd.f32 %v1152_v18, %v1052_v41 }
 0x12f   : > { %v1280_v22 = vadd.f32 %v1266_v59, %v1166_v13 }
 0x130   : > { %v925_v33 = vpop.f32.mrf.mxu1  ;;  %v1268_v46 = vpop.f32.mrf.mxu0 }
 0x131   : > { %1288 = vst [vmem:[%s2409_s11 + $0x20] sm:$0xff] %v1280_v22  ;;  %v1295_v34 = vadd.f32 %v1294_v20, %v1280_v22  ;;  %v1310_v36 = vmul.f32 %v1280_v22, %v1280_v22  ;;  %v938_v37 = vadd.f32 %v925_v33, %v824_v25  ;;  %v1271_v10 = vpop.f32.mrf.mxu2 }
 0x133   : > { %v1317_v39 = vadd.f32 %v1316_v32, %v1310_v36  ;;  %v1053_v42 = vadd.f32 %v1040_v45, %v938_v37 }
 0x135   : > { %v1167_v50 = vadd.f32 %v1154_v8, %v1053_v42 }
 0x137   : > { %v1281_v6 = vadd.f32 %v1268_v46, %v1167_v50 }
 0x138   : > { %v928_v44 = vpop.f32.mrf.mxu1 }
 0x139   : > { %1289 = vst [vmem:[%s2409_s11 + $0x28] sm:$0xff] %v1281_v6  ;;  %v1296_v48 = vadd.f32 %v1295_v34, %v1281_v6  ;;  %v1311_v40 = vmul.f32 %v1281_v6, %v1281_v6  ;;  %v939_v11 = vadd.f32 %v928_v44, %v825_v43  ;;  %v1273_v3 = vpop.f32.mrf.mxu2 }
 0x13b   : > { %v1318_v53 = vadd.f32 %v1317_v39, %v1311_v40  ;;  %v1054_v12 = vadd.f32 %v1043_v1, %v939_v11 }
 0x13d   : > { %v1168_v21 = vadd.f32 %v1157_v51, %v1054_v12 }
 0x13f   : > { %v1282_v57 = vadd.f32 %v1271_v10, %v1168_v21 }
 0x140   : > { %v930_v61 = vpop.f32.mrf.mxu1 }
 0x141   : > { %1290 = vst [vmem:[%s2409_s11 + $0x30] sm:$0xff] %v1282_v57  ;;  %v1297_v56 = vadd.f32 %v1296_v48, %v1282_v57  ;;  %v1312_v2 = vmul.f32 %v1282_v57, %v1282_v57  ;;  %v940_v47 = vadd.f32 %v930_v61, %v826_v55 }
 0x143   : > { %v1319_v58 = vadd.f32 %v1318_v53, %v1312_v2  ;;  %v1055_v62 = vadd.f32 %v1045_v38, %v940_v47 }
 0x145   : > { %v1169_v0 = vadd.f32 %v1159_v28, %v1055_v62 }
 0x147   : > { %v1283_v16 = vadd.f32 %v1273_v3, %v1169_v0 }
 0x149   : > { %1291 = vst [vmem:[%s2409_s11 + $0x38] sm:$0xff] %v1283_v16  ;;  %v1298_v30 = vadd.f32 %v1297_v56, %v1283_v16  ;;  %v1313_v45 = vmul.f32 %v1283_v16, %v1283_v16 }
 0x14b   : > { %v1299_v63 = vrot.slane %v1298_v30, 4  ;;  %v1320_v5 = vadd.f32 %v1319_v58, %v1313_v45 }
 0x14d   : > { %v1300_v60 = vadd.f32 %v1299_v63, %v1298_v30  ;;  %v1321_v29 = vrot.slane %v1320_v5, 4 }
 0x14f   : > { %v1301_v7 = vrot.slane %v1300_v60, 2  ;;  %v1322_v9 = vadd.f32 %v1321_v29, %v1320_v5 }
 0x151   : > { %v1302_v14 = vadd.f32 %v1301_v7, %v1300_v60  ;;  %v1323_v15 = vrot.slane %v1322_v9, 2 }
 0x153   : > { %v1303_v24 = vrot.slane %v1302_v14, 1  ;;  %v1324_v17 = vadd.f32 %v1323_v15, %v1322_v9 }
 0x155   : > { %v1304_v54 = vadd.f32 %v1303_v24, %v1302_v14  ;;  %v1325_v4 = vrot.slane %v1324_v17, 1 }
 0x157   : > { %1305 = vst [vmem:[%s208_s14] sm:$0x1] %v1304_v54  ;;  %v1326_v18 = vadd.f32 %v1325_v4, %v1324_v17 }
 0x159   : > { %1327 = vst [vmem:[%s208_s14 + $0x1] sm:$0x1] %v1326_v18 }
 0x15a PF: > { %s15_s15 = sadd.s32 1, %s1949_s15  }
 0x15b   : > { %p12_p4 = scmp.ge.s32.totalorder %s15_s15, 4  }
 0x15d   :  { %14 = sbr.rel (!%p12_p4) target bundleno = 1 (0x1), region = 84 }

// kernel: resnet_down_block.3
= control target key start
LH: loop header
LB: loop body
LE: loop exit
PB: predicated region body
PF: predicated region fallthrough
CT: control target
= control target key end

     0   :  { %s3013_s21 = smov 0   ;;  %s3500_s0 = inlined_call_operand.vmem [shape: bf16[2,36,9,128], index: 0, kind: input, shape index: {}]   ;;  %s3501_s1 = inlined_call_operand.vmem [shape: bf16[9,128,128], index: 1, kind: input, shape index: {}]   ;;  %s3502_s2 = inlined_call_operand.vmem [shape: bf16[128,128], index: 2, kind: input, shape index: {}]   ;;  %s3503_s3 = inlined_call_operand.vmem [shape: f32[2,64,128], index: 3, kind: output, shape index: {0}]   ;;  %s3504_s4 = inlined_call_operand.vmem [shape: f32[2,64,128], index: 4, kind: output, shape index: {1}]   ;;  %s3505_s5 = inlined_call_operand.vmem [shape: f32[2,2,128], index: 5, kind: output, shape index: {2}]   ;;  %s3506_s6 = inlined_call_operand.vmem [shape: f32[2,2,128], index: 6, kind: output, shape index: {3}]  }
   0x1 LB: > { %s2181_s22 = sadd.s32 4294967295, %s2976_s21   ;;  %p2185_p0 = scmp.ge.s32.totalorder %s2976_s21, 1  ;;  %s2976_s21 = sphi %s3013_s21, %s17_s21  }
   0x2   : > { %p219_p1 = scmp.lt.s32.totalorder %s2976_s21, 3 }
   0x4   : > { %p220_p2 = pnand %p2185_p0, %p219_p1 }
   0x5   : > { %p262_p3 = scmp.lt.s32.totalorder (!%p220_p2), %s2181_s22, 1 }
   0x6   : > { %223 = sbr.rel (%p220_p2) target bundleno = 351 (0x15f), region = 32 }
   0xb   : > { %v2860_v0 = vld [vmem:[%s3501_s1 + $0x78] sm:$0xff]  ;;  %v2859_v2 = vld [vmem:[%s3501_s1 + $0x70] sm:$0xff]  ;;  %v2858_v4 = vld [vmem:[%s3501_s1 + $0x68] sm:$0xff]  ;;  %s3510_s22 = smov (!%p262_p3, %s2181_s22), 1  ;;  %vm553_vm0 = vsmask.f32 3328 }
   0xc   : > { %v2848_v1 = vld [vmem:[%s3501_s1 + $0x38] sm:$0xff]  ;;  %2945 = vmatpush.bf16.msra.mxu2 %v2860_v0  ;;  %v2847_v3 = vld [vmem:[%s3501_s1 + $0x30] sm:$0xff]  ;;  %407 = vmatpush.bf16.msra.mxu0 %v2860_v0  ;;  %v2846_v5 = vld [vmem:[%s3501_s1 + $0x28] sm:$0xff]  ;;  %s2961_s25 = smul.u32 288, %s3510_s22  ;;  %vm554_vm1 = vsmask.f32 7440 }
   0xd   : > { %508 = vmatpush.bf16.msra.mxu1 %v2848_v1  ;;  %2953 = vmatpush.bf16.msra.mxu3 %v2848_v1  ;;  %v2857_v6 = vld [vmem:[%s3501_s1 + $0x60] sm:$0xff]  ;;  %v2856_v8 = vld [vmem:[%s3501_s1 + $0x58] sm:$0xff]  ;;  %v2855_v10 = vld [vmem:[%s3501_s1 + $0x50] sm:$0xff]  ;;  %s2191_s23 = sshll.u32 %s3510_s22, 1 }
   0xe   : > { %v2845_v7 = vld [vmem:[%s3501_s1 + $0x20] sm:$0xff]  ;;  %v2844_v9 = vld [vmem:[%s3501_s1 + $0x18] sm:$0xff]  ;;  %v2843_v11 = vld [vmem:[%s3501_s1 + $0x10] sm:$0xff]  ;;  %s3073_s8 = scalar_lea.vmem %s3500_s0, %s2961_s25  ;;  %s284_s26 = scalar_lea.vmem %s3506_s6, %s2191_s23 }
   0xf   : > { %v2854_v12 = vld [vmem:[%s3501_s1 + $0x48] sm:$0xff]  ;;  %v2853_v14 = vld [vmem:[%s3501_s1 + $0x40] sm:$0xff]  ;;  %v2851_v17 = vld [vmem:[%s3073_s8 + $0x6c] sm:$0xf0]  ;;  %s280_s28 = scalar_lea.vmem %s3505_s5, %s2191_s23 }
  0x10   : > { %2946 = vmatpush.bf16.msra.mxu2 %v2859_v2  ;;  %408 = vmatpush.bf16.msra.mxu0 %v2859_v2  ;;  %v2842_v13 = vld [vmem:[%s3501_s1 + $0x8] sm:$0xff]  ;;  %v2841_v15 = vld [vmem:[%s3501_s1] sm:$0xff]  ;;  %v2868_v22 = vld [vmem:[%s3501_s1 + $0xb8] sm:$0xff] }
  0x11   : > { %509 = vmatpush.bf16.msra.mxu1 %v2847_v3  ;;  %2954 = vmatpush.bf16.msra.mxu3 %v2847_v3  ;;  %v2227_v16 = vld [vmem:[%s3073_s8 + $0x68] sm:$0xf]  ;;  %v2267_v18 = vld [vmem:[%s3073_s8] sm:$0xf]  ;;  %v2880_v23 = vld [vmem:[%s3501_s1 + $0xf8] sm:$0xff] }
  0x12   : > { %v2837_v19 = vld [vmem:[%s3073_s8 + $0x4] sm:$0xf0]  ;;  %v2275_v20 = vld [vmem:[%s3073_s8 + $0x20] sm:$0xf]  ;;  %v2849_v25 = vld [vmem:[%s3073_s8 + $0x4c] sm:$0xf0]  ;;  %v2228_v26 = vor.u32 %v2851_v17, %v2227_v16 }
  0x13   : > { %v2839_v21 = vld [vmem:[%s3073_s8 + $0x24] sm:$0xf0]  ;;  %v2268_v27 = vor.u32 %v2837_v19, %v2267_v18  ;;  %v2900_v29 = vld [vmem:[%s3501_s1 + $0x178] sm:$0xff]  ;;  %v2867_v32 = vld [vmem:[%s3501_s1 + $0xb0] sm:$0xff] }
  0x14   : > { %2947 = vmatpush.bf16.msra.mxu2 %v2858_v4  ;;  %409 = vmatpush.bf16.msra.mxu0 %v2858_v4  ;;  %v2219_v24 = vld [vmem:[%s3073_s8 + $0x48] sm:$0xf]  ;;  %v2276_v28 = vor.u32 %v2839_v21, %v2275_v20  ;;  %v2892_v31 = vld [vmem:[%s3501_s1 + $0x138] sm:$0xff]  ;;  %v537_v33 = vld [vmem:[%s3073_s8] sm:$0xf] }
  0x15   : > { %510 = vmatpush.bf16.msra.mxu1 %v2846_v5  ;;  %2955 = vmatpush.bf16.msra.mxu3 %v2846_v5  ;;  %v2220_v30 = vor.u32 %v2849_v25, %v2219_v24  ;;  %v539_v34 = vld [vmem:[%s3073_s8 + $0x8] sm:$0xf]  ;;  %v2879_v35 = vld [vmem:[%s3501_s1 + $0xf0] sm:$0xff]  ;;  %v2507_v37 = vld [vmem:[%s3073_s8 + $0x98] sm:$0xf]  ;;  %v557_v39 = vshrl.u32 %v537_v33, 16 }
  0x16   : > { %v2505_v36 = vld [vmem:[%s3073_s8 + $0x90] sm:$0xf]  ;;  %v560_v40 = vshll.u32 %v537_v33, 16  ;;  %v571_v41 = vshrl.u32 %v539_v34, 16  ;;  %v574_v42 = vshll.u32 %v539_v34, 16  ;;  %v2866_v44 = vld [vmem:[%s3501_s1 + $0xa8] sm:$0xff]  ;;  %vm3169_vm2 = vmor %vm553_vm0, %vm554_vm1 }
  0x17   : > { %v2899_v38 = vld [vmem:[%s3501_s1 + $0x170] sm:$0xff]  ;;  %v1073_v45 = vshrl.u32 %v2505_v36, 16  ;;  %v1076_v46 = vshll.u32 %v2505_v36, 16  ;;  %v1087_v47 = vshrl.u32 %v2507_v37, 16  ;;  %v1090_v48 = vshll.u32 %v2507_v37, 16  ;;  %v2878_v49 = vld [vmem:[%s3501_s1 + $0xe8] sm:$0xff] }
  0x18   : > { %2948 = vmatpush.bf16.msra.mxu2 %v2857_v6  ;;  %410 = vmatpush.bf16.msra.mxu0 %v2857_v6  ;;  %v2891_v43 = vld [vmem:[%s3501_s1 + $0x130] sm:$0xff]  ;;  %v2898_v50 = vld [vmem:[%s3501_s1 + $0x168] sm:$0xff]  ;;  %v2865_v52 = vld [vmem:[%s3501_s1 + $0xa0] sm:$0xff]  ;;  %v559_v55 = vrot.slane %v557_v39, 4  ;;  %v562_v56 = vrot.slane %v560_v40, 5  ;;  %v573_v57 = vrot.slane %v571_v41, 4 }
  0x19   : > { %511 = vmatpush.bf16.msra.mxu1 %v2845_v7  ;;  %2956 = vmatpush.bf16.msra.mxu3 %v2845_v7  ;;  %v2890_v51 = vld [vmem:[%s3501_s1 + $0x128] sm:$0xff]  ;;  %v2877_v53 = vld [vmem:[%s3501_s1 + $0xe0] sm:$0xff]  ;;  %v576_v58 = vrot.slane %v574_v42, 5  ;;  %v2231_v60 = vld [vmem:[%s3073_s8 + $0x78] sm:$0xf]  ;;  %v1075_v63 = vrot.slane %v1073_v45, 4 }
  0x1a   : > { %v538_v54 = vld [vmem:[%s3073_s8 + $0x4] sm:$0x1]  ;;  %v2852_v61 = vld [vmem:[%s3073_s8 + $0x7c] sm:$0xf0]  ;;  %v540_v62 = vld [vmem:[%s3073_s8 + $0xc] sm:$0x1] }
  0x1b   : > { %v2897_v59 = vld [vmem:[%s3501_s1 + $0x160] sm:$0xff]  ;;  %v1078_v0 = vrot.slane %v1076_v46, 5  ;;  %v1089_v1 = vrot.slane %v1087_v47, 4  ;;  %v1092_v2 = vrot.slane %v1090_v48, 5  ;;  %v2271_v3 = vld [vmem:[%s3073_s8 + $0x10] sm:$0xf]  ;;  %v2232_v21 = vor.u32 %v2852_v61, %v2231_v60 }
  0x1c   : > { %2949 = vmatpush.bf16.msra.mxu2 %v2856_v8  ;;  %411 = vmatpush.bf16.msra.mxu0 %v2856_v8  ;;  %v2506_v4 = vld [vmem:[%s3073_s8 + $0x94] sm:$0x1]  ;;  %v2508_v5 = vld [vmem:[%s3073_s8 + $0x9c] sm:$0x1]  ;;  %v2838_v6 = vld [vmem:[%s3073_s8 + $0x14] sm:$0xf0] }
  0x1d   : > { %512 = vmatpush.bf16.msra.mxu1 %v2844_v9  ;;  %2957 = vmatpush.bf16.msra.mxu3 %v2844_v9  ;;  %v2279_v7 = vld [vmem:[%s3073_s8 + $0x30] sm:$0xf]  ;;  %v2840_v8 = vld [vmem:[%s3073_s8 + $0x34] sm:$0xf0]  ;;  %v1079_v17 = vor.u32 %v1078_v0, %v1075_v63  ;;  %v1082_v18 = vshll.u32 %v2506_v4, 16  ;;  %v1093_v19 = vor.u32 %v1092_v2, %v1089_v1  ;;  %v1096_v20 = vshll.u32 %v2508_v5, 16 }
  0x1e   : > { %v2223_v9 = vld [vmem:[%s3073_s8 + $0x58] sm:$0xf]  ;;  %v541_v39 = vld [vmem:[%s3073_s8 + $0x10] sm:$0xf]  ;;  %v2862_v46 = vld [vmem:[%s3501_s1 + $0x88] sm:$0xff] }
  0x1f   : > { %v2864_v16 = vld [vmem:[%s3501_s1 + $0x98] sm:$0xff]  ;;  %v1080_v34 = vrot.slane %v1079_v17, 4  ;;  %v1094_v36 = vrot.slane %v1093_v19, 4  ;;  %v1098_v37 = vrot.slane %v1096_v20, 5  ;;  %v2875_v41 = vld [vmem:[%s3501_s1 + $0xd0] sm:$0xff]  ;;  %v2886_v60 = vld [vmem:[%s3501_s1 + $0x108] sm:$0xff] }
  0x20   : > { %2950 = vmatpush.bf16.msra.mxu2 %v2855_v10  ;;  %412 = vmatpush.bf16.msra.mxu0 %v2855_v10  ;;  %v2850_v10 = vld [vmem:[%s3073_s8 + $0x5c] sm:$0xf0]  ;;  %v2896_v24 = vld [vmem:[%s3501_s1 + $0x158] sm:$0xff]  ;;  %v2887_v45 = vld [vmem:[%s3501_s1 + $0x110] sm:$0xff] }
  0x21   : > { %513 = vmatpush.bf16.msra.mxu1 %v2843_v11  ;;  %2958 = vmatpush.bf16.msra.mxu3 %v2843_v11  ;;  %v563_v11 = vor.u32 %v562_v56, %v559_v55  ;;  %v2224_v25 = vor.u32 %v2850_v10, %v2223_v9  ;;  %v543_v40 = vld [vmem:[%s3073_s8 + $0x18] sm:$0xf]  ;;  %v2894_v55 = vld [vmem:[%s3501_s1 + $0x148] sm:$0xff]  ;;  %v2861_v61 = vld [vmem:[%s3501_s1 + $0x80] sm:$0xff] }
  0x22   : > { %v2893_v63 = vld [vmem:[%s3501_s1 + $0x140] sm:$0xff]  ;;  %v2869_v2 = vld [vmem:[%s3073_s8 + $0x94] sm:$0xf0]  ;;  %v2512_v20 = vld [vmem:[%s3073_s8 + $0xac] sm:$0x1] }
  0x23   : > { %v2912_v5 = vld [vmem:[%s3501_s1 + $0x1b8] sm:$0xff] }
  0x24   : > { %2951 = vmatpush.bf16.msra.mxu2 %v2854_v12  ;;  %413 = vmatpush.bf16.msra.mxu0 %v2854_v12  ;;  %v566_v12 = vshll.u32 %v538_v54, 16  ;;  %v2874_v54 = vld [vmem:[%s3501_s1 + $0xc8] sm:$0xff]  ;;  %v2944_v19 = vld [vmem:[%s3502_s2 + $0x38] sm:$0xff] }
  0x25   : > { %514 = vmatpush.bf16.msra.mxu1 %v2842_v13  ;;  %2959 = vmatpush.bf16.msra.mxu3 %v2842_v13  ;;  %v577_v13 = vor.u32 %v576_v58, %v573_v57 }
  0x28   : > { %2952 = vmatpush.bf16.msra.mxu2 %v2853_v14  ;;  %414 = vmatpush.bf16.msra.mxu0 %v2853_v14  ;;  %v580_v14 = vshll.u32 %v540_v62, 16  ;;  %v3210_v62 = vld [vmem:[%s3073_s8 + $0x90] sm:$0xf] }
  0x29   : > { %515 = vmatpush.bf16.msra.mxu1 %v2841_v15  ;;  %2960 = vmatpush.bf16.msra.mxu3 %v2841_v15  ;;  %v2889_v15 = vld [vmem:[%s3501_s1 + $0x120] sm:$0xff] }
  0x2b   : > { %425 = vmatmul.bf16.vlgmr.msra.gmra.mxu2 %v2228_v26  ;;  %415 = vmatmul.bf16.vlgmr.msra.gmra.mxu0 %v2220_v30  ;;  %v2876_v26 = vld [vmem:[%s3501_s1 + $0xd8] sm:$0xff]  ;;  %v582_v30 = vrot.slane %v580_v14, 5 }
  0x2c   : > { %749 = vmatpush.bf16.msrb.mxu2 %v2868_v22  ;;  %516 = vmatmul.bf16.vlgmr.msra.gmra.mxu1 %v2268_v27  ;;  %v2272_v22 = vor.u32 %v2838_v6, %v2271_v3  ;;  %v564_v27 = vrot.slane %v563_v11, 4  ;;  %v542_v6 = vld [vmem:[%s3073_s8 + $0x14] sm:$0x1] }
  0x2d   : > { %884 = vmatpush.bf16.msrb.mxu3 %v2880_v23  ;;  %1265 = vmatpush.bf16.msrb.mxu1 %v2900_v29  ;;  %v2280_v23 = vor.u32 %v2840_v8, %v2279_v7  ;;  %v578_v29 = vrot.slane %v577_v13, 4  ;;  %v2873_v7 = vld [vmem:[%s3501_s1 + $0xc0] sm:$0xff]  ;;  %v544_v8 = vld [vmem:[%s3073_s8 + $0x1c] sm:$0x1] }
  0x2e   : > { %526 = vmatmul.bf16.vlgmr.msra.gmra.mxu3 %v2276_v28  ;;  %1019 = vmatpush.bf16.msrb.mxu0 %v2892_v31  ;;  %v568_v28 = vrot.slane %v566_v12, 5  ;;  %v2888_v31 = vld [vmem:[%s3501_s1 + $0x118] sm:$0xff]  ;;  %v2510_v13 = vld [vmem:[%s3073_s8 + $0xa4] sm:$0x1] }
  0x2f   : > { %v583_v47 = vsel %vm3169_vm2, %v578_v29, %v582_v30  ;;  %v1110_v30 = vshll.u32 %v2510_v13, 16 }
  0x30   : > { %750 = vmatpush.bf16.msrb.mxu2 %v2867_v32  ;;  %v2863_v32 = vld [vmem:[%s3501_s1 + $0x90] sm:$0xff]  ;;  %v569_v42 = vsel %vm3169_vm2, %v564_v27, %v568_v28  ;;  %v686_v1 = vunpack.c.l.b16 %v583_v47 }
  0x31   : > { %885 = vmatpush.bf16.msrb.mxu3 %v2879_v35  ;;  %1266 = vmatpush.bf16.msrb.mxu1 %v2899_v38  ;;  %v1084_v35 = vrot.slane %v1082_v18, 5  ;;  %v2895_v38 = vld [vmem:[%s3501_s1 + $0x150] sm:$0xff]  ;;  %v685_v0 = vunpack.c.l.b16 %v569_v42  ;;  %v2459_v18 = vld [vmem:[%s3073_s8 + $0xd8] sm:$0xf] }
  0x32   : > { %1020 = vmatpush.bf16.msrb.mxu0 %v2891_v43  ;;  %v2509_v43 = vld [vmem:[%s3073_s8 + $0xa0] sm:$0xf]  ;;  %v2513_v47 = vld [vmem:[%s3073_s8 + $0xb0] sm:$0xf] }
  0x33   : > { %v1085_v48 = vsel %vm3169_vm2, %v1080_v34, %v1084_v35  ;;  %v1101_v56 = vshrl.u32 %v2509_v43, 16  ;;  %v1104_v57 = vshll.u32 %v2509_v43, 16  ;;  %v693_v27 = vpack.c.b16 %v686_v1, %v685_v0  ;;  %v545_v43 = vld [vmem:[%s3073_s8 + $0x20] sm:$0xf] }
  0x34   : > { %751 = vmatpush.bf16.msrb.mxu2 %v2866_v44  ;;  %v2511_v44 = vld [vmem:[%s3073_s8 + $0xa8] sm:$0xf]  ;;  %v1201_v3 = vunpack.c.l.b16 %v1085_v48  ;;  %v2515_v48 = vld [vmem:[%s3073_s8 + $0xb8] sm:$0xf]  ;;  %v2909_v1 = vld [vmem:[%s3501_s1 + $0x1a0] sm:$0xff] }
  0x35   : > { %886 = vmatpush.bf16.msrb.mxu3 %v2878_v49  ;;  %1267 = vmatpush.bf16.msrb.mxu1 %v2898_v50  ;;  %v1099_v49 = vsel %vm3169_vm2, %v1094_v36, %v1098_v37  ;;  %v585_v50 = vshrl.u32 %v541_v39, 16  ;;  %v1115_v58 = vshrl.u32 %v2511_v44, 16  ;;  %v1103_v14 = vrot.slane %v1101_v56, 4 }
  0x36   : > { %1021 = vmatpush.bf16.msrb.mxu0 %v2890_v51  ;;  %v588_v51 = vshll.u32 %v541_v39, 16  ;;  %v1202_v4 = vunpack.c.l.b16 %v1099_v49  ;;  %v1124_v36 = vshll.u32 %v2512_v20, 16  ;;  %v2932_v39 = vld [vmem:[%s3501_s1 + $0x238] sm:$0xff]  ;;  %v616_v56 = vshll.u32 %v545_v43, 16 }
  0x37   : > { %v587_v9 = vrot.slane %v585_v50, 4  ;;  %v1146_v0 = vshll.u32 %v2515_v48, 16 }
  0x38   : > { %752 = vmatpush.bf16.msrb.mxu2 %v2865_v52  ;;  %v599_v52 = vshrl.u32 %v543_v40, 16  ;;  %v590_v10 = vrot.slane %v588_v51, 5  ;;  %v1209_v28 = vpack.c.b16 %v1202_v4, %v1201_v3 }
  0x39   : > { %887 = vmatpush.bf16.msrb.mxu3 %v2877_v53  ;;  %1268 = vmatpush.bf16.msrb.mxu1 %v2897_v59  ;;  %v602_v53 = vshll.u32 %v543_v40, 16  ;;  %v1118_v59 = vshll.u32 %v2511_v44, 16  ;;  %v2943_v40 = vld [vmem:[%s3502_s2 + $0x30] sm:$0xff]  ;;  %v547_v44 = vld [vmem:[%s3073_s8 + $0x28] sm:$0xf] }
  0x3a   : > { %1022 = vmatpush.bf16.msrb.mxu0 %v2889_v15  ;;  %v601_v11 = vrot.slane %v599_v52, 4  ;;  %v1106_v15 = vrot.slane %v1104_v57, 5  ;;  %v591_v29 = vor.u32 %v590_v10, %v587_v9  ;;  %v1126_v52 = vrot.slane %v1124_v36, 5  ;;  %v2930_v9 = vld [vmem:[%s3501_s1 + $0x228] sm:$0xff] }
  0x3b   : > { %430 = vmatmul.bf16.gmra.mxu2 %v2232_v21  ;;  %420 = vmatmul.bf16.gmra.mxu0 %v2224_v25  ;;  %v604_v12 = vrot.slane %v602_v53, 5  ;;  %v1120_v17 = vrot.slane %v1118_v59, 5  ;;  %v2885_v21 = vld [vmem:[%s3501_s1 + $0x100] sm:$0xff]  ;;  %v594_v25 = vshll.u32 %v542_v6, 16  ;;  %v2910_v53 = vld [vmem:[%s3501_s1 + $0x1a8] sm:$0xff]  ;;  %v627_v57 = vshrl.u32 %v547_v44, 16 }
  0x3c   : > { %753 = vmatpush.bf16.msrb.mxu2 %v2864_v16  ;;  %521 = vmatmul.bf16.gmra.mxu1 %v2272_v22  ;;  %v1117_v16 = vrot.slane %v1115_v58, 4  ;;  %v2388_v22 = vor.u32 %v2869_v2, %v3210_v62  ;;  %v1107_v34 = vor.u32 %v1106_v15, %v1103_v14  ;;  %v630_v58 = vshll.u32 %v547_v44, 16  ;;  %v2922_v59 = vld [vmem:[%s3501_s1 + $0x1e8] sm:$0xff]  ;;  %v2921_v6 = vld [vmem:[%s3501_s1 + $0x1e0] sm:$0xff]  ;;  %v2514_v15 = vld [vmem:[%s3073_s8 + $0xb4] sm:$0x1] }
  0x3d   : > { %1269 = vmatpush.bf16.msrb.mxu1 %v2896_v24  ;;  %888 = vmatpush.bf16.msrb.mxu3 %v2876_v26  ;;  %v2924_v24 = vld [vmem:[%s3501_s1 + $0x1f8] sm:$0xff]  ;;  %v608_v26 = vshll.u32 %v544_v8, 16  ;;  %v1132_v62 = vshll.u32 %v2513_v47, 16  ;;  %v548_v8 = vld [vmem:[%s3073_s8 + $0x2c] sm:$0x1]  ;;  %v2941_v14 = vld [vmem:[%s3502_s2 + $0x20] sm:$0xff] }
  0x3e   : > { %531 = vmatmul.bf16.gmra.mxu3 %v2280_v23  ;;  %1023 = vmatpush.bf16.msrb.mxu0 %v2888_v31  ;;  %v2881_v23 = vld [vmem:[%s3073_s8 + $0xdc] sm:$0xf0]  ;;  %v2911_v31 = vld [vmem:[%s3501_s1 + $0x1b0] sm:$0xff]  ;;  %v1121_v35 = vor.u32 %v1120_v17, %v1117_v16  ;;  %v1108_v50 = vrot.slane %v1107_v34, 4  ;;  %v632_v13 = vrot.slane %v630_v58, 5  ;;  %v1138_v34 = vshll.u32 %v2514_v15, 16 }
  0x3f   : > { %v2460_v37 = vor.u32 %v2881_v23, %v2459_v18  ;;  %v610_v42 = vrot.slane %v608_v26, 5  ;;  %v1134_v17 = vrot.slane %v1132_v62, 5  ;;  %v2870_v26 = vld [vmem:[%s3073_s8 + $0xa4] sm:$0xf0]  ;;  %v551_v58 = vld [vmem:[%s3073_s8 + $0x38] sm:$0xf] }
  0x40   : > { %754 = vmatpush.bf16.msrb.mxu2 %v2863_v32  ;;  %v605_v32 = vor.u32 %v604_v12, %v601_v11  ;;  %v1122_v51 = vrot.slane %v1121_v35, 4  ;;  %v618_v11 = vrot.slane %v616_v56, 5  ;;  %v629_v12 = vrot.slane %v627_v57, 4  ;;  %v2940_v35 = vld [vmem:[%s3502_s2 + $0x18] sm:$0xff]  ;;  %v549_v57 = vld [vmem:[%s3073_s8 + $0x30] sm:$0xf] }
  0x41   : > { %1270 = vmatpush.bf16.msrb.mxu1 %v2895_v38  ;;  %889 = vmatpush.bf16.msrb.mxu3 %v2875_v41  ;;  %v2923_v38 = vld [vmem:[%s3501_s1 + $0x1f0] sm:$0xff]  ;;  %v596_v41 = vrot.slane %v594_v25, 5  ;;  %v2516_v25 = vld [vmem:[%s3073_s8 + $0xbc] sm:$0x1]  ;;  %v2519_v62 = vld [vmem:[%s3073_s8 + $0xc8] sm:$0xf] }
  0x42   : > { %1024 = vmatpush.bf16.msrb.mxu0 %v2887_v45  ;;  %v592_v45 = vrot.slane %v591_v29, 4  ;;  %v606_v49 = vrot.slane %v605_v32, 4  ;;  %v2882_v29 = vld [vmem:[%s3073_s8 + $0xec] sm:$0xf0]  ;;  %v636_v32 = vshll.u32 %v548_v8, 16  ;;  %v633_v36 = vor.u32 %v632_v13, %v629_v12  ;;  %v2928_v56 = vld [vmem:[%s3501_s1 + $0x218] sm:$0xff] }
  0x43   : > { %v658_v8 = vshll.u32 %v551_v58, 16  ;;  %v1171_v12 = vshrl.u32 %v2519_v62, 16  ;;  %v1174_v13 = vshll.u32 %v2519_v62, 16  ;;  %v2395_v15 = vld [vmem:[%s3073_s8 + $0xb0] sm:$0xf] }
  0x44   : > { %755 = vmatpush.bf16.msrb.mxu2 %v2862_v46  ;;  %v1112_v46 = vrot.slane %v1110_v30, 5  ;;  %v597_v2 = vsel %vm3169_vm2, %v592_v45, %v596_v41  ;;  %v611_v3 = vsel %vm3169_vm2, %v606_v49, %v610_v42  ;;  %v2929_v41 = vld [vmem:[%s3501_s1 + $0x220] sm:$0xff]  ;;  %v638_v49 = vrot.slane %v636_v32, 5 }
  0x45   : > { %1271 = vmatpush.bf16.msrb.mxu1 %v2894_v55  ;;  %890 = vmatpush.bf16.msrb.mxu3 %v2874_v54  ;;  %v2942_v54 = vld [vmem:[%s3502_s2 + $0x28] sm:$0xff]  ;;  %v613_v55 = vshrl.u32 %v545_v43, 16  ;;  %v687_v20 = vunpack.c.l.b16 %v597_v2 }
  0x46   : > { %1025 = vmatpush.bf16.msrb.mxu0 %v2886_v60  ;;  %v2931_v60 = vld [vmem:[%s3501_s1 + $0x230] sm:$0xff]  ;;  %v1113_v4 = vsel %vm3169_vm2, %v1108_v50, %v1112_v46  ;;  %v1140_v50 = vrot.slane %v1138_v34, 5  ;;  %v1173_v34 = vrot.slane %v1171_v12, 4  ;;  %v2471_v12 = vld [vmem:[%s3073_s8 + $0x108] sm:$0xf] }
  0x47   : > { %v615_v10 = vrot.slane %v613_v55, 4  ;;  %v1203_v23 = vunpack.c.l.b16 %v1113_v4  ;;  %v2907_v46 = vld [vmem:[%s3501_s1 + $0x190] sm:$0xff] }
  0x48   : > { %756 = vmatpush.bf16.msrb.mxu2 %v2861_v61  ;;  %v1129_v61 = vshrl.u32 %v2513_v47, 16  ;;  %v2919_v55 = vld [vmem:[%s3501_s1 + $0x1d0] sm:$0xff] }
  0x49   : > { %1272 = vmatpush.bf16.msrb.mxu1 %v2893_v63  ;;  %891 = vmatpush.bf16.msrb.mxu3 %v2873_v7  ;;  %v1143_v63 = vshrl.u32 %v2515_v48, 16  ;;  %v546_v7 = vld [vmem:[%s3073_s8 + $0x24] sm:$0x1]  ;;  %v619_v30 = vor.u32 %v618_v11, %v615_v10  ;;  %v2927_v4 = vld [vmem:[%s3501_s1 + $0x210] sm:$0xff] }
  0x4a   : > { %1026 = vmatpush.bf16.msrb.mxu0 %v2885_v21  ;;  %v1131_v16 = vrot.slane %v1129_v61, 4  ;;  %v688_v21 = vunpack.c.l.b16 %v611_v3  ;;  %v2517_v61 = vld [vmem:[%s3073_s8 + $0xc0] sm:$0xf]  ;;  %v2918_v3 = vld [vmem:[%s3501_s1 + $0x1c8] sm:$0xff] }
  0x4b   : > { %757 = vmatmul.bf16.vlgmr.msrb.gmra.mxu2 %v693_v27  ;;  %v1145_v18 = vrot.slane %v1143_v63, 4  ;;  %v2463_v27 = vld [vmem:[%s3073_s8 + $0xe8] sm:$0xf]  ;;  %v620_v47 = vrot.slane %v619_v30, 4  ;;  %v2939_v63 = vld [vmem:[%s3502_s2 + $0x10] sm:$0xff]  ;;  %v1157_v10 = vshrl.u32 %v2517_v61, 16 }
  0x4c   : > { %1400 = vmatpush.bf16.msra.mxu2 %v2912_v5  ;;  %1273 = vmatmul.bf16.vlgmr.msrb.gmra.mxu1 %v1209_v28  ;;  %v1127_v5 = vsel %vm3169_vm2, %v1122_v51, %v1126_v52  ;;  %v2908_v28 = vld [vmem:[%s3501_s1 + $0x198] sm:$0xff]  ;;  %v694_v42 = vpack.c.b16 %v688_v21, %v687_v20  ;;  %v2464_v45 = vor.u32 %v2882_v29, %v2463_v27  ;;  %v634_v51 = vrot.slane %v633_v36, 4  ;;  %v550_v21 = vld [vmem:[%s3073_s8 + $0x34] sm:$0x1]  ;;  %v2937_v29 = vld [vmem:[%s3502_s2] sm:$0xff] }
  0x4d   : > { %1958 = vmatpush.bf16.msra.mxu1 %v2944_v19  ;;  %1535 = vmatpush.bf16.msra.mxu3 %v2924_v24  ;;  %v1148_v19 = vrot.slane %v1146_v0, 5  ;;  %v1204_v24 = vunpack.c.l.b16 %v1127_v5  ;;  %v641_v5 = vshrl.u32 %v549_v57, 16  ;;  %v1160_v11 = vshll.u32 %v2517_v61, 16  ;;  %v2518_v30 = vld [vmem:[%s3073_s8 + $0xc4] sm:$0x1] }
  0x4e   : > { %892 = vmatmul.bf16.vlgmr.msrb.gmra.mxu3 %v2388_v22  ;;  %1027 = vmatmul.bf16.vlgmr.msrb.gmra.mxu0 %v2460_v37  ;;  %v2391_v22 = vld [vmem:[%s3073_s8 + $0xa0] sm:$0xf]  ;;  %v1135_v37 = vor.u32 %v1134_v17, %v1131_v16  ;;  %v639_v0 = vsel %vm3169_vm2, %v634_v51, %v638_v49  ;;  %v2871_v16 = vld [vmem:[%s3073_s8 + $0xb4] sm:$0xf0]  ;;  %v2520_v36 = vld [vmem:[%s3073_s8 + $0xcc] sm:$0x1] }
  0x4f   : > { %1781 = vmatpush.bf16.msra.mxu0 %v2932_v39  ;;  %v1152_v39 = vshll.u32 %v2516_v25, 16  ;;  %v1210_v43 = vpack.c.b16 %v1204_v24, %v1203_v23  ;;  %v2392_v44 = vor.u32 %v2870_v26, %v2391_v22  ;;  %v552_v22 = vld [vmem:[%s3073_s8 + $0x3c] sm:$0x1]  ;;  %v2917_v23 = vld [vmem:[%s3501_s1 + $0x1c0] sm:$0xff]  ;;  %v2926_v24 = vld [vmem:[%s3501_s1 + $0x208] sm:$0xff]  ;;  %v643_v25 = vrot.slane %v641_v5, 4 }
  0x50   : > { %1401 = vmatpush.bf16.msra.mxu2 %v2911_v31  ;;  %v622_v31 = vshll.u32 %v546_v7, 16  ;;  %v1136_v52 = vrot.slane %v1135_v37, 4  ;;  %v655_v7 = vshrl.u32 %v551_v58, 16  ;;  %v1162_v32 = vrot.slane %v1160_v11, 5  ;;  %v2715_v61 = vld [vmem:[%s3073_s8 + $0x10] sm:$0xf] }
  0x51   : > { %1959 = vmatpush.bf16.msra.mxu1 %v2943_v40  ;;  %1536 = vmatpush.bf16.msra.mxu3 %v2923_v38  ;;  %v1149_v38 = vor.u32 %v1148_v19, %v1145_v18  ;;  %v2920_v40 = vld [vmem:[%s3501_s1 + $0x1d8] sm:$0xff]  ;;  %v690_v18 = vunpack.c.l.b16 %v639_v0  ;;  %v1606_v5 = vshll.u32 %v2715_v61, 16  ;;  %v2872_v11 = vld [vmem:[%s3073_s8 + $0xc4] sm:$0xf0] }
  0x52   : > { %v624_v48 = vrot.slane %v622_v31, 5  ;;  %v657_v27 = vrot.slane %v655_v7, 4  ;;  %v1159_v31 = vrot.slane %v1157_v10, 4  ;;  %v2399_v10 = vld [vmem:[%s3073_s8 + $0xc0] sm:$0xf] }
  0x53   : > { %1782 = vmatpush.bf16.msra.mxu0 %v2931_v60 }
  0x54   : > { %1402 = vmatpush.bf16.msra.mxu2 %v2910_v53  ;;  %v1150_v53 = vrot.slane %v1149_v38, 4  ;;  %v625_v60 = vsel %vm3169_vm2, %v620_v47, %v624_v48  ;;  %v2396_v38 = vor.u32 %v2871_v16, %v2395_v15  ;;  %v1163_v48 = vor.u32 %v1162_v32, %v1159_v31 }
  0x55   : > { %1960 = vmatpush.bf16.msra.mxu1 %v2942_v54  ;;  %1537 = vmatpush.bf16.msra.mxu3 %v2922_v59  ;;  %v1154_v54 = vrot.slane %v1152_v39, 5  ;;  %v2906_v59 = vld [vmem:[%s3501_s1 + $0x188] sm:$0xff]  ;;  %v689_v17 = vunpack.c.l.b16 %v625_v60 }
  0x56   : > { %v2713_v60 = vld [vmem:[%s3073_s8 + $0x8] sm:$0xf] }
  0x57   : > { %1783 = vmatpush.bf16.msra.mxu0 %v2930_v9  ;;  %v1155_v2 = vsel %vm3169_vm2, %v1150_v53, %v1154_v54  ;;  %v2938_v9 = vld [vmem:[%s3502_s2 + $0x8] sm:$0xff]  ;;  %v695_v37 = vpack.c.b16 %v690_v18, %v689_v17  ;;  %v1608_v17 = vrot.slane %v1606_v5, 5 }
  0x58   : > { %1403 = vmatpush.bf16.msra.mxu2 %v2909_v1  ;;  %v1141_v1 = vsel %vm3169_vm2, %v1136_v52, %v1140_v50  ;;  %v1206_v20 = vunpack.c.l.b16 %v1155_v2  ;;  %v1180_v50 = vshll.u32 %v2520_v36, 16  ;;  %v1589_v2 = vshrl.u32 %v2713_v60, 16 }
  0x59   : > { %1961 = vmatpush.bf16.msra.mxu1 %v2941_v14  ;;  %1538 = vmatpush.bf16.msra.mxu3 %v2921_v6  ;;  %v644_v6 = vshll.u32 %v549_v57, 16  ;;  %v2905_v14 = vld [vmem:[%s3501_s1 + $0x180] sm:$0xff]  ;;  %v1205_v19 = vunpack.c.l.b16 %v1141_v1  ;;  %v1164_v57 = vrot.slane %v1163_v48, 4 }
  0x5b   : > { %1784 = vmatpush.bf16.msra.mxu0 %v2929_v41  ;;  %762 = vmatmul.bf16.gmra.mxu2 %v694_v42  ;;  %v646_v26 = vrot.slane %v644_v6, 5  ;;  %v1211_v39 = vpack.c.b16 %v1206_v20, %v1205_v19  ;;  %v2883_v41 = vld [vmem:[%s3073_s8 + $0xfc] sm:$0xf0]  ;;  %v2714_v20 = vld [vmem:[%s3073_s8 + $0xc] sm:$0x1] }
  0x5c   : > { %1404 = vmatpush.bf16.msra.mxu2 %v2908_v28  ;;  %1278 = vmatmul.bf16.gmra.mxu1 %v1210_v43  ;;  %v660_v28 = vrot.slane %v658_v8, 5  ;;  %v2925_v42 = vld [vmem:[%s3501_s1 + $0x200] sm:$0xff] }
  0x5d   : > { %1962 = vmatpush.bf16.msra.mxu1 %v2940_v35  ;;  %1539 = vmatpush.bf16.msra.mxu3 %v2920_v40  ;;  %v1176_v35 = vrot.slane %v1174_v13, 5  ;;  %v2467_v40 = vld [vmem:[%s3073_s8 + $0xf8] sm:$0xf]  ;;  %v647_v43 = vor.u32 %v646_v26, %v643_v25  ;;  %v2884_v13 = vld [vmem:[%s3073_s8 + $0x10c] sm:$0xf0]  ;;  %v1598_v25 = vshll.u32 %v2714_v20, 16 }
  0x5e   : > { %897 = vmatmul.bf16.gmra.mxu3 %v2392_v44  ;;  %1032 = vmatmul.bf16.gmra.mxu0 %v2464_v45  ;;  %v650_v44 = vshll.u32 %v550_v21, 16  ;;  %v664_v45 = vshll.u32 %v552_v22, 16  ;;  %v661_v47 = vor.u32 %v660_v28, %v657_v27  ;;  %v2468_v51 = vor.u32 %v2883_v41, %v2467_v40  ;;  %v2716_v21 = vld [vmem:[%s3073_s8 + $0x14] sm:$0x1]  ;;  %v2717_v28 = vld [vmem:[%s3073_s8 + $0x18] sm:$0xf] }
  0x5f   : > { %1785 = vmatpush.bf16.msra.mxu0 %v2928_v56  ;;  %v1177_v49 = vor.u32 %v1176_v35, %v1173_v34  ;;  %v648_v52 = vrot.slane %v647_v43, 4  ;;  %v2400_v22 = vor.u32 %v2872_v11, %v2399_v10  ;;  %v1612_v27 = vshll.u32 %v2716_v21, 16  ;;  %v2901_v40 = vld [vmem:[%s3073_s8 + $0xc] sm:$0xf0]  ;;  %v2599_v11 = vld [vmem:[%s3073_s8 + $0x18] sm:$0xf] }
  0x60   : > { %1405 = vmatpush.bf16.msra.mxu2 %v2907_v46  ;;  %v1166_v46 = vshll.u32 %v2518_v30, 16  ;;  %v652_v53 = vrot.slane %v650_v44, 5  ;;  %v666_v54 = vrot.slane %v664_v45, 5  ;;  %v662_v56 = vrot.slane %v661_v47, 4  ;;  %v2667_v43 = vld [vmem:[%s3073_s8 + $0x50] sm:$0xf] }
  0x61   : > { %1540 = vmatpush.bf16.msra.mxu3 %v2919_v55  ;;  %1963 = vmatpush.bf16.msra.mxu1 %v2939_v63  ;;  %v1178_v58 = vrot.slane %v1177_v49, 4  ;;  %v1600_v31 = vrot.slane %v1598_v25, 5  ;;  %v1614_v34 = vrot.slane %v1612_v27, 5  ;;  %v1617_v35 = vshrl.u32 %v2717_v28, 16  ;;  %v2913_v44 = vld [vmem:[%s3073_s8 + $0x54] sm:$0xf0] }
  0x62   : > { %v1168_v55 = vrot.slane %v1166_v46, 5  ;;  %v653_v62 = vsel %vm3169_vm2, %v648_v52, %v652_v53  ;;  %v667_v63 = vsel %vm3169_vm2, %v662_v56, %v666_v54  ;;  %v1620_v36 = vshll.u32 %v2717_v28, 16  ;;  %v2787_v45 = vld [vmem:[%s3073_s8 + $0xd8] sm:$0xf]  ;;  %v2933_v46 = vld [vmem:[%s3073_s8 + $0xdc] sm:$0xf0] }
  0x63   : > { %1786 = vmatpush.bf16.msra.mxu0 %v2927_v4  ;;  %v1603_v4 = vshrl.u32 %v2715_v61, 16  ;;  %v691_v6 = vunpack.c.l.b16 %v653_v62  ;;  %v692_v7 = vunpack.c.l.b16 %v667_v63  ;;  %v1619_v47 = vrot.slane %v1617_v35, 4  ;;  %v2718_v53 = vld [vmem:[%s3073_s8 + $0x1c] sm:$0x1]  ;;  %v2720_v54 = vld [vmem:[%s3073_s8 + $0x24] sm:$0x1] }
  0x64   : > { %1406 = vmatpush.bf16.msra.mxu2 %v2906_v59  ;;  %v1182_v59 = vrot.slane %v1180_v50, 5  ;;  %v1169_v0 = vsel %vm3169_vm2, %v1164_v57, %v1168_v55  ;;  %v1622_v48 = vrot.slane %v1620_v36, 5  ;;  %v2668_v56 = vor.u32 %v2913_v44, %v2667_v43 }
  0x65   : > { %1541 = vmatpush.bf16.msra.mxu3 %v2918_v3  ;;  %1964 = vmatpush.bf16.msra.mxu1 %v2938_v9  ;;  %v1592_v3 = vshll.u32 %v2713_v60, 16  ;;  %v1207_v8 = vunpack.c.l.b16 %v1169_v0  ;;  %v1605_v16 = vrot.slane %v1603_v4, 4  ;;  %v696_v18 = vpack.c.b16 %v692_v7, %v691_v6  ;;  %v2723_v4 = vld [vmem:[%s3073_s8 + $0x30] sm:$0xf] }
  0x66   : > { %v1183_v1 = vsel %vm3169_vm2, %v1178_v58, %v1182_v59  ;;  %v2788_v57 = vor.u32 %v2933_v46, %v2787_v45  ;;  %v1623_v58 = vor.u32 %v1622_v48, %v1619_v47  ;;  %v1626_v59 = vshll.u32 %v2718_v53, 16  ;;  %v2603_v46 = vld [vmem:[%s3073_s8 + $0x28] sm:$0xf]  ;;  %v2903_v47 = vld [vmem:[%s3073_s8 + $0x2c] sm:$0xf0] }
  0x67   : > { %1787 = vmatpush.bf16.msra.mxu0 %v2926_v24  ;;  %v1208_v9 = vunpack.c.l.b16 %v1183_v1  ;;  %v1594_v15 = vrot.slane %v1592_v3, 5  ;;  %v1609_v26 = vor.u32 %v1608_v17, %v1605_v16  ;;  %v1640_v61 = vshll.u32 %v2720_v54, 16  ;;  %v2721_v3 = vld [vmem:[%s3073_s8 + $0x28] sm:$0xf]  ;;  %v2795_v48 = vld [vmem:[%s3073_s8 + $0xf8] sm:$0xf] }
  0x68   : > { %1407 = vmatpush.bf16.msra.mxu2 %v2905_v14  ;;  %v1591_v14 = vrot.slane %v1589_v2, 4  ;;  %v1624_v63 = vrot.slane %v1623_v58, 4  ;;  %v1628_v0 = vrot.slane %v1626_v59, 5  ;;  %v1645_v7 = vshrl.u32 %v2721_v3, 16 }
  0x69   : > { %1542 = vmatpush.bf16.msra.mxu3 %v2917_v23  ;;  %1965 = vmatpush.bf16.msra.mxu1 %v2937_v29  ;;  %v1212_v19 = vpack.c.b16 %v1208_v9, %v1207_v8  ;;  %v2472_v23 = vor.u32 %v2884_v13, %v2471_v12  ;;  %v2719_v29 = vld [vmem:[%s3073_s8 + $0x20] sm:$0xf]  ;;  %v1610_v32 = vrot.slane %v1609_v26, 4  ;;  %v1642_v2 = vrot.slane %v1640_v61, 5  ;;  %v2728_v61 = vld [vmem:[%s3073_s8 + $0x44] sm:$0x1] }
  0x6a   : > { %v1595_v24 = vor.u32 %v1594_v15, %v1591_v14  ;;  %v1629_v5 = vsel %vm3169_vm2, %v1624_v63, %v1628_v0  ;;  %v1648_v8 = vshll.u32 %v2721_v3, 16  ;;  %v1659_v9 = vshrl.u32 %v2723_v4, 16  ;;  %v2902_v12 = vld [vmem:[%s3073_s8 + $0x1c] sm:$0xf0]  ;;  %v2791_v14 = vld [vmem:[%s3073_s8 + $0xe8] sm:$0xf] }
  0x6b   : > { %1788 = vmatpush.bf16.msra.mxu0 %v2925_v42  ;;  %767 = vmatmul.bf16.gmra.mxu2 %v695_v37  ;;  %v1631_v37 = vshrl.u32 %v2719_v29, 16  ;;  %v1615_v42 = vsel %vm3169_vm2, %v1610_v32, %v1614_v34  ;;  %v1662_v10 = vshll.u32 %v2723_v4, 16  ;;  %v2671_v13 = vld [vmem:[%s3073_s8 + $0x60] sm:$0xf]  ;;  %v2934_v15 = vld [vmem:[%s3073_s8 + $0xec] sm:$0xf0]  ;;  %v1719_v16 = vunpack.c.l.b16 %v1629_v5 }
  0x6c   : > { %1283 = vmatmul.bf16.gmra.mxu1 %v1211_v39  ;;  %v1596_v30 = vrot.slane %v1595_v24, 4  ;;  %v2595_v39 = vld [vmem:[%s3073_s8 + $0x8] sm:$0xf]  ;;  %v1718_v52 = vunpack.c.l.b16 %v1615_v42  ;;  %v1650_v20 = vrot.slane %v1648_v8, 5  ;;  %v1661_v21 = vrot.slane %v1659_v9, 4 }
  0x6d   : > { %v1633_v49 = vrot.slane %v1631_v37, 4  ;;  %v2596_v55 = vor.u32 %v2901_v40, %v2595_v39  ;;  %v2724_v24 = vld [vmem:[%s3073_s8 + $0x34] sm:$0x1]  ;;  %v2600_v25 = vor.u32 %v2902_v12, %v2599_v11  ;;  %v2792_v26 = vor.u32 %v2934_v15, %v2791_v14  ;;  %v2727_v39 = vld [vmem:[%s3073_s8 + $0x40] sm:$0xf] }
  0x6e   : > { %902 = vmatmul.bf16.gmra.mxu3 %v2396_v38  ;;  %1037 = vmatmul.bf16.gmra.mxu0 %v2468_v51  ;;  %v1634_v38 = vshll.u32 %v2719_v29, 16  ;;  %v1601_v41 = vsel %vm3169_vm2, %v1596_v30, %v1600_v31  ;;  %v1668_v32 = vshll.u32 %v2724_v24, 16  ;;  %v1687_v44 = vshrl.u32 %v2727_v39, 16  ;;  %v2916_v24 = vld [vmem:[%s3073_s8 + $0x84] sm:$0xf0] }
  0x6f   : > { %v1717_v51 = vunpack.c.l.b16 %v1601_v41  ;;  %v1690_v45 = vshll.u32 %v2727_v39, 16  ;;  %v2604_v58 = vor.u32 %v2903_v47, %v2603_v46  ;;  %v1696_v5 = vshll.u32 %v2728_v61, 16 }
  0x70   : > { %v1636_v50 = vrot.slane %v1634_v38, 5  ;;  %v1670_v37 = vrot.slane %v1668_v32, 5  ;;  %v2725_v38 = vld [vmem:[%s3073_s8 + $0x38] sm:$0xf] }
  0x71   : > { %v1725_v62 = vpack.c.b16 %v1718_v52, %v1717_v51  ;;  %v1673_v42 = vshrl.u32 %v2725_v38, 16  ;;  %v1676_v43 = vshll.u32 %v2725_v38, 16  ;;  %v2915_v51 = vld [vmem:[%s3073_s8 + $0x74] sm:$0xf0]  ;;  %v1698_v11 = vrot.slane %v1696_v5, 5 }
  0x72   : > { %v1637_v60 = vor.u32 %v1636_v50, %v1633_v49  ;;  %v2935_v49 = vld [vmem:[%s3073_s8 + $0xfc] sm:$0xf0]  ;;  %v2675_v50 = vld [vmem:[%s3073_s8 + $0x70] sm:$0xf] }
  0x73   : > { %v1675_v54 = vrot.slane %v1673_v42, 4  ;;  %v2796_v59 = vor.u32 %v2935_v49, %v2795_v48  ;;  %v2676_v63 = vor.u32 %v2915_v51, %v2675_v50 }
  0x74   : > { %v1638_v1 = vrot.slane %v1637_v60, 4  ;;  %v2726_v60 = vld [vmem:[%s3073_s8 + $0x3c] sm:$0x1] }
  0x75   : > { %v1682_v3 = vshll.u32 %v2726_v60, 16 }
  0x76   : > { %v1643_v6 = vsel %vm3169_vm2, %v1638_v1, %v1642_v2 }
  0x77   : > { %v1720_v17 = vunpack.c.l.b16 %v1643_v6  ;;  %v1684_v9 = vrot.slane %v1682_v3, 5 }
  0x79   : > { %v1726_v28 = vpack.c.b16 %v1720_v17, %v1719_v16 }
  0x7b   : > { %772 = vmatmul.bf16.gmra.mxu2 %v696_v18  ;;  %v2914_v18 = vld [vmem:[%s3073_s8 + $0x64] sm:$0xf0] }
  0x7c   : > { %1288 = vmatmul.bf16.gmra.mxu1 %v1212_v19  ;;  %v1647_v19 = vrot.slane %v1645_v7, 4  ;;  %v2672_v27 = vor.u32 %v2914_v18, %v2671_v13 }
  0x7e   : > { %907 = vmatmul.bf16.gmra.mxu3 %v2400_v22  ;;  %1042 = vmatmul.bf16.gmra.mxu0 %v2472_v23  ;;  %v1664_v22 = vrot.slane %v1662_v10, 5  ;;  %v2722_v23 = vld [vmem:[%s3073_s8 + $0x2c] sm:$0x1]  ;;  %v1651_v29 = vor.u32 %v1650_v20, %v1647_v19  ;;  %v2607_v19 = vld [vmem:[%s3073_s8 + $0x38] sm:$0xf] }
  0x7f   : > { %v1654_v30 = vshll.u32 %v2722_v23, 16  ;;  %v2904_v20 = vld [vmem:[%s3073_s8 + $0x3c] sm:$0xf0] }
  0x80   : > { %v1665_v31 = vor.u32 %v1664_v22, %v1661_v21  ;;  %v1652_v34 = vrot.slane %v1651_v29, 4  ;;  %v2799_v21 = vld [vmem:[%s3073_s8 + $0x108] sm:$0xf]  ;;  %v2936_v22 = vld [vmem:[%s3073_s8 + $0x10c] sm:$0xf0]  ;;  %v2608_v29 = vor.u32 %v2904_v20, %v2607_v19 }
  0x81   : > { %v1656_v35 = vrot.slane %v1654_v30, 5  ;;  %v2679_v23 = vld [vmem:[%s3073_s8 + $0x80] sm:$0xf]  ;;  %v2800_v30 = vor.u32 %v2936_v22, %v2799_v21  ;;  %s2835_s8 = sshll.u32 %s3510_s22, 6 }
  0x82   : > { %v1666_v36 = vrot.slane %v1665_v31, 4  ;;  %s3452_s17 = scalar_lea.vmem %s3504_s4, %s2835_s8  ;;  %s3464_s20 = scalar_lea.vmem %s3503_s3, %s2835_s8 }
  0x83   : > { %v1657_v40 = vsel %vm3169_vm2, %v1652_v34, %v1656_v35  ;;  %v2680_v34 = vor.u32 %v2916_v24, %v2679_v23 }
  0x84   : > { %v1671_v41 = vsel %vm3169_vm2, %v1666_v36, %v1670_v37  ;;  %v1721_v52 = vunpack.c.l.b16 %v1657_v40 }
  0x85   : > { %v1722_v53 = vunpack.c.l.b16 %v1671_v41 }
  0x87   : > { %v1727_v0 = vpack.c.b16 %v1722_v53, %v1721_v52 }
  0x8b   : > { %1408 = vmatmul.bf16.vlgmr.msra.gmra.mxu2 %v2596_v55  ;;  %v1678_v55 = vrot.slane %v1676_v43, 5 }
  0x8c   : > { %1966 = vmatmul.bf16.vlgmr.msra.gmra.mxu1 %v2788_v57  ;;  %v1692_v57 = vrot.slane %v1690_v45, 5 }
  0x8d   : > { %v1679_v2 = vor.u32 %v1678_v55, %v1675_v54 }
  0x8e   : > { %1543 = vmatmul.bf16.vlgmr.msra.gmra.mxu3 %v2668_v56  ;;  %1789 = vmatmul.bf16.vlgmr.msra.gmra.mxu0 %v1725_v62  ;;  %v1689_v56 = vrot.slane %v1687_v44, 4 }
  0x8f   : > { %v1680_v8 = vrot.slane %v1679_v2, 4 }
  0x90   : > { %v1693_v4 = vor.u32 %v1692_v57, %v1689_v56 }
  0x91   : > { %v1685_v16 = vsel %vm3169_vm2, %v1680_v8, %v1684_v9 }
  0x92   : > { %v1694_v10 = vrot.slane %v1693_v4, 4 }
  0x94   : > { %v1699_v17 = vsel %vm3169_vm2, %v1694_v10, %v1698_v11 }
  0x9b   : > { %1413 = vmatmul.bf16.gmra.mxu2 %v2600_v25  ;;  %v1723_v25 = vunpack.c.l.b16 %v1685_v16 }
  0x9c   : > { %1971 = vmatmul.bf16.gmra.mxu1 %v2792_v26  ;;  %v1724_v26 = vunpack.c.l.b16 %v1699_v17 }
  0x9e   : > { %1548 = vmatmul.bf16.gmra.mxu3 %v2672_v27  ;;  %1794 = vmatmul.bf16.gmra.mxu0 %v1726_v28  ;;  %v1728_v35 = vpack.c.b16 %v1724_v26, %v1723_v25 }
  0xa8   : > { %v416_v1 = vpop.f32.mrf.mxu0 }
  0xa9   : > { %v517_v62 = vpop.f32.mrf.mxu1 }
  0xaa   : > { %v518_v6 = vadd.f32 %v517_v62, %v416_v1 }
  0xab   : > { %1418 = vmatmul.bf16.gmra.mxu2 %v2604_v58 }
  0xac   : > { %1976 = vmatmul.bf16.gmra.mxu1 %v2796_v59 }
  0xae   : > { %1553 = vmatmul.bf16.gmra.mxu3 %v2676_v63  ;;  %1799 = vmatmul.bf16.gmra.mxu0 %v1727_v0  ;;  %v426_v7 = vpop.f32.mrf.mxu2 }
  0xb0   : > { %v418_v15 = vpop.f32.mrf.mxu0 }
  0xb1   : > { %v527_v12 = vpop.f32.mrf.mxu3  ;;  %v519_v14 = vpop.f32.mrf.mxu1 }
  0xb2   : > { %v3423_v13 = vadd.f32 %v527_v12, %v426_v7  ;;  %v520_v18 = vadd.f32 %v519_v14, %v418_v15 }
  0xb6   : > { %v428_v27 = vpop.f32.mrf.mxu2 }
  0xb8   : > { %v421_v36 = vpop.f32.mrf.mxu0 }
  0xb9   : > { %v529_v28 = vpop.f32.mrf.mxu3  ;;  %v522_v32 = vpop.f32.mrf.mxu1 }
  0xba   : > { %v530_v31 = vadd.f32 %v529_v28, %v428_v27  ;;  %v523_v33 = vadd.f32 %v522_v32, %v421_v36 }
  0xbb   : > { %1423 = vmatmul.bf16.gmra.mxu2 %v2608_v29 }
  0xbc   : > { %1981 = vmatmul.bf16.gmra.mxu1 %v2800_v30 }
  0xbe   : > { %1558 = vmatmul.bf16.gmra.mxu3 %v2680_v34  ;;  %1804 = vmatmul.bf16.gmra.mxu0 %v1728_v35  ;;  %v431_v37 = vpop.f32.mrf.mxu2 }
  0xc0   : > { %v423_v41 = vpop.f32.mrf.mxu0 }
  0xc1   : > { %v532_v38 = vpop.f32.mrf.mxu3  ;;  %v524_v40 = vpop.f32.mrf.mxu1 }
  0xc2   : > { %v533_v39 = vadd.f32 %v532_v38, %v431_v37  ;;  %v525_v42 = vadd.f32 %v524_v40, %v423_v41 }
  0xc6   : > { %v433_v43 = vpop.f32.mrf.mxu2 }
  0xc9   : > { %v534_v44 = vpop.f32.mrf.mxu3  ;;  %v1274_v46 = vpop.f32.mrf.mxu1 }
  0xca   : > { %v535_v45 = vadd.f32 %v534_v44, %v433_v43 }
  0xcb   : > { %v1028_v47 = vpop.f32.mrf.mxu0 }
  0xce   : > { %v758_v48 = vpop.f32.mrf.mxu2 }
  0xcf   : > { %v778_v49 = vadd.f32 %v758_v48, %v518_v6 }
  0xd1   : > { %v893_v50 = vpop.f32.mrf.mxu3  ;;  %v1276_v51 = vpop.f32.mrf.mxu1 }
  0xd2   : > { %v913_v52 = vadd.f32 %v893_v50, %v778_v49 }
  0xd3   : > { %v1030_v53 = vpop.f32.mrf.mxu0 }
  0xd4   : > { %v1048_v54 = vadd.f32 %v1028_v47, %v913_v52 }
  0xd6   : > { %v1294_v55 = vadd.f32 %v1274_v46, %v1048_v54  ;;  %v760_v56 = vpop.f32.mrf.mxu2 }
  0xd7   : > { %v779_v57 = vadd.f32 %v760_v56, %v520_v18 }
  0xd9   : > { %v895_v58 = vpop.f32.mrf.mxu3  ;;  %v1279_v59 = vpop.f32.mrf.mxu1 }
  0xda   : > { %v914_v60 = vadd.f32 %v895_v58, %v779_v57 }
  0xdb   : > { %v1033_v61 = vpop.f32.mrf.mxu0 }
  0xdc   : > { %v1049_v62 = vadd.f32 %v1030_v53, %v914_v60 }
  0xde   : > { %v3435_v63 = vadd.f32 %v1276_v51, %v1049_v62  ;;  %v763_v0 = vpop.f32.mrf.mxu2 }
  0xdf   : > { %v780_v1 = vadd.f32 %v763_v0, %v523_v33 }
  0xe1   : > { %v898_v2 = vpop.f32.mrf.mxu3  ;;  %v1281_v3 = vpop.f32.mrf.mxu1 }
  0xe2   : > { %v915_v4 = vadd.f32 %v898_v2, %v780_v1 }
  0xe3   : > { %v1035_v5 = vpop.f32.mrf.mxu0 }
  0xe4   : > { %v1050_v6 = vadd.f32 %v1033_v61, %v915_v4 }
  0xe6   : > { %v3437_v7 = vadd.f32 %v1279_v59, %v1050_v6  ;;  %v765_v8 = vpop.f32.mrf.mxu2 }
  0xe7   : > { %v781_v9 = vadd.f32 %v765_v8, %v525_v42 }
  0xe9   : > { %v900_v10 = vpop.f32.mrf.mxu3  ;;  %v1284_v11 = vpop.f32.mrf.mxu1 }
  0xea   : > { %v916_v12 = vadd.f32 %v900_v10, %v781_v9 }
  0xeb   : > { %v1038_v14 = vpop.f32.mrf.mxu0 }
  0xec   : > { %v1051_v15 = vadd.f32 %v1035_v5, %v916_v12 }
  0xee   : > { %v3439_v16 = vadd.f32 %v1281_v3, %v1051_v15  ;;  %v768_v17 = vpop.f32.mrf.mxu2 }
  0xef   : > { %v782_v18 = vadd.f32 %v768_v17, %v3423_v13 }
  0xf1   : > { %v903_v19 = vpop.f32.mrf.mxu3  ;;  %v1286_v20 = vpop.f32.mrf.mxu1 }
  0xf2   : > { %v917_v21 = vadd.f32 %v903_v19, %v782_v18 }
  0xf3   : > { %v1040_v22 = vpop.f32.mrf.mxu0 }
  0xf4   : > { %v1052_v23 = vadd.f32 %v1038_v14, %v917_v21 }
  0xf6   : > { %v3442_v24 = vadd.f32 %v1284_v11, %v1052_v23  ;;  %v770_v25 = vpop.f32.mrf.mxu2 }
  0xf7   : > { %v783_v26 = vadd.f32 %v770_v25, %v530_v31 }
  0xf9   : > { %v905_v27 = vpop.f32.mrf.mxu3  ;;  %v1289_v28 = vpop.f32.mrf.mxu1 }
  0xfa   : > { %v918_v29 = vadd.f32 %v905_v27, %v783_v26 }
  0xfb   : > { %v1043_v30 = vpop.f32.mrf.mxu0 }
  0xfc   : > { %v1053_v32 = vadd.f32 %v1040_v22, %v918_v29 }
  0xfe   : > { %v3444_v34 = vadd.f32 %v1286_v20, %v1053_v32  ;;  %v773_v35 = vpop.f32.mrf.mxu2 }
  0xff   : > { %v784_v36 = vadd.f32 %v773_v35, %v533_v39 }
 0x101   : > { %v908_v13 = vpop.f32.mrf.mxu3  ;;  %v1291_v33 = vpop.f32.mrf.mxu1 }
 0x102   : > { %v919_v37 = vadd.f32 %v908_v13, %v784_v36 }
 0x103   : > { %v1045_v38 = vpop.f32.mrf.mxu0 }
 0x104   : > { %v1054_v40 = vadd.f32 %v1043_v30, %v919_v37 }
 0x106   : > { %v3447_v41 = vadd.f32 %v1289_v28, %v1054_v40  ;;  %v775_v42 = vpop.f32.mrf.mxu2 }
 0x107   : > { %v785_v31 = vadd.f32 %v775_v42, %v535_v45 }
 0x109   : > { %v910_v43 = vpop.f32.mrf.mxu3  ;;  %v3454_v44 = vpop.f32.mrf.mxu1 }
 0x10a   : > { %v920_v39 = vadd.f32 %v910_v43, %v785_v31  ;;  %1987 = vst [vmem:[%s3452_s17] sm:$0xff] %v3454_v44 }
 0x10b   : > { %v1790_v46 = vpop.f32.mrf.mxu0 }
 0x10c   : > { %v1055_v47 = vadd.f32 %v1045_v38, %v920_v39 }
 0x10e   : > { %v3458_v48 = vadd.f32 %v1291_v33, %v1055_v47  ;;  %v1409_v49 = vpop.f32.mrf.mxu2 }
 0x10f   : > { %v1429_v50 = vadd.f32 %v1409_v49, %v1294_v55 }
 0x111   : > { %v1544_v51 = vpop.f32.mrf.mxu3  ;;  %v1969_v52 = vpop.f32.mrf.mxu1 }
 0x112   : > { %v1564_v53 = vadd.f32 %v1544_v51, %v1429_v50  ;;  %1988 = vst [vmem:[%s3452_s17 + $0x8] sm:$0xff] %v1969_v52  ;;  %v2010_v30 = vmul.f32 %v1969_v52, %v1969_v52  ;;  %v1995_v36 = vadd.f32 %v1969_v52, %v3454_v44 }
 0x113   : > { %v1792_v45 = vpop.f32.mrf.mxu0 }
 0x114   : > { %v1810_v54 = vadd.f32 %v1790_v46, %v1564_v53 }
 0x116   : > { %1818 = vst [vmem:[%s3464_s20] sm:$0xff] %v1810_v54  ;;  %v1411_v56 = vpop.f32.mrf.mxu2  ;;  %v1840_v62 = vmul.f32 %v1810_v54, %v1810_v54 }
 0x117   : > { %v1430_v57 = vadd.f32 %v1411_v56, %v3435_v63 }
 0x119   : > { %v1546_v58 = vpop.f32.mrf.mxu3  ;;  %v1972_v55 = vpop.f32.mrf.mxu1 }
 0x11a   : > { %v1565_v59 = vadd.f32 %v1546_v58, %v1430_v57  ;;  %1989 = vst [vmem:[%s3452_s17 + $0x10] sm:$0xff] %v1972_v55  ;;  %v2011_v35 = vmul.f32 %v1972_v55, %v1972_v55  ;;  %v1996_v42 = vadd.f32 %v1995_v36, %v1972_v55 }
 0x11b   : > { %v1795_v60 = vpop.f32.mrf.mxu0 }
 0x11c   : > { %v1811_v61 = vadd.f32 %v1792_v45, %v1565_v59 }
 0x11e   : > { %1819 = vst [vmem:[%s3464_s20 + $0x8] sm:$0xff] %v1811_v61  ;;  %v1826_v0 = vadd.f32 %v1811_v61, %v1810_v54  ;;  %v1841_v1 = vmul.f32 %v1811_v61, %v1811_v61  ;;  %v1414_v2 = vpop.f32.mrf.mxu2 }
 0x11f   : > { %v1431_v4 = vadd.f32 %v1414_v2, %v3437_v7 }
 0x120   : > { %v1848_v3 = vadd.f32 %v1841_v1, %v1840_v62 }
 0x121   : > { %v1549_v5 = vpop.f32.mrf.mxu3  ;;  %v1974_v6 = vpop.f32.mrf.mxu1 }
 0x122   : > { %v1566_v63 = vadd.f32 %v1549_v5, %v1431_v4  ;;  %1990 = vst [vmem:[%s3452_s17 + $0x18] sm:$0xff] %v1974_v6  ;;  %v2012_v38 = vmul.f32 %v1974_v6, %v1974_v6  ;;  %v1997_v50 = vadd.f32 %v1996_v42, %v1974_v6 }
 0x123   : > { %v1797_v8 = vpop.f32.mrf.mxu0 }
 0x124   : > { %v1812_v9 = vadd.f32 %v1795_v60, %v1566_v63 }
 0x126   : > { %1820 = vst [vmem:[%s3464_s20 + $0x10] sm:$0xff] %v1812_v9  ;;  %v1827_v10 = vadd.f32 %v1826_v0, %v1812_v9  ;;  %v1842_v11 = vmul.f32 %v1812_v9, %v1812_v9  ;;  %v1416_v12 = vpop.f32.mrf.mxu2 }
 0x127   : > { %v1432_v15 = vadd.f32 %v1416_v12, %v3439_v16  ;;  %v2009_v16 = vmul.f32 %v3454_v44, %v3454_v44 }
 0x128   : > { %v1849_v14 = vadd.f32 %v1848_v3, %v1842_v11 }
 0x129   : > { %v1551_v17 = vpop.f32.mrf.mxu3  ;;  %v1977_v18 = vpop.f32.mrf.mxu1  ;;  %v2017_v37 = vadd.f32 %v2010_v30, %v2009_v16 }
 0x12a   : > { %v1567_v19 = vadd.f32 %v1551_v17, %v1432_v15  ;;  %1991 = vst [vmem:[%s3452_s17 + $0x20] sm:$0xff] %v1977_v18  ;;  %v2013_v47 = vmul.f32 %v1977_v18, %v1977_v18  ;;  %v1998_v52 = vadd.f32 %v1997_v50, %v1977_v18 }
 0x12b   : > { %v1800_v20 = vpop.f32.mrf.mxu0  ;;  %v2018_v46 = vadd.f32 %v2017_v37, %v2011_v35 }
 0x12c   : > { %v1813_v7 = vadd.f32 %v1797_v8, %v1567_v19 }
 0x12d   : > { %v2019_v44 = vadd.f32 %v2018_v46, %v2012_v38 }
 0x12e   : > { %1821 = vst [vmem:[%s3464_s20 + $0x18] sm:$0xff] %v1813_v7  ;;  %v1828_v21 = vadd.f32 %v1827_v10, %v1813_v7  ;;  %v1843_v22 = vmul.f32 %v1813_v7, %v1813_v7  ;;  %v1419_v23 = vpop.f32.mrf.mxu2 }
 0x12f   : > { %v1433_v26 = vadd.f32 %v1419_v23, %v3442_v24  ;;  %v2020_v54 = vadd.f32 %v2019_v44, %v2013_v47 }
 0x130   : > { %v1850_v25 = vadd.f32 %v1849_v14, %v1843_v22 }
 0x131   : > { %v1554_v27 = vpop.f32.mrf.mxu3  ;;  %v1979_v28 = vpop.f32.mrf.mxu1 }
 0x132   : > { %v1568_v29 = vadd.f32 %v1554_v27, %v1433_v26  ;;  %1992 = vst [vmem:[%s3452_s17 + $0x28] sm:$0xff] %v1979_v28  ;;  %v2014_v53 = vmul.f32 %v1979_v28, %v1979_v28  ;;  %v1999_v56 = vadd.f32 %v1998_v52, %v1979_v28 }
 0x133   : > { %v1802_v40 = vpop.f32.mrf.mxu0 }
 0x134   : > { %v1814_v32 = vadd.f32 %v1800_v20, %v1568_v29 }
 0x136   : > { %1822 = vst [vmem:[%s3464_s20 + $0x20] sm:$0xff] %v1814_v32  ;;  %v1829_v13 = vadd.f32 %v1828_v21, %v1814_v32  ;;  %v1844_v33 = vmul.f32 %v1814_v32, %v1814_v32  ;;  %v1421_v24 = vpop.f32.mrf.mxu2 }
 0x137   : > { %v1434_v43 = vadd.f32 %v1421_v24, %v3444_v34  ;;  %v2021_v34 = vadd.f32 %v2020_v54, %v2014_v53 }
 0x138   : > { %v1851_v31 = vadd.f32 %v1850_v25, %v1844_v33 }
 0x139   : > { %v1556_v39 = vpop.f32.mrf.mxu3  ;;  %v1982_v49 = vpop.f32.mrf.mxu1 }
 0x13a   : > { %v1569_v51 = vadd.f32 %v1556_v39, %v1434_v43  ;;  %1993 = vst [vmem:[%s3452_s17 + $0x30] sm:$0xff] %v1982_v49  ;;  %v2015_v55 = vmul.f32 %v1982_v49, %v1982_v49  ;;  %v2000_v61 = vadd.f32 %v1999_v56, %v1982_v49 }
 0x13b   : > { %v1805_v1 = vpop.f32.mrf.mxu0 }
 0x13c   : > { %v1815_v45 = vadd.f32 %v1802_v40, %v1569_v51  ;;  %v2022_v3 = vadd.f32 %v2021_v34, %v2015_v55 }
 0x13e   : > { %1823 = vst [vmem:[%s3464_s20 + $0x28] sm:$0xff] %v1815_v45  ;;  %v1830_v57 = vadd.f32 %v1829_v13, %v1815_v45  ;;  %v1845_v58 = vmul.f32 %v1815_v45, %v1815_v45  ;;  %v1424_v59 = vpop.f32.mrf.mxu2 }
 0x13f   : > { %v1435_v62 = vadd.f32 %v1424_v59, %v3447_v41 }
 0x140   : > { %v1852_v60 = vadd.f32 %v1851_v31, %v1845_v58 }
 0x141   : > { %v1559_v0 = vpop.f32.mrf.mxu3  ;;  %v1984_v2 = vpop.f32.mrf.mxu1 }
 0x142   : > { %v1570_v4 = vadd.f32 %v1559_v0, %v1435_v62  ;;  %1994 = vst [vmem:[%s3452_s17 + $0x38] sm:$0xff] %v1984_v2  ;;  %v2001_v5 = vadd.f32 %v2000_v61, %v1984_v2  ;;  %v2016_v6 = vmul.f32 %v1984_v2, %v1984_v2 }
 0x143   : > { %v1807_v23 = vpop.f32.mrf.mxu0 }
 0x144   : > { %v1816_v63 = vadd.f32 %v1805_v1, %v1570_v4  ;;  %v2002_v8 = vrot.slane %v2001_v5, 4  ;;  %v2023_v9 = vadd.f32 %v2022_v3, %v2016_v6 }
 0x146   : > { %1824 = vst [vmem:[%s3464_s20 + $0x30] sm:$0xff] %v1816_v63  ;;  %v1831_v10 = vadd.f32 %v1830_v57, %v1816_v63  ;;  %v1846_v11 = vmul.f32 %v1816_v63, %v1816_v63  ;;  %v2003_v12 = vadd.f32 %v2002_v8, %v2001_v5  ;;  %v2024_v14 = vrot.slane %v2023_v9, 4  ;;  %v1426_v15 = vpop.f32.mrf.mxu2 }
 0x147   : > { %v1436_v19 = vadd.f32 %v1426_v15, %v3458_v48 }
 0x148   : > { %v1853_v17 = vadd.f32 %v1852_v60, %v1846_v11  ;;  %v2004_v41 = vrot.slane %v2003_v12, 2  ;;  %v2025_v18 = vadd.f32 %v2024_v14, %v2023_v9 }
 0x149   : > { %v1561_v7 = vpop.f32.mrf.mxu3 }
 0x14a   : > { %v2005_v20 = vadd.f32 %v2004_v41, %v2003_v12  ;;  %v2026_v21 = vrot.slane %v2025_v18, 2  ;;  %v1571_v22 = vadd.f32 %v1561_v7, %v1436_v19 }
 0x14c   : > { %v2006_v25 = vrot.slane %v2005_v20, 1  ;;  %v2027_v26 = vadd.f32 %v2026_v21, %v2025_v18  ;;  %v1817_v27 = vadd.f32 %v1807_v23, %v1571_v22 }
 0x14e   : > { %v2007_v28 = vadd.f32 %v2006_v25, %v2005_v20  ;;  %v2028_v29 = vrot.slane %v2027_v26, 1  ;;  %1825 = vst [vmem:[%s3464_s20 + $0x38] sm:$0xff] %v1817_v27  ;;  %v1832_v16 = vadd.f32 %v1831_v10, %v1817_v27  ;;  %v1847_v30 = vmul.f32 %v1817_v27, %v1817_v27 }
 0x150   : > { %2008 = vst [vmem:[%s284_s26] sm:$0x1] %v2007_v28  ;;  %v2029_v48 = vadd.f32 %v2028_v29, %v2027_v26  ;;  %v1833_v32 = vrot.slane %v1832_v16, 4  ;;  %v1854_v35 = vadd.f32 %v1853_v17, %v1847_v30 }
 0x152   : > { %2030 = vst [vmem:[%s284_s26 + $0x1] sm:$0x1] %v2029_v48  ;;  %v1834_v36 = vadd.f32 %v1833_v32, %v1832_v16  ;;  %v1855_v13 = vrot.slane %v1854_v35, 4 }
 0x154   : > { %v1835_v33 = vrot.slane %v1834_v36, 2  ;;  %v1856_v37 = vadd.f32 %v1855_v13, %v1854_v35 }
 0x156   : > { %v1836_v38 = vadd.f32 %v1835_v33, %v1834_v36  ;;  %v1857_v40 = vrot.slane %v1856_v37, 2 }
 0x158   : > { %v1837_v24 = vrot.slane %v1836_v38, 1  ;;  %v1858_v42 = vadd.f32 %v1857_v40, %v1856_v37 }
 0x15a   : > { %v1838_v31 = vadd.f32 %v1837_v24, %v1836_v38  ;;  %v1859_v43 = vrot.slane %v1858_v42, 1 }
 0x15c   : > { %1839 = vst [vmem:[%s280_s28] sm:$0x1] %v1838_v31  ;;  %v1860_v39 = vadd.f32 %v1859_v43, %v1858_v42 }
 0x15e   : > { %1861 = vst [vmem:[%s280_s28 + $0x1] sm:$0x1] %v1860_v39 }
 0x15f PF: > { %s17_s21 = sadd.s32 1, %s2976_s21  }
 0x160   : > { %p14_p4 = scmp.ge.s32.totalorder %s17_s21, 4  }
 0x162   :  { %16 = sbr.rel (!%p14_p4) target bundleno = 1 (0x1), region = 111 }

</bundles_post_ra>
